<compile_context>
chip_gen: v6e
topology: v6e:2x2x1
jax: 0.10.0
libtpu: 0.0.40
codegen_flags: <defaults>
</compile_context>

<pallas_src>
import jax
import jax.numpy as jnp
from jax.experimental import pallas as pl
from jax.experimental.pallas import tpu as pltpu

NEG_SLOPE = 0.1
LANE = 128


def _round_up(n, m):
    return ((n + m - 1) // m) * m


def _device_kind():
    try:
        return jax.devices()[0].device_kind.lower()
    except Exception:
        return ""


def _default_min_tiles():
    # v7x has 2 TensorCores per chip; the "parallel" grid axis only helps if both
    # cores get grid steps. Everything else runs best with as few tiles as possible.
    kind = _device_kind()
    if "v7" in kind or "tpu7" in kind:
        return 2
    return 1


def _default_epilogue_dtype():
    # bf16 VPU exists on v6e/v7x; keep f32 epilogue on v5e (and unknown chips) to avoid
    # emulated bf16 vector ops / regressions where the MXU is the binding slot anyway.
    kind = _device_kind()
    if "v6" in kind or "v7" in kind or "tpu7" in kind:
        return jnp.bfloat16
    return jnp.float32


def _leaky_relu(x):
    # max-form: one fewer VALU op than where(x > 0, x, 0.1 * x); identical result.
    return jnp.maximum(x, NEG_SLOPE * x)


def labeled_ae_kernel(
    x_ref,
    # encoder params (bf16 weights, epilogue-dtype biases)
    we1, be1, we2, be2, we3, be3, we4, be4,
    # decoder params
    wd1, bd1, wd2, bd2, wd3, bd3, wd4, bd4,
    out_ref,
):
    def lin(h, w_ref, b_ref, act):
        # bf16 x bf16 on the MXU with f32 accumulation; epilogue (bias + LeakyReLU) in the
        # bias dtype (bf16 on v6e/v7x, f32 on v5e) with a single down-cast of the dot.
        y = jnp.dot(h.astype(jnp.bfloat16), w_ref[...],
                    preferred_element_type=jnp.float32)
        y = y.astype(b_ref.dtype) + b_ref[...]
        return _leaky_relu(y) if act else y

    h = x_ref[...]                      # (TB, 128) bf16 tile, already lane-dense

    # encoder: input -> 512 -> 256 -> 128 -> enc(padded to 128), LeakyReLU(0.1) each
    h = lin(h, we1, be1, True)
    h = lin(h, we2, be2, True)
    h = lin(h, we3, be3, True)
    encoded = lin(h, we4, be4, True)    # padded lanes are exactly 0

    # decoder: enc -> 128 -> 256 -> 512 -> input(padded to 128), LeakyReLU on all but last
    h = lin(encoded, wd1, bd1, True)
    h = lin(h, wd2, bd2, True)
    h = lin(h, wd3, bd3, True)
    decoded = lin(h, wd4, bd4, False)

    out_ref[...] = decoded.astype(out_ref.dtype)


def init_params(key, input_dim, encoding_dim):
    """f32 params mimicking nn.Linear's U(-1/sqrt(fan_in), 1/sqrt(fan_in)) init."""
    enc_dims = [(input_dim, 512), (512, 256), (256, 128), (128, encoding_dim)]
    dec_dims = [(encoding_dim, 128), (128, 256), (256, 512), (512, input_dim)]
    params = []
    for (fan_in, fan_out) in enc_dims + dec_dims:
        key, kw, kb = jax.random.split(key, 3)
        bound = 1.0 / jnp.sqrt(fan_in)
        w = jax.random.uniform(kw, (fan_in, fan_out), jnp.float32, -bound, bound)
        b = jax.random.uniform(kb, (1, fan_out), jnp.float32, -bound, bound)
        params.extend([w, b])
    return params


def pad_params(params, input_dim, encoding_dim, epilogue_dtype=jnp.float32):
    """Zero-pad the input_dim / encoding_dim facing dims up to 128 lanes, cast weights to
    bf16 and biases to the epilogue dtype. Exact: LeakyReLU(0)=0 and zero rows/columns
    contribute nothing to the matmuls."""
    d_in_p = _round_up(input_dim, LANE)
    d_enc_p = _round_up(encoding_dim, LANE)
    padded = []
    for idx in range(8):
        w = params[2 * idx]
        b = params[2 * idx + 1]
        fan_in, fan_out = w.shape
        if idx == 0:   # we1: pad input rows
            w = jnp.pad(w, ((0, d_in_p - fan_in), (0, 0)))
        if idx == 4:   # wd1: pad encoding rows
            w = jnp.pad(w, ((0, d_enc_p - fan_in), (0, 0)))
        if idx == 3:   # we4: pad encoding columns (+ bias)
            w = jnp.pad(w, ((0, 0), (0, d_enc_p - fan_out)))
            b = jnp.pad(b, ((0, 0), (0, d_enc_p - fan_out)))
        if idx == 7:   # wd4: pad output columns (+ bias)
            w = jnp.pad(w, ((0, 0), (0, d_in_p - fan_out)))
            b = jnp.pad(b, ((0, 0), (0, d_in_p - fan_out)))
        padded.extend([w.astype(jnp.bfloat16), b.astype(epilogue_dtype)])
    return padded


def labeled_ae_forward(x, params, *, encoding_dim, tile_batch=512,
                       min_tiles=None, epilogue_dtype=None):
    """forward(x) = decoder(encoder(x)); params is the flat f32 list from init_params."""
    batch, input_dim = x.shape
    d_in_p = _round_up(input_dim, LANE)

    if min_tiles is None:
        min_tiles = _default_min_tiles()
    if epilogue_dtype is None:
        epilogue_dtype = _default_epilogue_dtype()

    padded_params = pad_params(params, input_dim, encoding_dim, epilogue_dtype)

    # Batch tile: multiple of 8 sublanes, at most tile_batch rows per grid step, and
    # small enough that the grid has >= min_tiles steps (2 on v7x to feed both TCs).
    b8 = max(_round_up(batch, 8), 8)
    tb = min(tile_batch, _round_up(pl.cdiv(b8, min_tiles), 8))
    tb = max(tb, 8)
    b_pad = _round_up(batch, tb)
    num_tiles = b_pad // tb

    # Lane-dense bf16 input slab (zero-padded rows/cols are exact no-ops).
    x_p = jnp.zeros((b_pad, d_in_p), jnp.bfloat16)
    x_p = x_p.at[:batch, :input_dim].set(x.astype(jnp.bfloat16))

    act_spec = pl.BlockSpec((tb, d_in_p), lambda i: (i, 0))
    out_spec = pl.BlockSpec((tb, d_in_p), lambda i: (i, 0))
    # Constant index maps -> weights/biases stay VMEM-resident across the whole grid.
    param_specs = [pl.BlockSpec(p.shape, lambda i: (0, 0)) for p in padded_params]

    layer_dims = [p.shape for p in padded_params[0::2]]
    flops = 2 * b_pad * sum(k * n for k, n in layer_dims)
    param_bytes = sum(int(p.size) * p.dtype.itemsize for p in padded_params)
    io_bytes = int(x_p.size) * 2 + b_pad * d_in_p * 4
    cost = pl.CostEstimate(flops=int(flops), transcendentals=0,
                           bytes_accessed=int(param_bytes + io_bytes))

    out_padded = pl.pallas_call(
        labeled_ae_kernel,
        out_shape=jax.ShapeDtypeStruct((b_pad, d_in_p), jnp.float32),
        grid=(num_tiles,),
        in_specs=[act_spec] + param_specs,
        out_specs=out_spec,
        compiler_params=pltpu.CompilerParams(
            dimension_semantics=("parallel",)),
        cost_estimate=cost,
    )(x_p, *padded_params)

    return out_padded[:batch, :input_dim]


def reference_forward_quantized(x_p_bf16, padded_params):
    """Pure-JAX reference applying the same bf16 weight / epilogue-dtype rounding."""
    h = x_p_bf16
    acts = [True] * 7 + [False]
    for i, act in enumerate(acts):
        w, b = padded_params[2 * i], padded_params[2 * i + 1]
        y = jnp.dot(h.astype(jnp.bfloat16), w, preferred_element_type=jnp.float32)
        y = y.astype(b.dtype) + b
        h = jnp.maximum(y, NEG_SLOPE * y) if act else y
    return h.astype(jnp.float32)


if __name__ == "__main__":
    # NOTE: forward() = decoder(encoder(x)) only.
    # TODO(synk): clusterize() (sklearn DBSCAN/KMeans), the classifier head and the
    # training/loss machinery are not part of forward() and have no Pallas equivalent.
    batch = 256          # one 256-row tile on v5e/v6e; two 128-row tiles on v7x (2 TCs)
    input_dim = 32
    encoding_dim = 2

    key = jax.random.PRNGKey(0)
    key_x, key_p = jax.random.split(key)
    x = jax.random.normal(key_x, (batch, input_dim), jnp.float32)
    params = init_params(key_p, input_dim, encoding_dim)

    out = labeled_ae_forward(x, params, encoding_dim=encoding_dim)
    out = jax.block_until_ready(out)
    assert out.shape == (batch, input_dim)

    # Reference with identical bf16 quantization / epilogue dtype / zero padding.
    epi_dtype = _default_epilogue_dtype()
    padded = pad_params(params, input_dim, encoding_dim, epi_dtype)
    d_in_p = _round_up(input_dim, LANE)
    x_p = jnp.zeros((batch, d_in_p), jnp.bfloat16)
    x_p = x_p.at[:, :input_dim].set(x.astype(jnp.bfloat16))
    ref = reference_forward_quantized(x_p, padded)[:, :input_dim]
    assert jnp.allclose(out, ref, atol=2e-2, rtol=2e-2), "mismatch vs reference"

    print("KERNEL_OK")
</pallas_src>

<mosaic_0001>
module attributes {stable_mosaic.version = 11 : i64} {
  func.func @labeled_ae_kernel(%arg0: i32, %arg1: memref<256x128xbf16, #tpu.memory_space<vmem>>, %arg2: memref<128x512xbf16, #tpu.memory_space<vmem>>, %arg3: memref<1x512xf32, #tpu.memory_space<vmem>>, %arg4: memref<512x256xbf16, #tpu.memory_space<vmem>>, %arg5: memref<1x256xf32, #tpu.memory_space<vmem>>, %arg6: memref<256x128xbf16, #tpu.memory_space<vmem>>, %arg7: memref<1x128xf32, #tpu.memory_space<vmem>>, %arg8: memref<128x128xbf16, #tpu.memory_space<vmem>>, %arg9: memref<1x128xf32, #tpu.memory_space<vmem>>, %arg10: memref<128x128xbf16, #tpu.memory_space<vmem>>, %arg11: memref<1x128xf32, #tpu.memory_space<vmem>>, %arg12: memref<128x256xbf16, #tpu.memory_space<vmem>>, %arg13: memref<1x256xf32, #tpu.memory_space<vmem>>, %arg14: memref<256x512xbf16, #tpu.memory_space<vmem>>, %arg15: memref<1x512xf32, #tpu.memory_space<vmem>>, %arg16: memref<512x128xbf16, #tpu.memory_space<vmem>>, %arg17: memref<1x128xf32, #tpu.memory_space<vmem>>, %arg18: memref<256x128xf32, #tpu.memory_space<vmem>>) attributes {dimension_semantics = [#tpu.dimension_semantics<parallel>], iteration_bounds = array<i64: 1>, scalar_prefetch = 0 : i64, scratch_operands = 0 : i64, tpu.core_type = #tpu.core_type<tc>, window_params = [{transform_indices = @transform_0, window_bounds = array<i64: 256, 128>}, {pipeline_mode = #tpu.pipeline_mode<synchronous>, transform_indices = @transform_1, window_bounds = array<i64: 128, 512>}, {pipeline_mode = #tpu.pipeline_mode<synchronous>, transform_indices = @transform_2, window_bounds = array<i64: 1, 512>}, {pipeline_mode = #tpu.pipeline_mode<synchronous>, transform_indices = @transform_3, window_bounds = array<i64: 512, 256>}, {pipeline_mode = #tpu.pipeline_mode<synchronous>, transform_indices = @transform_4, window_bounds = array<i64: 1, 256>}, {pipeline_mode = #tpu.pipeline_mode<synchronous>, transform_indices = @transform_5, window_bounds = array<i64: 256, 128>}, {pipeline_mode = #tpu.pipeline_mode<synchronous>, transform_indices = @transform_6, window_bounds = array<i64: 1, 128>}, {pipeline_mode = #tpu.pipeline_mode<synchronous>, transform_indices = @transform_7, window_bounds = array<i64: 128, 128>}, {pipeline_mode = #tpu.pipeline_mode<synchronous>, transform_indices = @transform_8, window_bounds = array<i64: 1, 128>}, {pipeline_mode = #tpu.pipeline_mode<synchronous>, transform_indices = @transform_9, window_bounds = array<i64: 128, 128>}, {pipeline_mode = #tpu.pipeline_mode<synchronous>, transform_indices = @transform_10, window_bounds = array<i64: 1, 128>}, {pipeline_mode = #tpu.pipeline_mode<synchronous>, transform_indices = @transform_11, window_bounds = array<i64: 128, 256>}, {pipeline_mode = #tpu.pipeline_mode<synchronous>, transform_indices = @transform_12, window_bounds = array<i64: 1, 256>}, {pipeline_mode = #tpu.pipeline_mode<synchronous>, transform_indices = @transform_13, window_bounds = array<i64: 256, 512>}, {pipeline_mode = #tpu.pipeline_mode<synchronous>, transform_indices = @transform_14, window_bounds = array<i64: 1, 512>}, {pipeline_mode = #tpu.pipeline_mode<synchronous>, transform_indices = @transform_15, window_bounds = array<i64: 512, 128>}, {pipeline_mode = #tpu.pipeline_mode<synchronous>, transform_indices = @transform_16, window_bounds = array<i64: 1, 128>}, {transform_indices = @transform_17, window_bounds = array<i64: 256, 128>}]} {
    %c0 = arith.constant 0 : index
    %c0_0 = arith.constant 0 : index
    %0 = vector.load %arg1[%c0, %c0_0] : memref<256x128xbf16, #tpu.memory_space<vmem>>, vector<256x128xbf16>
    %c0_1 = arith.constant 0 : index
    %c0_2 = arith.constant 0 : index
    %1 = vector.load %arg2[%c0_1, %c0_2] : memref<128x512xbf16, #tpu.memory_space<vmem>>, vector<128x512xbf16>
    %cst = arith.constant dense<0.000000e+00> : vector<256x512xf32>
    %2 = tpu.matmul %0, %1, %cst {dimension_numbers = #tpu.dot_dimension_numbers<[1], [0], [0], [1], [0, 0, 1, 1], [], []>} : vector<256x128xbf16>, vector<128x512xbf16>, vector<256x512xf32> -> vector<256x512xf32>
    %c0_3 = arith.constant 0 : index
    %c0_4 = arith.constant 0 : index
    %3 = vector.load %arg3[%c0_3, %c0_4] : memref<1x512xf32, #tpu.memory_space<vmem>>, vector<1x512xf32>
    %4 = vector.broadcast %3 : vector<1x512xf32> to vector<256x512xf32>
    %5 = arith.addf %2, %4 : vector<256x512xf32>
    %cst_5 = arith.constant 1.000000e-01 : f32
    %6 = vector.broadcast %cst_5 : f32 to vector<256x512xf32>
    %7 = arith.mulf %6, %5 : vector<256x512xf32>
    %8 = arith.maximumf %5, %7 : vector<256x512xf32>
    %9 = arith.truncf %8 : vector<256x512xf32> to vector<256x512xbf16>
    %c0_6 = arith.constant 0 : index
    %c0_7 = arith.constant 0 : index
    %10 = vector.load %arg4[%c0_6, %c0_7] : memref<512x256xbf16, #tpu.memory_space<vmem>>, vector<512x256xbf16>
    %cst_8 = arith.constant dense<0.000000e+00> : vector<256x256xf32>
    %11 = tpu.matmul %9, %10, %cst_8 {dimension_numbers = #tpu.dot_dimension_numbers<[1], [0], [0], [1], [0, 0, 1, 1], [], []>} : vector<256x512xbf16>, vector<512x256xbf16>, vector<256x256xf32> -> vector<256x256xf32>
    %c0_9 = arith.constant 0 : index
    %c0_10 = arith.constant 0 : index
    %12 = vector.load %arg5[%c0_9, %c0_10] : memref<1x256xf32, #tpu.memory_space<vmem>>, vector<1x256xf32>
    %13 = vector.broadcast %12 : vector<1x256xf32> to vector<256x256xf32>
    %14 = arith.addf %11, %13 : vector<256x256xf32>
    %cst_11 = arith.constant 1.000000e-01 : f32
    %15 = vector.broadcast %cst_11 : f32 to vector<256x256xf32>
    %16 = arith.mulf %15, %14 : vector<256x256xf32>
    %17 = arith.maximumf %14, %16 : vector<256x256xf32>
    %18 = arith.truncf %17 : vector<256x256xf32> to vector<256x256xbf16>
    %c0_12 = arith.constant 0 : index
    %c0_13 = arith.constant 0 : index
    %19 = vector.load %arg6[%c0_12, %c0_13] : memref<256x128xbf16, #tpu.memory_space<vmem>>, vector<256x128xbf16>
    %cst_14 = arith.constant dense<0.000000e+00> : vector<256x128xf32>
    %20 = tpu.matmul %18, %19, %cst_14 {dimension_numbers = #tpu.dot_dimension_numbers<[1], [0], [0], [1], [0, 0, 1, 1], [], []>} : vector<256x256xbf16>, vector<256x128xbf16>, vector<256x128xf32> -> vector<256x128xf32>
    %c0_15 = arith.constant 0 : index
    %c0_16 = arith.constant 0 : index
    %21 = vector.load %arg7[%c0_15, %c0_16] : memref<1x128xf32, #tpu.memory_space<vmem>>, vector<1x128xf32>
    %22 = vector.broadcast %21 : vector<1x128xf32> to vector<256x128xf32>
    %23 = arith.addf %20, %22 : vector<256x128xf32>
    %cst_17 = arith.constant 1.000000e-01 : f32
    %24 = vector.broadcast %cst_17 : f32 to vector<256x128xf32>
    %25 = arith.mulf %24, %23 : vector<256x128xf32>
    %26 = arith.maximumf %23, %25 : vector<256x128xf32>
    %27 = arith.truncf %26 : vector<256x128xf32> to vector<256x128xbf16>
    %c0_18 = arith.constant 0 : index
    %c0_19 = arith.constant 0 : index
    %28 = vector.load %arg8[%c0_18, %c0_19] : memref<128x128xbf16, #tpu.memory_space<vmem>>, vector<128x128xbf16>
    %cst_20 = arith.constant dense<0.000000e+00> : vector<256x128xf32>
    %29 = tpu.matmul %27, %28, %cst_20 {dimension_numbers = #tpu.dot_dimension_numbers<[1], [0], [0], [1], [0, 0, 1, 1], [], []>} : vector<256x128xbf16>, vector<128x128xbf16>, vector<256x128xf32> -> vector<256x128xf32>
    %c0_21 = arith.constant 0 : index
    %c0_22 = arith.constant 0 : index
    %30 = vector.load %arg9[%c0_21, %c0_22] : memref<1x128xf32, #tpu.memory_space<vmem>>, vector<1x128xf32>
    %31 = vector.broadcast %30 : vector<1x128xf32> to vector<256x128xf32>
    %32 = arith.addf %29, %31 : vector<256x128xf32>
    %cst_23 = arith.constant 1.000000e-01 : f32
    %33 = vector.broadcast %cst_23 : f32 to vector<256x128xf32>
    %34 = arith.mulf %33, %32 : vector<256x128xf32>
    %35 = arith.maximumf %32, %34 : vector<256x128xf32>
    %36 = arith.truncf %35 : vector<256x128xf32> to vector<256x128xbf16>
    %c0_24 = arith.constant 0 : index
    %c0_25 = arith.constant 0 : index
    %37 = vector.load %arg10[%c0_24, %c0_25] : memref<128x128xbf16, #tpu.memory_space<vmem>>, vector<128x128xbf16>
    %cst_26 = arith.constant dense<0.000000e+00> : vector<256x128xf32>
    %38 = tpu.matmul %36, %37, %cst_26 {dimension_numbers = #tpu.dot_dimension_numbers<[1], [0], [0], [1], [0, 0, 1, 1], [], []>} : vector<256x128xbf16>, vector<128x128xbf16>, vector<256x128xf32> -> vector<256x128xf32>
    %c0_27 = arith.constant 0 : index
    %c0_28 = arith.constant 0 : index
    %39 = vector.load %arg11[%c0_27, %c0_28] : memref<1x128xf32, #tpu.memory_space<vmem>>, vector<1x128xf32>
    %40 = vector.broadcast %39 : vector<1x128xf32> to vector<256x128xf32>
    %41 = arith.addf %38, %40 : vector<256x128xf32>
    %cst_29 = arith.constant 1.000000e-01 : f32
    %42 = vector.broadcast %cst_29 : f32 to vector<256x128xf32>
    %43 = arith.mulf %42, %41 : vector<256x128xf32>
    %44 = arith.maximumf %41, %43 : vector<256x128xf32>
    %45 = arith.truncf %44 : vector<256x128xf32> to vector<256x128xbf16>
    %c0_30 = arith.constant 0 : index
    %c0_31 = arith.constant 0 : index
    %46 = vector.load %arg12[%c0_30, %c0_31] : memref<128x256xbf16, #tpu.memory_space<vmem>>, vector<128x256xbf16>
    %cst_32 = arith.constant dense<0.000000e+00> : vector<256x256xf32>
    %47 = tpu.matmul %45, %46, %cst_32 {dimension_numbers = #tpu.dot_dimension_numbers<[1], [0], [0], [1], [0, 0, 1, 1], [], []>} : vector<256x128xbf16>, vector<128x256xbf16>, vector<256x256xf32> -> vector<256x256xf32>
    %c0_33 = arith.constant 0 : index
    %c0_34 = arith.constant 0 : index
    %48 = vector.load %arg13[%c0_33, %c0_34] : memref<1x256xf32, #tpu.memory_space<vmem>>, vector<1x256xf32>
    %49 = vector.broadcast %48 : vector<1x256xf32> to vector<256x256xf32>
    %50 = arith.addf %47, %49 : vector<256x256xf32>
    %cst_35 = arith.constant 1.000000e-01 : f32
    %51 = vector.broadcast %cst_35 : f32 to vector<256x256xf32>
    %52 = arith.mulf %51, %50 : vector<256x256xf32>
    %53 = arith.maximumf %50, %52 : vector<256x256xf32>
    %54 = arith.truncf %53 : vector<256x256xf32> to vector<256x256xbf16>
    %c0_36 = arith.constant 0 : index
    %c0_37 = arith.constant 0 : index
    %55 = vector.load %arg14[%c0_36, %c0_37] : memref<256x512xbf16, #tpu.memory_space<vmem>>, vector<256x512xbf16>
    %cst_38 = arith.constant dense<0.000000e+00> : vector<256x512xf32>
    %56 = tpu.matmul %54, %55, %cst_38 {dimension_numbers = #tpu.dot_dimension_numbers<[1], [0], [0], [1], [0, 0, 1, 1], [], []>} : vector<256x256xbf16>, vector<256x512xbf16>, vector<256x512xf32> -> vector<256x512xf32>
    %c0_39 = arith.constant 0 : index
    %c0_40 = arith.constant 0 : index
    %57 = vector.load %arg15[%c0_39, %c0_40] : memref<1x512xf32, #tpu.memory_space<vmem>>, vector<1x512xf32>
    %58 = vector.broadcast %57 : vector<1x512xf32> to vector<256x512xf32>
    %59 = arith.addf %56, %58 : vector<256x512xf32>
    %cst_41 = arith.constant 1.000000e-01 : f32
    %60 = vector.broadcast %cst_41 : f32 to vector<256x512xf32>
    %61 = arith.mulf %60, %59 : vector<256x512xf32>
    %62 = arith.maximumf %59, %61 : vector<256x512xf32>
    %63 = arith.truncf %62 : vector<256x512xf32> to vector<256x512xbf16>
    %c0_42 = arith.constant 0 : index
    %c0_43 = arith.constant 0 : index
    %64 = vector.load %arg16[%c0_42, %c0_43] : memref<512x128xbf16, #tpu.memory_space<vmem>>, vector<512x128xbf16>
    %cst_44 = arith.constant dense<0.000000e+00> : vector<256x128xf32>
    %65 = tpu.matmul %63, %64, %cst_44 {dimension_numbers = #tpu.dot_dimension_numbers<[1], [0], [0], [1], [0, 0, 1, 1], [], []>} : vector<256x512xbf16>, vector<512x128xbf16>, vector<256x128xf32> -> vector<256x128xf32>
    %c0_45 = arith.constant 0 : index
    %c0_46 = arith.constant 0 : index
    %66 = vector.load %arg17[%c0_45, %c0_46] : memref<1x128xf32, #tpu.memory_space<vmem>>, vector<1x128xf32>
    %67 = vector.broadcast %66 : vector<1x128xf32> to vector<256x128xf32>
    %68 = arith.addf %65, %67 : vector<256x128xf32>
    %c0_47 = arith.constant 0 : index
    %c0_48 = arith.constant 0 : index
    %69 = vector.load %arg18[%c0_47, %c0_48] : memref<256x128xf32, #tpu.memory_space<vmem>>, vector<256x128xf32>
    tpu.vector_store %arg18[%c0_47, %c0_48], %68 {strides = array<i32>} : memref<256x128xf32, #tpu.memory_space<vmem>>, vector<256x128xf32>,
    return
  }
  func.func @transform_0(%arg0: i32) -> (i32, i32) {
    %c0_i32 = arith.constant 0 : i32
    %c0_i32_0 = arith.constant 0 : i32
    return %arg0, %c0_i32 : i32, i32
  }
  func.func @transform_1(%arg0: i32) -> (i32, i32) {
    %c0_i32 = arith.constant 0 : i32
    %c0_i32_0 = arith.constant 0 : i32
    %c0_i32_1 = arith.constant 0 : i32
    return %c0_i32, %c0_i32_0 : i32, i32
  }
  func.func @transform_2(%arg0: i32) -> (i32, i32) {
    %c0_i32 = arith.constant 0 : i32
    %c0_i32_0 = arith.constant 0 : i32
    %c0_i32_1 = arith.constant 0 : i32
    return %c0_i32, %c0_i32_0 : i32, i32
  }
  func.func @transform_3(%arg0: i32) -> (i32, i32) {
    %c0_i32 = arith.constant 0 : i32
    %c0_i32_0 = arith.constant 0 : i32
    %c0_i32_1 = arith.constant 0 : i32
    return %c0_i32, %c0_i32_0 : i32, i32
  }
  func.func @transform_4(%arg0: i32) -> (i32, i32) {
    %c0_i32 = arith.constant 0 : i32
    %c0_i32_0 = arith.constant 0 : i32
    %c0_i32_1 = arith.constant 0 : i32
    return %c0_i32, %c0_i32_0 : i32, i32
  }
  func.func @transform_5(%arg0: i32) -> (i32, i32) {
    %c0_i32 = arith.constant 0 : i32
    %c0_i32_0 = arith.constant 0 : i32
    %c0_i32_1 = arith.constant 0 : i32
    return %c0_i32, %c0_i32_0 : i32, i32
  }
  func.func @transform_6(%arg0: i32) -> (i32, i32) {
    %c0_i32 = arith.constant 0 : i32
    %c0_i32_0 = arith.constant 0 : i32
    %c0_i32_1 = arith.constant 0 : i32
    return %c0_i32, %c0_i32_0 : i32, i32
  }
  func.func @transform_7(%arg0: i32) -> (i32, i32) {
    %c0_i32 = arith.constant 0 : i32
    %c0_i32_0 = arith.constant 0 : i32
    %c0_i32_1 = arith.constant 0 : i32
    return %c0_i32, %c0_i32_0 : i32, i32
  }
  func.func @transform_8(%arg0: i32) -> (i32, i32) {
    %c0_i32 = arith.constant 0 : i32
    %c0_i32_0 = arith.constant 0 : i32
    %c0_i32_1 = arith.constant 0 : i32
    return %c0_i32, %c0_i32_0 : i32, i32
  }
  func.func @transform_9(%arg0: i32) -> (i32, i32) {
    %c0_i32 = arith.constant 0 : i32
    %c0_i32_0 = arith.constant 0 : i32
    %c0_i32_1 = arith.constant 0 : i32
    return %c0_i32, %c0_i32_0 : i32, i32
  }
  func.func @transform_10(%arg0: i32) -> (i32, i32) {
    %c0_i32 = arith.constant 0 : i32
    %c0_i32_0 = arith.constant 0 : i32
    %c0_i32_1 = arith.constant 0 : i32
    return %c0_i32, %c0_i32_0 : i32, i32
  }
  func.func @transform_11(%arg0: i32) -> (i32, i32) {
    %c0_i32 = arith.constant 0 : i32
    %c0_i32_0 = arith.constant 0 : i32
    %c0_i32_1 = arith.constant 0 : i32
    return %c0_i32, %c0_i32_0 : i32, i32
  }
  func.func @transform_12(%arg0: i32) -> (i32, i32) {
    %c0_i32 = arith.constant 0 : i32
    %c0_i32_0 = arith.constant 0 : i32
    %c0_i32_1 = arith.constant 0 : i32
    return %c0_i32, %c0_i32_0 : i32, i32
  }
  func.func @transform_13(%arg0: i32) -> (i32, i32) {
    %c0_i32 = arith.constant 0 : i32
    %c0_i32_0 = arith.constant 0 : i32
    %c0_i32_1 = arith.constant 0 : i32
    return %c0_i32, %c0_i32_0 : i32, i32
  }
  func.func @transform_14(%arg0: i32) -> (i32, i32) {
    %c0_i32 = arith.constant 0 : i32
    %c0_i32_0 = arith.constant 0 : i32
    %c0_i32_1 = arith.constant 0 : i32
    return %c0_i32, %c0_i32_0 : i32, i32
  }
  func.func @transform_15(%arg0: i32) -> (i32, i32) {
    %c0_i32 = arith.constant 0 : i32
    %c0_i32_0 = arith.constant 0 : i32
    %c0_i32_1 = arith.constant 0 : i32
    return %c0_i32, %c0_i32_0 : i32, i32
  }
  func.func @transform_16(%arg0: i32) -> (i32, i32) {
    %c0_i32 = arith.constant 0 : i32
    %c0_i32_0 = arith.constant 0 : i32
    %c0_i32_1 = arith.constant 0 : i32
    return %c0_i32, %c0_i32_0 : i32, i32
  }
  func.func @transform_17(%arg0: i32) -> (i32, i32) {
    %c0_i32 = arith.constant 0 : i32
    %c0_i32_0 = arith.constant 0 : i32
    return %arg0, %c0_i32 : i32, i32
  }
}

</mosaic_0001>

<bundles_post_ra>
// kernel: tpu_custom_call.1
= control target key start
LH: loop header
LB: loop body
LE: loop exit
PB: predicated region body
PF: predicated region fallthrough
CT: control target
= control target key end

     0   :  { %s7851_s0 = inlined_call_operand.hbm [shape: bf16[256,128], index: 0, kind: input, shape index: {}]   ;;  %s7852_s1 = inlined_call_operand.hbm [shape: bf16[128,512], index: 1, kind: input, shape index: {}]   ;;  %s7853_s2 = inlined_call_operand.hbm [shape: f32[1,512], index: 2, kind: input, shape index: {}]   ;;  %s7854_s3 = inlined_call_operand.hbm [shape: bf16[512,256], index: 3, kind: input, shape index: {}]   ;;  %s7855_s4 = inlined_call_operand.vmem [shape: f32[1,256], index: 4, kind: input, shape index: {}]   ;;  %s7856_s5 = inlined_call_operand.hbm [shape: bf16[256,128], index: 5, kind: input, shape index: {}]   ;;  %s7857_s6 = inlined_call_operand.vmem [shape: f32[1,128], index: 6, kind: input, shape index: {}]   ;;  %s7858_s7 = inlined_call_operand.hbm [shape: bf16[128,128], index: 7, kind: input, shape index: {}]   ;;  %s7859_s8 = inlined_call_operand.vmem [shape: f32[1,128], index: 8, kind: input, shape index: {}]   ;;  %s7860_s9 = inlined_call_operand.hbm [shape: bf16[128,128], index: 9, kind: input, shape index: {}]   ;;  %s7861_s10 = inlined_call_operand.vmem [shape: f32[1,128], index: 10, kind: input, shape index: {}]   ;;  %s7862_s11 = inlined_call_operand.hbm [shape: bf16[128,256], index: 11, kind: input, shape index: {}]   ;;  %s7863_s12 = inlined_call_operand.vmem [shape: f32[1,256], index: 12, kind: input, shape index: {}]   ;;  %s7864_s13 = inlined_call_operand.hbm [shape: bf16[256,512], index: 13, kind: input, shape index: {}]   ;;  %s7865_s14 = inlined_call_operand.vmem [shape: f32[1,512], index: 14, kind: input, shape index: {}]   ;;  %s7866_s15 = inlined_call_operand.hbm [shape: bf16[512,128], index: 15, kind: input, shape index: {}]   ;;  %s7867_s16 = inlined_call_operand.vmem [shape: f32[1,128], index: 16, kind: input, shape index: {}]   ;;  %s7868_s17 = inlined_call_operand.hbm [shape: f32[256,128], index: 17, kind: output, shape index: {}]  }
   0x1   :  { %7872 = sst [smem:[#allocation27_spill]] %s7851_s0 }
   0x2   :  { %7873 = sst [smem:[#allocation28_spill]] %s7852_s1 }
   0x3   :  { %22 = vsyncpa [#allocation3], 0 }
   0x4   :  { %23 = vsyncpa [#allocation6], 0 }
   0x5   :  { %24 = vsyncpa [#allocation9], 0 }
   0x6   :  { %25 = vsyncpa [#allocation12], 0 }
   0x7   :  { %26 = vsyncpa [#allocation15], 0 }
   0x8   :  { %27 = vsyncpa [#allocation18], 0 }
   0x9   :  { %28 = vsyncpa [#allocation4], 0  ;;  %s6746_s24 = smov [#allocation5]  }
   0xa   :  { %s46_s25 = sshll.u32 %s6746_s24, 4  ;;  %s47_s25 = int_to_ptr.vmem [resolvable:$true] %s46_s25 }
   0xb   :  { %s6520_s26 = scalar_lea.vmem %s47_s25, 4096  ;;  %p6525_p1 = scmp.lt.s32.totalorder %s47_s25, %s47_s25 }
   0xc   :  { %p6521_p0 = scmp.ne.s32.totalorder %s47_s25, %s6520_s26  ;;  %p6526_p2 = scmp.lt.s32.totalorder %s6520_s26, %s6520_s26 }
   0xe   :  { %p6527_p3 = por %p6526_p2, %p6525_p1 }
  0x10   :  { %p6528_p4 = pnand %p6527_p3, %p6521_p0 }
  0x12   :  { %6531 = shalt.err (!%p6528_p4)
}
  0x13   :  { %s7869_s27 = smov 256   ;;  %s6748_s28 = smov 16  }
  0x14   :  { %s7874_s30 = sld [smem:[#allocation28_spill]]  ;;  %s6749_s18 = smov [#allocation8]  }
  0x15   :  { %s68_s19 = sshll.u32 %s6749_s18, 4  ;;  %s69_s19 = int_to_ptr.vmem [resolvable:$true] %s68_s19 }
  0x16   :  { %s6540_s1 = scalar_lea.vmem %s69_s19, 8192  ;;  %p6545_p6 = scmp.lt.s32.totalorder %s69_s19, %s69_s19 }
  0x17   :  { %p6541_p5 = scmp.ne.s32.totalorder %s69_s19, %s6540_s1  ;;  %p6546_p7 = scmp.lt.s32.totalorder %s6540_s1, %s6540_s1 }
  0x19   :  { %p6547_p8 = por %p6546_p7, %p6545_p6 }
  0x1a   :  { %52 = dma.hbm_to_vmem [thread:$0]  %s7874_s30, 4096, %s47_s25, [#allocation6], %s7869_s27, %s7869_s27, %s6748_s28  }
  0x1b   :  { %p6548_p9 = pnand %p6547_p8, %p6541_p5 }
  0x1d   :  { %6551 = shalt.err (!%p6548_p9)
}
  0x1e   :  { %s6750_s20 = smov 128   ;;  %s6751_s21 = smov 8  }
  0x1f   :  { %74 = dma.hbm_to_vmem [thread:$0]  %s7854_s3, 8192, %s69_s19, [#allocation9], %s6750_s20, %s6750_s20, %s6751_s21  }
  0x20   :  { %s6752_s24 = smov [#allocation11]   ;;  %s6753_s26 = smov [#allocation14]  }
  0x21   :  { %s96_s25 = sshll.u32 %s6752_s24, 4  ;;  %s124_s29 = sshll.u32 %s6753_s26, 4  ;;  %s97_s25 = int_to_ptr.vmem [resolvable:$true] %s96_s25  ;;  %s125_s29 = int_to_ptr.vmem [resolvable:$true] %s124_s29 }
  0x22   :  { %s6560_s0 = scalar_lea.vmem %s97_s25, 1024  ;;  %p6565_p11 = scmp.lt.s32.totalorder %s97_s25, %s97_s25 }
  0x23   :  { %p6561_p10 = scmp.ne.s32.totalorder %s97_s25, %s6560_s0  ;;  %p6566_p12 = scmp.lt.s32.totalorder %s6560_s0, %s6560_s0 }
  0x25   :  { %p6567_p13 = por %p6566_p12, %p6565_p11 }
  0x27   :  { %p6568_p0 = pnand %p6567_p13, %p6561_p10 }
  0x29   :  { %6571 = shalt.err (!%p6568_p0)
}
  0x2a   :  { %s6754_s30 = smov 64   ;;  %s6755_s18 = smov 4  }
  0x2b   :  { %102 = dma.hbm_to_vmem [thread:$0]  %s7858_s7, 1024, %s97_s25, [#allocation12], %s6754_s30, %s6754_s30, %s6755_s18  }
  0x2c   :  { %s6580_s19 = scalar_lea.vmem %s125_s29, 2048  ;;  %p6585_p2 = scmp.lt.s32.totalorder %s125_s29, %s125_s29 }
  0x2d   :  { %p6581_p1 = scmp.ne.s32.totalorder %s125_s29, %s6580_s19  ;;  %p6586_p3 = scmp.lt.s32.totalorder %s6580_s19, %s6580_s19 }
  0x2f   :  { %p6587_p4 = por %p6586_p3, %p6585_p2 }
  0x31   :  { %p6588_p5 = pnand %p6587_p4, %p6581_p1 }
  0x33   :  { %6591 = shalt.err (!%p6588_p5)
}
  0x34   :  { %130 = dma.hbm_to_vmem [thread:$0]  %s7862_s11, 2048, %s125_s29, [#allocation15], %s6750_s20, %s6750_s20, %s6751_s21  }
  0x35   :  { %s6756_s24 = smov [#allocation2]   ;;  %s6757_s0 = smov [#allocation7]  }
  0x36   :  { %s34_s26 = sshll.u32 %s6756_s24, 4  ;;  %s59_s27 = sshll.u32 %s6757_s0, 4  ;;  %s35_s26 = int_to_ptr.vmem [resolvable:$true] %s34_s26  ;;  %s60_s27 = int_to_ptr.vmem [resolvable:$true] %s59_s27 }
  0x37   :  { %s6600_s7 = scalar_lea.vmem %s35_s26, 2048  ;;  %p6605_p7 = scmp.lt.s32.totalorder %s35_s26, %s35_s26 }
  0x38   :  { %p6601_p6 = scmp.ne.s32.totalorder %s35_s26, %s6600_s7  ;;  %p6606_p8 = scmp.lt.s32.totalorder %s6600_s7, %s6600_s7 }
  0x3a   :  { %p6607_p9 = por %p6606_p8, %p6605_p7 }
  0x3c   :  { %p6608_p10 = pnand %p6607_p9, %p6601_p6 }
  0x3e   :  { %6611 = shalt.err (!%p6608_p10)
}
  0x3f   :  { %s7875_s3 = sld [smem:[#allocation27_spill]]  ;;  %s6620_s11 = scalar_lea.vmem %s60_s27, 64 }
  0x40   :  { %p6621_p11 = scmp.ne.s32.totalorder %s60_s27, %s6620_s11  ;;  %p6625_p12 = scmp.lt.s32.totalorder %s60_s27, %s60_s27 }
  0x41   :  { %p6626_p13 = scmp.lt.s32.totalorder %s6620_s11, %s6620_s11 }
  0x43   :  { %p6627_p0 = por %p6626_p13, %p6625_p12 }
  0x45   :  { %40 = dma.hbm_to_vmem [thread:$0]  %s7875_s3, 2048, %s35_s26, [#allocation3], %s6754_s30, %s6754_s30, %s6755_s18  }
  0x46   :  { %p6628_p1 = pnand %p6627_p0, %p6621_p11 }
  0x48   :  { %6631 = shalt.err (!%p6628_p1)
}
  0x49   :  { %62 = dma.hbm_to_vmem [thread:$0]  %s7853_s2, 64, %s60_s27, [#allocation6]  }
  0x4a   :  { %s6758_s22 = smov [#allocation10]   ;;  %s6759_s24 = smov [#allocation13]  }
  0x4b   :  { %s82_s23 = sshll.u32 %s6758_s22, 4  ;;  %s110_s0 = sshll.u32 %s6759_s24, 4  ;;  %s83_s23 = int_to_ptr.vmem [resolvable:$true] %s82_s23  ;;  %s111_s0 = int_to_ptr.vmem [resolvable:$true] %s110_s0 }
  0x4c   :  { %s6640_s7 = scalar_lea.vmem %s83_s23, 2048  ;;  %p6645_p3 = scmp.lt.s32.totalorder %s83_s23, %s83_s23 }
  0x4d   :  { %p6641_p2 = scmp.ne.s32.totalorder %s83_s23, %s6640_s7  ;;  %p6646_p4 = scmp.lt.s32.totalorder %s6640_s7, %s6640_s7 }
  0x4f   :  { %p6647_p5 = por %p6646_p4, %p6645_p3 }
  0x51   :  { %p6648_p6 = pnand %p6647_p5, %p6641_p2 }
  0x53   :  { %6651 = shalt.err (!%p6648_p6)
}
  0x54   :  { %88 = dma.hbm_to_vmem [thread:$0]  %s7856_s5, 2048, %s83_s23, [#allocation9], %s6754_s30, %s6754_s30, %s6755_s18  }
  0x55   :  { %s6660_s2 = scalar_lea.vmem %s111_s0, 1024  ;;  %p6665_p8 = scmp.lt.s32.totalorder %s111_s0, %s111_s0 }
  0x56   :  { %p6661_p7 = scmp.ne.s32.totalorder %s111_s0, %s6660_s2  ;;  %p6666_p9 = scmp.lt.s32.totalorder %s6660_s2, %s6660_s2 }
  0x58   :  { %p6667_p10 = por %p6666_p9, %p6665_p8 }
  0x5a   :  { %p6668_p11 = pnand %p6667_p10, %p6661_p7 }
  0x5c   :  { %6671 = shalt.err (!%p6668_p11)
}
  0x5d   :  { %116 = dma.hbm_to_vmem [thread:$0]  %s7860_s9, 1024, %s111_s0, [#allocation12], %s6754_s30, %s6754_s30, %s6755_s18  }
  0x5e   :  { %s6760_s3 = smov [#allocation16]   ;;  %s6761_s29 = smov [#allocation17]  }
  0x5f   :  { %s138_s11 = sshll.u32 %s6760_s3, 4  ;;  %s152_s19 = sshll.u32 %s6761_s29, 4  ;;  %s139_s11 = int_to_ptr.vmem [resolvable:$true] %s138_s11  ;;  %s153_s19 = int_to_ptr.vmem [resolvable:$true] %s152_s19 }
  0x60   :  { %s6680_s5 = scalar_lea.vmem %s139_s11, 8192  ;;  %p6685_p13 = scmp.lt.s32.totalorder %s139_s11, %s139_s11 }
  0x61   :  { %p6681_p12 = scmp.ne.s32.totalorder %s139_s11, %s6680_s5  ;;  %p6686_p0 = scmp.lt.s32.totalorder %s6680_s5, %s6680_s5 }
  0x63   :  { %p6687_p1 = por %p6686_p0, %p6685_p13 }
  0x65   :  { %p6688_p2 = pnand %p6687_p1, %p6681_p12 }
  0x67   :  { %6691 = shalt.err (!%p6688_p2)
}
  0x68   :  { %s7876_s22 = smov 256   ;;  %s6700_s9 = scalar_lea.vmem %s153_s19, 4096 }
  0x69   :  { %144 = dma.hbm_to_vmem [thread:$0]  %s7864_s13, 8192, %s139_s11, [#allocation15], %s7876_s22, %s7876_s22, %s6748_s28  }
  0x6a   :  { %p6701_p3 = scmp.ne.s32.totalorder %s153_s19, %s6700_s9  ;;  %p6705_p4 = scmp.lt.s32.totalorder %s153_s19, %s153_s19 }
  0x6b   :  { %p6706_p5 = scmp.lt.s32.totalorder %s6700_s9, %s6700_s9 }
  0x6d   :  { %p6707_p6 = por %p6706_p5, %p6705_p4 }
  0x6f   :  { %p6708_p7 = pnand %p6707_p6, %p6701_p3 }
  0x71   :  { %6711 = shalt.err (!%p6708_p7)
}
  0x72   :  { %158 = dma.hbm_to_vmem [thread:$0]  %s7866_s15, 4096, %s153_s19, [#allocation18], %s6754_s30, %s6754_s30, %s6755_s18  }
  0x73   :  { %6732 = dma.done.wait [#allocation3], 2048  }
  0x74   :  { %6733 = vsyncadd [#allocation3], 4294965248 }
  0x75   :  { %6734 = dma.done.wait [#allocation6], 4160  }
  0x76   :  { %6735 = vsyncadd [#allocation6], 4294963136 }
  0x77   :  { %6736 = dma.done.wait [#allocation9], 10240  }
  0x78   :  { %6737 = vsyncadd [#allocation9], 4294957056 }
  0x79   :  { %6738 = dma.done.wait [#allocation12], 2048  }
  0x7a   :  { %6739 = vsyncadd [#allocation12], 4294965248 }
  0x7b   :  { %6740 = dma.done.wait [#allocation15], 10240  }
  0x7c   :  { %6741 = vsyncadd [#allocation15], 4294957056 }
  0x7d   :  { %6742 = dma.done.wait [#allocation18], 4096  }
  0x7e   :  { %6743 = vsyncadd [#allocation18], 4294963200  ;;  %v6762_v0 = vmov 0   ;;  %v6168_v1 = vld [vmem:[#allocation5 + $0xe4] ss:$16 sps:$4 sm:$0xff]   ;;  %v6921_v23 = vld [vmem:[#allocation2 + $0x8] sm:$0xff]  }
  0x7f   :  { %566 = vmatprep.mubr.bf16.mxu0 %v6762_v0  ;;  %646 = vmatprep.mubr.bf16.mxu1 %v6762_v0  ;;  %v6170_v2 = vld [vmem:[#allocation5 + $0xe0] ss:$16 sps:$4 sm:$0xff]   ;;  %v6171_v3 = vld [vmem:[#allocation5 + $0xc4] ss:$16 sps:$4 sm:$0xff]   ;;  %v6196_v17 = vld [vmem:[#allocation5 + $0xec] ss:$16 sps:$4 sm:$0xff]  }
  0x80   :  { %534 = vmatprep.subr.bf16.mxu0 %v6168_v1  ;;  %6134 = vmatprep.subr.bf16.mxu1 %v6168_v1  ;;  %v6173_v4 = vld [vmem:[#allocation5 + $0xc0] ss:$16 sps:$4 sm:$0xff]   ;;  %v6174_v5 = vld [vmem:[#allocation5 + $0xa4] ss:$16 sps:$4 sm:$0xff]   ;;  %v6194_v20 = vld [vmem:[#allocation5 + $0xe8] ss:$16 sps:$4 sm:$0xff]  }
  0x81   :  { %535 = vmatpush1.bf16.msra.mxu0 %v6170_v2  ;;  %6142 = vmatpush1.bf16.msra.mxu1 %v6170_v2  ;;  %v6176_v6 = vld [vmem:[#allocation5 + $0xa0] ss:$16 sps:$4 sm:$0xff]   ;;  %v6177_v7 = vld [vmem:[#allocation5 + $0x84] ss:$16 sps:$4 sm:$0xff]   ;;  %v6201_v21 = vld [vmem:[#allocation5 + $0xcc] ss:$16 sps:$4 sm:$0xff]  }
  0x82   :  { %536 = vmatprep.subr.bf16.mxu0 %v6171_v3  ;;  %6135 = vmatprep.subr.bf16.mxu1 %v6171_v3  ;;  %v6179_v8 = vld [vmem:[#allocation5 + $0x80] ss:$16 sps:$4 sm:$0xff]   ;;  %v6180_v9 = vld [vmem:[#allocation5 + $0x64] ss:$16 sps:$4 sm:$0xff]   ;;  %v6199_v22 = vld [vmem:[#allocation5 + $0xc8] ss:$16 sps:$4 sm:$0xff]  }
  0x83   :  { %v6182_v10 = vld [vmem:[#allocation5 + $0x60] ss:$16 sps:$4 sm:$0xff]   ;;  %v6183_v11 = vld [vmem:[#allocation5 + $0x44] ss:$16 sps:$4 sm:$0xff]   ;;  %v6206_v24 = vld [vmem:[#allocation5 + $0xac] ss:$16 sps:$4 sm:$0xff]  }
  0x84   :  { %v6185_v12 = vld [vmem:[#allocation5 + $0x40] ss:$16 sps:$4 sm:$0xff]   ;;  %v6186_v13 = vld [vmem:[#allocation5 + $0x24] ss:$16 sps:$4 sm:$0xff]   ;;  %v6923_v25 = vld [vmem:[#allocation2 + $0x48] sm:$0xff]  }
  0x85   :  { %537 = vmatpush1.bf16.msra.mxu0 %v6173_v4  ;;  %6143 = vmatpush1.bf16.msra.mxu1 %v6173_v4  ;;  %v6188_v14 = vld [vmem:[#allocation5 + $0x20] ss:$16 sps:$4 sm:$0xff]   ;;  %v6189_v15 = vld [vmem:[#allocation5 + $0x4] ss:$16 sps:$4 sm:$0xff]   ;;  %v6204_v26 = vld [vmem:[#allocation5 + $0xa8] ss:$16 sps:$4 sm:$0xff]  }
  0x86   :  { %538 = vmatprep.subr.bf16.mxu0 %v6174_v5  ;;  %6136 = vmatprep.subr.bf16.mxu1 %v6174_v5  ;;  %v6191_v16 = vld [vmem:[#allocation5] ss:$16 sps:$4 sm:$0xff]   ;;  %v6211_v27 = vld [vmem:[#allocation5 + $0x8c] ss:$16 sps:$4 sm:$0xff]   ;;  %v6209_v28 = vld [vmem:[#allocation5 + $0x88] ss:$16 sps:$4 sm:$0xff]  }
  0x87   :  { %v6913_v18 = vld [vmem:[#allocation2] sm:$0xff]   ;;  %v6216_v29 = vld [vmem:[#allocation5 + $0x6c] ss:$16 sps:$4 sm:$0xff]   ;;  %v6929_v30 = vld [vmem:[#allocation2 + $0x10] sm:$0xff]  }
  0x88   :  { %v6915_v19 = vld [vmem:[#allocation2 + $0x40] sm:$0xff]   ;;  %v6931_v31 = vld [vmem:[#allocation2 + $0x50] sm:$0xff]   ;;  %v6214_v32 = vld [vmem:[#allocation5 + $0x68] ss:$16 sps:$4 sm:$0xff]  }
  0x89   :  { %539 = vmatpush1.bf16.msra.mxu0 %v6176_v6  ;;  %6144 = vmatpush1.bf16.msra.mxu1 %v6176_v6  ;;  %v6221_v33 = vld [vmem:[#allocation5 + $0x4c] ss:$16 sps:$4 sm:$0xff]   ;;  %v6234_v34 = vld [vmem:[#allocation8 + $0x74] ss:$8 sps:$4 sm:$0xff]   ;;  %v6240_v39 = vld [vmem:[#allocation8 + $0x64] ss:$8 sps:$4 sm:$0xff]  }
  0x8a   :  { %540 = vmatprep.subr.bf16.mxu0 %v6177_v7  ;;  %6137 = vmatprep.subr.bf16.mxu1 %v6177_v7  ;;  %v6232_v35 = vld [vmem:[#allocation8 + $0x70] ss:$8 sps:$4 sm:$0xff]   ;;  %v6219_v36 = vld [vmem:[#allocation5 + $0x48] ss:$16 sps:$4 sm:$0xff]   ;;  %v6238_v38 = vld [vmem:[#allocation8 + $0x60] ss:$8 sps:$4 sm:$0xff]  }
  0x8b   :  { %v6226_v37 = vld [vmem:[#allocation5 + $0x2c] ss:$16 sps:$4 sm:$0xff]   ;;  %v6224_v42 = vld [vmem:[#allocation5 + $0x28] ss:$16 sps:$4 sm:$0xff]   ;;  %v6945_v50 = vld [vmem:[#allocation2 + $0x20] sm:$0xff]  }
  0x8c   :  { %v6937_v40 = vld [vmem:[#allocation2 + $0x18] sm:$0xff]   ;;  %v6247_v48 = vld [vmem:[#allocation8 + $0x40] ss:$8 sps:$4 sm:$0xff]   ;;  %v6249_v49 = vld [vmem:[#allocation8 + $0x44] ss:$8 sps:$4 sm:$0xff]  }
  0x8d   :  { %541 = vmatpush1.bf16.msra.mxu0 %v6179_v8  ;;  %6145 = vmatpush1.bf16.msra.mxu1 %v6179_v8  ;;  %v6939_v41 = vld [vmem:[#allocation2 + $0x58] sm:$0xff]   ;;  %v6947_v51 = vld [vmem:[#allocation2 + $0x60] sm:$0xff]   ;;  %v6258_v55 = vld [vmem:[#allocation8 + $0x24] ss:$8 sps:$4 sm:$0xff]  }
  0x8e   :  { %542 = vmatprep.subr.bf16.mxu0 %v6180_v9  ;;  %6138 = vmatprep.subr.bf16.mxu1 %v6180_v9  ;;  %v6231_v43 = vld [vmem:[#allocation5 + $0xc] ss:$16 sps:$4 sm:$0xff]   ;;  %v6243_v44 = vld [vmem:[#allocation8 + $0x54] ss:$8 sps:$4 sm:$0xff]   ;;  %v6267_v61 = vld [vmem:[#allocation8 + $0x4] ss:$8 sps:$4 sm:$0xff]  }
  0x8f   :  { %v6241_v45 = vld [vmem:[#allocation8 + $0x50] ss:$8 sps:$4 sm:$0xff]   ;;  %v6229_v46 = vld [vmem:[#allocation5 + $0x8] ss:$16 sps:$4 sm:$0xff]   ;;  %v6256_v54 = vld [vmem:[#allocation8 + $0x20] ss:$8 sps:$4 sm:$0xff]  }
  0x90   :  { %v6237_v47 = vld [vmem:[#allocation8 + $0x174] ss:$8 sps:$4 sm:$0xff]   ;;  %v6250_v53 = vld [vmem:[#allocation8 + $0x30] ss:$8 sps:$4 sm:$0xff]   ;;  %v6953_v56 = vld [vmem:[#allocation2 + $0x28] sm:$0xff]  }
  0x91   :  { %543 = vmatpush1.bf16.msra.mxu0 %v6182_v10  ;;  %6146 = vmatpush1.bf16.msra.mxu1 %v6182_v10  ;;  %v6252_v52 = vld [vmem:[#allocation8 + $0x34] ss:$8 sps:$4 sm:$0xff]   ;;  %v6955_v57 = vld [vmem:[#allocation2 + $0x68] sm:$0xff]   ;;  %v6259_v59 = vld [vmem:[#allocation8 + $0x10] ss:$8 sps:$4 sm:$0xff]  }
  0x92   :  { %544 = vmatprep.subr.bf16.mxu0 %v6183_v11  ;;  %6139 = vmatprep.subr.bf16.mxu1 %v6183_v11  ;;  %v6261_v58 = vld [vmem:[#allocation8 + $0x14] ss:$8 sps:$4 sm:$0xff]   ;;  %v6265_v60 = vld [vmem:[#allocation8] ss:$8 sps:$4 sm:$0xff]   ;;  %v6961_v62 = vld [vmem:[#allocation2 + $0x30] sm:$0xff]  }
  0x93   :  { %v6963_v63 = vld [vmem:[#allocation2 + $0x70] sm:$0xff]   ;;  %v6270_v1 = vld [vmem:[#allocation8 + $0xf4] ss:$8 sps:$4 sm:$0xff]   ;;  %v6274_v3 = vld [vmem:[#allocation8 + $0xe0] ss:$8 sps:$4 sm:$0xff]  }
  0x94   :  { %v6268_v2 = vld [vmem:[#allocation8 + $0xf0] ss:$8 sps:$4 sm:$0xff]   ;;  %v6276_v4 = vld [vmem:[#allocation8 + $0xe4] ss:$8 sps:$4 sm:$0xff]   ;;  %v6279_v7 = vld [vmem:[#allocation8 + $0xd4] ss:$8 sps:$4 sm:$0xff]  }
  0x95   :  { %545 = vmatpush1.bf16.msra.mxu0 %v6185_v12  ;;  %6147 = vmatpush1.bf16.msra.mxu1 %v6185_v12  ;;  %v6969_v5 = vld [vmem:[#allocation2 + $0x38] sm:$0xff]   ;;  %v6283_v9 = vld [vmem:[#allocation8 + $0xc0] ss:$8 sps:$4 sm:$0xff]   ;;  %v6285_v10 = vld [vmem:[#allocation8 + $0xc4] ss:$8 sps:$4 sm:$0xff]  }
  0x96   :  { %546 = vmatprep.subr.bf16.mxu0 %v6186_v13  ;;  %6140 = vmatprep.subr.bf16.mxu1 %v6186_v13  ;;  %v6971_v6 = vld [vmem:[#allocation2 + $0x78] sm:$0xff]   ;;  %v6246_v12 = vld [vmem:[#allocation8 + $0x164] ss:$8 sps:$4 sm:$0xff]  }
  0x97   :  { %v6277_v8 = vld [vmem:[#allocation8 + $0xd0] ss:$8 sps:$4 sm:$0xff]   ;;  %v6288_v13 = vld [vmem:[#allocation8 + $0xb4] ss:$8 sps:$4 sm:$0xff]  }
  0x98   :  { %v6235_v11 = vld [vmem:[#allocation8 + $0x170] ss:$8 sps:$4 sm:$0xff]  }
  0x99   :  { %547 = vmatpush1.bf16.msra.mxu0 %v6188_v14  ;;  %6148 = vmatpush1.bf16.msra.mxu1 %v6188_v14  ;;  %v6244_v14 = vld [vmem:[#allocation8 + $0x160] ss:$8 sps:$4 sm:$0xff]  }
  0x9a   :  { %548 = vmatprep.subr.bf16.mxu0 %v6189_v15  ;;  %6141 = vmatprep.subr.bf16.mxu1 %v6189_v15  ;;  %v6286_v15 = vld [vmem:[#allocation8 + $0xb0] ss:$8 sps:$4 sm:$0xff]  }
  0x9d   :  { %549 = vmatpush1.bf16.msra.mxu0 %v6191_v16  ;;  %6149 = vmatpush1.bf16.msra.mxu1 %v6191_v16  ;;  %v6255_v16 = vld [vmem:[#allocation8 + $0x154] ss:$8 sps:$4 sm:$0xff]  }
  0x9e   :  { %727 = vmatprep.subr.bf16.mxu1 %v6196_v17  ;;  %1636 = vmatprep.subr.bf16.mxu0 %v6234_v34  ;;  %v6294_v17 = vld [vmem:[#allocation8 + $0xa4] ss:$8 sps:$4 sm:$0xff]   ;;  %v6280_v34 = vld [vmem:[#allocation8 + $0x120] ss:$8 sps:$4 sm:$0xff]  }
  0xa0   :  { %567 = vmatmul.mubr.bf16.vlgmr.msra.gmra.mxu0 %v6913_v18  ;;  %647 = vmatmul.mubr.bf16.vlgmr.msra.gmra.mxu1 %v6915_v19 }
  0xa1   :  { %728 = vmatpush1.bf16.msra.mxu1 %v6194_v20  ;;  %576 = vmatprep.mubr.bf16.mxu0 %v6762_v0  ;;  %v6292_v20 = vld [vmem:[#allocation8 + $0xa0] ss:$8 sps:$4 sm:$0xff]  }
  0xa2   :  { %656 = vmatprep.mubr.bf16.mxu1 %v6762_v0  ;;  %729 = vmatprep.subr.bf16.mxu1 %v6201_v21  ;;  %v6253_v21 = vld [vmem:[#allocation8 + $0x150] ss:$8 sps:$4 sm:$0xff]  }
  0xa3   :  { %1637 = vmatpush1.bf16.msra.mxu0 %v6232_v35  ;;  %v6289_v35 = vld [vmem:[#allocation8 + $0x110] ss:$8 sps:$4 sm:$0xff]  }
  0xa4   :  { %1638 = vmatprep.subr.bf16.mxu0 %v6240_v39  ;;  %v6304_v39 = vld [vmem:[#allocation8 + $0x1f0] ss:$8 sps:$4 sm:$0xff]  }
  0xa5   :  { %730 = vmatpush1.bf16.msra.mxu1 %v6199_v22  ;;  %v6264_v22 = vld [vmem:[#allocation8 + $0x144] ss:$8 sps:$4 sm:$0xff]  }
  0xa6   :  { %731 = vmatprep.subr.bf16.mxu1 %v6206_v24  ;;  %v6262_v24 = vld [vmem:[#allocation8 + $0x140] ss:$8 sps:$4 sm:$0xff]  }
  0xa7   :  { %1639 = vmatpush1.bf16.msra.mxu0 %v6238_v38  ;;  %v6306_v38 = vld [vmem:[#allocation8 + $0x1f4] ss:$8 sps:$4 sm:$0xff]  }
  0xa8   :  { %577 = vmatmul.mubr.bf16.gmra.mxu0 %v6921_v23  ;;  %657 = vmatmul.mubr.bf16.gmra.mxu1 %v6923_v25 }
  0xa9   :  { %586 = vmatprep.mubr.bf16.mxu0 %v6762_v0  ;;  %666 = vmatprep.mubr.bf16.mxu1 %v6762_v0 }
  0xaa   :  { %732 = vmatpush1.bf16.msra.mxu1 %v6204_v26  ;;  %1640 = vmatprep.subr.bf16.mxu0 %v6243_v44  ;;  %v6297_v26 = vld [vmem:[#allocation8 + $0x94] ss:$8 sps:$4 sm:$0xff]  }
  0xab   :  { %733 = vmatprep.subr.bf16.mxu1 %v6211_v27  ;;  %1641 = vmatpush1.bf16.msra.mxu0 %v6241_v45  ;;  %v6295_v27 = vld [vmem:[#allocation8 + $0x90] ss:$8 sps:$4 sm:$0xff]   ;;  %v6312_v44 = vld [vmem:[#allocation8 + $0x1d4] ss:$8 sps:$4 sm:$0xff]   ;;  %v6315_v45 = vld [vmem:[#allocation8 + $0x1c4] ss:$8 sps:$4 sm:$0xff]  }
  0xac   :  { %1642 = vmatprep.subr.bf16.mxu0 %v6249_v49  ;;  %v6321_v49 = vld [vmem:[#allocation8 + $0x1a4] ss:$8 sps:$4 sm:$0xff]  }
  0xae   :  { %734 = vmatpush1.bf16.msra.mxu1 %v6209_v28  ;;  %v6303_v28 = vld [vmem:[#allocation8 + $0x84] ss:$8 sps:$4 sm:$0xff]  }
  0xaf   :  { %735 = vmatprep.subr.bf16.mxu1 %v6216_v29  ;;  %1643 = vmatpush1.bf16.msra.mxu0 %v6247_v48  ;;  %v6301_v29 = vld [vmem:[#allocation8 + $0x80] ss:$8 sps:$4 sm:$0xff]  }
  0xb0   :  { %587 = vmatmul.mubr.bf16.gmra.mxu0 %v6929_v30  ;;  %667 = vmatmul.mubr.bf16.gmra.mxu1 %v6931_v31  ;;  %v6319_v48 = vld [vmem:[#allocation8 + $0x1a0] ss:$8 sps:$4 sm:$0xff]  }
  0xb1   :  { %596 = vmatprep.mubr.bf16.mxu0 %v6762_v0  ;;  %676 = vmatprep.mubr.bf16.mxu1 %v6762_v0 }
  0xb2   :  { %736 = vmatpush1.bf16.msra.mxu1 %v6214_v32  ;;  %1644 = vmatprep.subr.bf16.mxu0 %v6252_v52  ;;  %v6271_v32 = vld [vmem:[#allocation8 + $0x130] ss:$8 sps:$4 sm:$0xff]   ;;  %v6324_v52 = vld [vmem:[#allocation8 + $0x194] ss:$8 sps:$4 sm:$0xff]  }
  0xb3   :  { %737 = vmatprep.subr.bf16.mxu1 %v6221_v33  ;;  %1645 = vmatpush1.bf16.msra.mxu0 %v6250_v53  ;;  %v6282_v33 = vld [vmem:[#allocation8 + $0x124] ss:$8 sps:$4 sm:$0xff]  }
  0xb4   :  { %1646 = vmatprep.subr.bf16.mxu0 %v6258_v55  ;;  %v6327_v53 = vld [vmem:[#allocation8 + $0x184] ss:$8 sps:$4 sm:$0xff]  }
  0xb6   :  { %738 = vmatpush1.bf16.msra.mxu1 %v6219_v36  ;;  %v6300_v36 = vld [vmem:[#allocation8 + $0x104] ss:$8 sps:$4 sm:$0xff]  }
  0xb7   :  { %739 = vmatprep.subr.bf16.mxu1 %v6226_v37  ;;  %1647 = vmatpush1.bf16.msra.mxu0 %v6256_v54  ;;  %v6298_v37 = vld [vmem:[#allocation8 + $0x100] ss:$8 sps:$4 sm:$0xff]  }
  0xb8   :  { %597 = vmatmul.mubr.bf16.gmra.mxu0 %v6937_v40  ;;  %677 = vmatmul.mubr.bf16.gmra.mxu1 %v6939_v41  ;;  %v6325_v54 = vld [vmem:[#allocation8 + $0x180] ss:$8 sps:$4 sm:$0xff]  }
  0xb9   :  { %606 = vmatprep.mubr.bf16.mxu0 %v6762_v0  ;;  %686 = vmatprep.mubr.bf16.mxu1 %v6762_v0 }
  0xba   :  { %740 = vmatpush1.bf16.msra.mxu1 %v6224_v42  ;;  %1648 = vmatprep.subr.bf16.mxu0 %v6261_v58  ;;  %v6307_v42 = vld [vmem:[#allocation8 + $0x1e0] ss:$8 sps:$4 sm:$0xff]  }
  0xbb   :  { %741 = vmatprep.subr.bf16.mxu1 %v6231_v43  ;;  %1649 = vmatpush1.bf16.msra.mxu0 %v6259_v59  ;;  %v6310_v43 = vld [vmem:[#allocation8 + $0x1d0] ss:$8 sps:$4 sm:$0xff]  }
  0xbc   :  { %1650 = vmatprep.subr.bf16.mxu0 %v6267_v61 }
  0xbe   :  { %742 = vmatpush1.bf16.msra.mxu1 %v6229_v46  ;;  %v6316_v46 = vld [vmem:[#allocation8 + $0x1b0] ss:$8 sps:$4 sm:$0xff]  }
  0xbf   :  { %1829 = vmatprep.subr.bf16.mxu1 %v6237_v47  ;;  %1651 = vmatpush1.bf16.msra.mxu0 %v6265_v60  ;;  %v6318_v47 = vld [vmem:[#allocation8 + $0x1b4] ss:$8 sps:$4 sm:$0xff]  }
  0xc0   :  { %607 = vmatmul.mubr.bf16.gmra.mxu0 %v6945_v50  ;;  %687 = vmatmul.mubr.bf16.gmra.mxu1 %v6947_v51 }
  0xc1   :  { %616 = vmatprep.mubr.bf16.mxu0 %v6762_v0  ;;  %696 = vmatprep.mubr.bf16.mxu1 %v6762_v0 }
  0xc2   :  { %1652 = vmatprep.subr.bf16.mxu0 %v6270_v1 }
  0xc3   :  { %1653 = vmatpush2.bf16.msra.mxu0 %v6268_v2 }
  0xc4   :  { %1654 = vmatprep.subr.bf16.mxu0 %v6276_v4 }
  0xc7   :  { %1655 = vmatpush2.bf16.msra.mxu0 %v6274_v3 }
  0xc8   :  { %617 = vmatmul.mubr.bf16.gmra.mxu0 %v6953_v56  ;;  %697 = vmatmul.mubr.bf16.gmra.mxu1 %v6955_v57 }
  0xc9   :  { %626 = vmatprep.mubr.bf16.mxu0 %v6762_v0  ;;  %706 = vmatprep.mubr.bf16.mxu1 %v6762_v0 }
  0xca   :  { %1656 = vmatprep.subr.bf16.mxu0 %v6279_v7 }
  0xcb   :  { %1657 = vmatpush2.bf16.msra.mxu0 %v6277_v8 }
  0xcc   :  { %1658 = vmatprep.subr.bf16.mxu0 %v6285_v10 }
  0xcf   :  { %1659 = vmatpush2.bf16.msra.mxu0 %v6283_v9 }
  0xd0   :  { %627 = vmatmul.mubr.bf16.gmra.mxu0 %v6961_v62  ;;  %707 = vmatmul.mubr.bf16.gmra.mxu1 %v6963_v63 }
  0xd1   :  { %636 = vmatprep.mubr.bf16.mxu0 %v6762_v0  ;;  %716 = vmatprep.mubr.bf16.mxu1 %v6762_v0 }
  0xd2   :  { %1660 = vmatprep.subr.bf16.mxu0 %v6288_v13 }
  0xd3   :  { %1661 = vmatpush2.bf16.msra.mxu0 %v6286_v15 }
  0xd4   :  { %1662 = vmatprep.subr.bf16.mxu0 %v6294_v17 }
  0xd7   :  { %1663 = vmatpush2.bf16.msra.mxu0 %v6292_v20 }
  0xd8   :  { %637 = vmatmul.mubr.bf16.gmra.mxu0 %v6969_v5  ;;  %717 = vmatmul.mubr.bf16.gmra.mxu1 %v6971_v6 }
  0xd9   :  { %759 = vmatprep.mubr.bf16.mxu1 %v6762_v0  ;;  %1664 = vmatprep.subr.bf16.mxu0 %v6297_v26 }
  0xdb   :  { %1665 = vmatpush2.bf16.msra.mxu0 %v6295_v27 }
  0xdc   :  { %1666 = vmatprep.subr.bf16.mxu0 %v6303_v28 }
  0xdf   :  { %1667 = vmatpush2.bf16.msra.mxu0 %v6301_v29 }
  0xe0   :  { %760 = vmatmul.mubr.bf16.vlgmr.msra.gmra.mxu1 %v6913_v18  ;;  %v6273_v18 = vld [vmem:[#allocation8 + $0x134] ss:$8 sps:$4 sm:$0xff]  }
  0xe1   :  { %769 = vmatprep.mubr.bf16.mxu1 %v6762_v0  ;;  %1830 = vmatpush1.bf16.msra.mxu1 %v6235_v11 }
  0xe2   :  { %1831 = vmatprep.subr.bf16.mxu1 %v6246_v12 }
  0xe5   :  { %1832 = vmatpush1.bf16.msra.mxu1 %v6244_v14 }
  0xe6   :  { %1833 = vmatprep.subr.bf16.mxu1 %v6255_v16 }
  0xe8   :  { %770 = vmatmul.mubr.bf16.gmra.mxu1 %v6921_v23  ;;  %v6291_v23 = vld [vmem:[#allocation8 + $0x114] ss:$8 sps:$4 sm:$0xff]  }
  0xe9   :  { %779 = vmatprep.mubr.bf16.mxu1 %v6762_v0  ;;  %1834 = vmatpush1.bf16.msra.mxu1 %v6253_v21 }
  0xea   :  { %1835 = vmatprep.subr.bf16.mxu1 %v6264_v22 }
  0xed   :  { %1836 = vmatpush1.bf16.msra.mxu1 %v6262_v24 }
  0xee   :  { %1837 = vmatprep.subr.bf16.mxu1 %v6273_v18 }
  0xf0   :  { %780 = vmatmul.mubr.bf16.gmra.mxu1 %v6929_v30  ;;  %v6309_v30 = vld [vmem:[#allocation8 + $0x1e4] ss:$8 sps:$4 sm:$0xff]  }
  0xf1   :  { %789 = vmatprep.mubr.bf16.mxu1 %v6762_v0  ;;  %1838 = vmatpush1.bf16.msra.mxu1 %v6271_v32 }
  0xf2   :  { %1839 = vmatprep.subr.bf16.mxu1 %v6282_v33 }
  0xf5   :  { %1840 = vmatpush1.bf16.msra.mxu1 %v6280_v34 }
  0xf6   :  { %1841 = vmatprep.subr.bf16.mxu1 %v6291_v23 }
  0xf8   :  { %790 = vmatmul.mubr.bf16.gmra.mxu1 %v6937_v40  ;;  %v6313_v40 = vld [vmem:[#allocation8 + $0x1c0] ss:$8 sps:$4 sm:$0xff]  }
  0xf9   :  { %799 = vmatprep.mubr.bf16.mxu1 %v6762_v0  ;;  %1842 = vmatpush1.bf16.msra.mxu1 %v6289_v35 }
  0xfa   :  { %1843 = vmatprep.subr.bf16.mxu1 %v6300_v36 }
  0xfd   :  { %1844 = vmatpush1.bf16.msra.mxu1 %v6298_v37 }
  0xfe   :  { %1845 = vmatprep.subr.bf16.mxu1 %v6306_v38 }
 0x100   :  { %800 = vmatmul.mubr.bf16.gmra.mxu1 %v6945_v50  ;;  %v6322_v50 = vld [vmem:[#allocation8 + $0x190] ss:$8 sps:$4 sm:$0xff]  }
 0x101   :  { %809 = vmatprep.mubr.bf16.mxu1 %v6762_v0  ;;  %1846 = vmatpush2.bf16.msra.mxu1 %v6304_v39 }
 0x102   :  { %1847 = vmatprep.subr.bf16.mxu1 %v6309_v30 }
 0x105   :  { %1848 = vmatpush2.bf16.msra.mxu1 %v6307_v42 }
 0x106   :  { %1849 = vmatprep.subr.bf16.mxu1 %v6312_v44 }
 0x108   :  { %810 = vmatmul.mubr.bf16.gmra.mxu1 %v6953_v56 }
 0x109   :  { %819 = vmatprep.mubr.bf16.mxu1 %v6762_v0  ;;  %1850 = vmatpush2.bf16.msra.mxu1 %v6310_v43 }
 0x10a   :  { %1851 = vmatprep.subr.bf16.mxu1 %v6315_v45 }
 0x10d   :  { %1852 = vmatpush2.bf16.msra.mxu1 %v6313_v40 }
 0x10e   :  { %1853 = vmatprep.subr.bf16.mxu1 %v6318_v47 }
 0x110   :  { %820 = vmatmul.mubr.bf16.gmra.mxu1 %v6961_v62 }
 0x111   :  { %829 = vmatprep.mubr.bf16.mxu1 %v6762_v0  ;;  %1854 = vmatpush2.bf16.msra.mxu1 %v6316_v46 }
 0x112   :  { %1855 = vmatprep.subr.bf16.mxu1 %v6321_v49 }
 0x115   :  { %1856 = vmatpush2.bf16.msra.mxu1 %v6319_v48 }
 0x116   :  { %1857 = vmatprep.subr.bf16.mxu1 %v6324_v52 }
 0x118   :  { %830 = vmatmul.mubr.bf16.gmra.mxu1 %v6969_v5 }
 0x119   :  { %839 = vmatprep.mubr.bf16.mxu1 %v6762_v0  ;;  %1858 = vmatpush2.bf16.msra.mxu1 %v6322_v50 }
 0x11a   :  { %1859 = vmatprep.subr.bf16.mxu1 %v6327_v53 }
 0x11d   :  { %1860 = vmatpush2.bf16.msra.mxu1 %v6325_v54 }
 0x120   :  { %840 = vmatmul.mubr.bf16.gmra.mxu1 %v6915_v19  ;;  %v258_v19 = vlaneseq }
 0x121   :  { %849 = vmatprep.mubr.bf16.mxu1 %v6762_v0 }
 0x128   :  { %850 = vmatmul.mubr.bf16.gmra.mxu1 %v6923_v25  ;;  %v7006_v25 = vshrl.u32 %v258_v19, 7 }
 0x129   :  { %859 = vmatprep.mubr.bf16.mxu1 %v6762_v0 }
 0x12a   :  { %v7019_v55 = vsub.s32 1, %v7006_v25 }
 0x130   :  { %860 = vmatmul.mubr.bf16.gmra.mxu1 %v6931_v31  ;;  %v7010_v31 = vsub.s32 0, %v7006_v25 }
 0x131   :  { %869 = vmatprep.mubr.bf16.mxu1 %v6762_v0 }
 0x138   :  { %870 = vmatmul.mubr.bf16.gmra.mxu1 %v6939_v41  ;;  %v7012_v41 = vld [vmem:[#allocation7] sm:$0xf] }
 0x139   :  { %879 = vmatprep.mubr.bf16.mxu1 %v6762_v0  ;;  %v7025_v60 = vrot.slane %v7012_v41, %v7019_v55 }
 0x140   :  { %880 = vmatmul.mubr.bf16.gmra.mxu1 %v6947_v51  ;;  %v7016_v51 = vrot.slane %v7012_v41, %v7010_v31 }
 0x141   :  { %889 = vmatprep.mubr.bf16.mxu1 %v6762_v0 }
 0x148   :  { %890 = vmatmul.mubr.bf16.gmra.mxu1 %v6955_v57 }
 0x149   :  { %899 = vmatprep.mubr.bf16.mxu1 %v6762_v0 }
 0x150   :  { %900 = vmatmul.mubr.bf16.gmra.mxu1 %v6963_v63 }
 0x151   :  { %909 = vmatprep.mubr.bf16.mxu1 %v6762_v0 }
 0x158   :  { %910 = vmatmul.mubr.bf16.gmra.mxu1 %v6971_v6 }
 0x160   :  { %v568_v56 = vpop.f32.mrf.mxu0  ;;  %v648_v57 = vpop.f32.mrf.mxu1 }
 0x161   :  { %v569_v58 = vadd.f32 %v568_v56, %v7016_v51  ;;  %v649_v59 = vadd.f32 %v648_v57, %v7016_v51 }
 0x162   :  { %v570_v61 = vpop.f32.mrf.mxu0  ;;  %v7027_v62 = vpop.f32.mrf.mxu1 }
 0x163   :  { %v571_v63 = vadd.f32 %v570_v61, %v7025_v60  ;;  %v920_v3 = vmul.f32 0.1, %v569_v58  ;;  %v984_v4 = vmul.f32 0.1, %v649_v59 }
 0x164   :  { %v572_v1 = vpop.f32.mrf.mxu0  ;;  %v652_v2 = vpop.f32.mrf.mxu1 }
 0x165   :  { %v921_v5 = vmul.f32 0.1, %v571_v63  ;;  %v573_v6 = vadd.f32 %v572_v1, %v7016_v51  ;;  %v653_v7 = vadd.f32 %v652_v2, %v7016_v51  ;;  %v1048_v15 = vmax.f32 %v569_v58, %v920_v3 }
 0x166   :  { %v574_v8 = vpop.f32.mrf.mxu0  ;;  %v7032_v9 = vpop.f32.mrf.mxu1  ;;  %v1112_v21 = vmax.f32 %v649_v59, %v984_v4 }
 0x167   :  { %v575_v10 = vadd.f32 %v574_v8, %v7025_v60  ;;  %v924_v11 = vmul.f32 0.1, %v573_v6  ;;  %v988_v12 = vmul.f32 0.1, %v653_v7  ;;  %v1049_v22 = vmax.f32 %v571_v63, %v921_v5 }
 0x168   :  { %v578_v13 = vpop.f32.mrf.mxu0  ;;  %v658_v14 = vpop.f32.mrf.mxu1 }
 0x169   :  { %v925_v16 = vmul.f32 0.1, %v575_v10  ;;  %v579_v17 = vadd.f32 %v578_v13, %v7016_v51  ;;  %v659_v20 = vadd.f32 %v658_v14, %v7016_v51  ;;  %v1052_v24 = vmax.f32 %v573_v6, %v924_v11 }
 0x16a   :  { %v1116_v26 = vmax.f32 %v653_v7, %v988_v12  ;;  %v580_v18 = vpop.f32.mrf.mxu0  ;;  %v7037_v27 = vpop.f32.mrf.mxu1 }
 0x16b   :  { %v1053_v28 = vmax.f32 %v575_v10, %v925_v16  ;;  %v581_v29 = vadd.f32 %v580_v18, %v7025_v60  ;;  %v1176_v23 = vpack.c.bf16 %v1052_v24, %v1048_v15  ;;  %v928_v35 = vmul.f32 0.1, %v579_v17 }
 0x16c   :  { %v582_v32 = vpop.f32.mrf.mxu0  ;;  %v662_v33 = vpop.f32.mrf.mxu1  ;;  %v7040_v34 = vpack.c.bf16 %v1116_v26, %v1112_v21  ;;  %v992_v38 = vmul.f32 0.1, %v659_v20 }
 0x16d   :  { %v583_v36 = vadd.f32 %v582_v32, %v7016_v51  ;;  %v663_v37 = vadd.f32 %v662_v33, %v7016_v51  ;;  %v929_v39 = vmul.f32 0.1, %v581_v29  ;;  %v1177_v43 = vpack.c.bf16 %v1053_v28, %v1049_v22 }
 0x16e   :  { %v584_v30 = vpop.f32.mrf.mxu0  ;;  %v7044_v42 = vpop.f32.mrf.mxu1  ;;  %v1056_v48 = vmax.f32 %v579_v17, %v928_v35  ;;  %v1120_v53 = vmax.f32 %v659_v20, %v992_v38 }
 0x16f   :  { %v932_v44 = vmul.f32 0.1, %v583_v36  ;;  %v996_v40 = vmul.f32 0.1, %v663_v37  ;;  %v585_v45 = vadd.f32 %v584_v30, %v7025_v60  ;;  %1668 = vmatprep.mubr.bf16.mxu0 %v1177_v43  ;;  %v1057_v54 = vmax.f32 %v581_v29, %v929_v39 }
 0x170   :  { %v588_v46 = vpop.f32.mrf.mxu0  ;;  %v668_v47 = vpop.f32.mrf.mxu1  ;;  %1669 = vmatmul.mubr.bf16.vlgmr.msra.gmra.mxu0 %v1176_v23 }
 0x171   :  { %v1060_v49 = vmax.f32 %v583_v36, %v932_v44  ;;  %v1124_v50 = vmax.f32 %v663_v37, %v996_v40  ;;  %v933_v52 = vmul.f32 0.1, %v585_v45  ;;  %v589_v19 = vadd.f32 %v588_v46, %v7016_v51 }
 0x172   :  { %v669_v56 = vadd.f32 %v668_v47, %v7016_v51  ;;  %v590_v57 = vpop.f32.mrf.mxu0  ;;  %v7049_v58 = vpop.f32.mrf.mxu1 }
 0x173   :  { %v1061_v59 = vmax.f32 %v585_v45, %v933_v52  ;;  %v591_v61 = vadd.f32 %v590_v57, %v7025_v60  ;;  %v936_v63 = vmul.f32 0.1, %v589_v19  ;;  %v7052_v3 = vpack.c.bf16 %v1124_v50, %v1120_v53 }
 0x174   :  { %v592_v1 = vpop.f32.mrf.mxu0  ;;  %v672_v2 = vpop.f32.mrf.mxu1  ;;  %v1180_v6 = vpack.c.bf16 %v1060_v49, %v1056_v48  ;;  %v1000_v7 = vmul.f32 0.1, %v669_v56 }
 0x175   :  { %v593_v4 = vadd.f32 %v592_v1, %v7016_v51  ;;  %v673_v5 = vadd.f32 %v672_v2, %v7016_v51  ;;  %v937_v8 = vmul.f32 0.1, %v591_v61  ;;  %v1181_v12 = vpack.c.bf16 %v1061_v59, %v1057_v54 }
 0x176   :  { %v594_v10 = vpop.f32.mrf.mxu0  ;;  %v7056_v11 = vpop.f32.mrf.mxu1  ;;  %v1064_v15 = vmax.f32 %v589_v19, %v936_v63  ;;  %v1128_v18 = vmax.f32 %v669_v56, %v1000_v7 }
 0x177   :  { %v940_v13 = vmul.f32 0.1, %v593_v4  ;;  %v1004_v14 = vmul.f32 0.1, %v673_v5  ;;  %v595_v16 = vadd.f32 %v594_v10, %v7025_v60  ;;  %1678 = vmatprep.mubr.bf16.mxu0 %v1181_v12  ;;  %v1065_v28 = vmax.f32 %v591_v61, %v937_v8 }
 0x178   :  { %v598_v17 = vpop.f32.mrf.mxu0  ;;  %v678_v20 = vpop.f32.mrf.mxu1  ;;  %1679 = vmatmul.mubr.bf16.gmra.mxu0 %v1180_v6 }
 0x179   :  { %v1068_v21 = vmax.f32 %v593_v4, %v940_v13  ;;  %v1132_v22 = vmax.f32 %v673_v5, %v1004_v14  ;;  %v599_v24 = vadd.f32 %v598_v17, %v7016_v51  ;;  %v679_v26 = vadd.f32 %v678_v20, %v7016_v51  ;;  %v6328_v17 = vld [vmem:[#allocation10 + $0x78] sm:$0xff]  }
 0x17a   :  { %v941_v29 = vmul.f32 0.1, %v595_v16  ;;  %v600_v32 = vpop.f32.mrf.mxu0  ;;  %v7061_v33 = vpop.f32.mrf.mxu1  ;;  %v6329_v20 = vld [vmem:[#allocation10 + $0x38] sm:$0xff]   ;;  %5654 = vmatprep.subr.bf16.mxu0 %v6328_v17 }
 0x17b   :  { %v601_v23 = vadd.f32 %v600_v32, %v7025_v60  ;;  %v7064_v38 = vpack.c.bf16 %v1132_v22, %v1128_v18  ;;  %v944_v39 = vmul.f32 0.1, %v599_v24  ;;  %v1008_v30 = vmul.f32 0.1, %v679_v26  ;;  %5655 = vmatpush3.bf16.msra.mxu0 %v6329_v20 }
 0x17c   :  { %v1069_v35 = vmax.f32 %v595_v16, %v941_v29  ;;  %v602_v36 = vpop.f32.mrf.mxu0  ;;  %v682_v37 = vpop.f32.mrf.mxu1  ;;  %v1184_v43 = vpack.c.bf16 %v1068_v21, %v1064_v15 }
 0x17d   :  { %v945_v44 = vmul.f32 0.1, %v601_v23  ;;  %v603_v40 = vadd.f32 %v602_v36, %v7016_v51  ;;  %v683_v45 = vadd.f32 %v682_v37, %v7016_v51  ;;  %v1072_v19 = vmax.f32 %v599_v24, %v944_v39 }
 0x17e   :  { %v604_v46 = vpop.f32.mrf.mxu0  ;;  %v7068_v47 = vpop.f32.mrf.mxu1  ;;  %v1185_v48 = vpack.c.bf16 %v1069_v35, %v1065_v28  ;;  %v1136_v61 = vmax.f32 %v679_v26, %v1008_v30 }
 0x17f   :  { %v605_v49 = vadd.f32 %v604_v46, %v7025_v60  ;;  %v948_v50 = vmul.f32 0.1, %v603_v40  ;;  %v1012_v52 = vmul.f32 0.1, %v683_v45  ;;  %v1073_v63 = vmax.f32 %v601_v23, %v945_v44 }
 0x180   :  { %1688 = vmatprep.mubr.bf16.mxu0 %v1185_v48  ;;  %v608_v53 = vpop.f32.mrf.mxu0  ;;  %v688_v54 = vpop.f32.mrf.mxu1 }
 0x181   :  { %v949_v56 = vmul.f32 0.1, %v605_v49  ;;  %v609_v57 = vadd.f32 %v608_v53, %v7016_v51  ;;  %v689_v59 = vadd.f32 %v688_v54, %v7016_v51  ;;  %1689 = vmatmul.mubr.bf16.gmra.mxu0 %v1184_v43  ;;  %v1076_v1 = vmax.f32 %v603_v40, %v948_v50 }
 0x182   :  { %v1140_v2 = vmax.f32 %v683_v45, %v1012_v52  ;;  %v610_v4 = vpop.f32.mrf.mxu0  ;;  %v7073_v5 = vpop.f32.mrf.mxu1 }
 0x183   :  { %v1077_v6 = vmax.f32 %v605_v49, %v949_v56  ;;  %v611_v7 = vadd.f32 %v610_v4, %v7025_v60  ;;  %v952_v13 = vmul.f32 0.1, %v609_v57  ;;  %v1188_v16 = vpack.c.bf16 %v1076_v1, %v1072_v19 }
 0x184   :  { %v612_v8 = vpop.f32.mrf.mxu0  ;;  %v692_v10 = vpop.f32.mrf.mxu1  ;;  %v7076_v12 = vpack.c.bf16 %v1140_v2, %v1136_v61  ;;  %v1016_v21 = vmul.f32 0.1, %v689_v59 }
 0x185   :  { %v613_v14 = vadd.f32 %v612_v8, %v7016_v51  ;;  %v693_v15 = vadd.f32 %v692_v10, %v7016_v51  ;;  %v953_v22 = vmul.f32 0.1, %v611_v7  ;;  %v1189_v18 = vpack.c.bf16 %v1077_v6, %v1073_v63 }
 0x186   :  { %v614_v24 = vpop.f32.mrf.mxu0  ;;  %v7080_v26 = vpop.f32.mrf.mxu1  ;;  %v1080_v36 = vmax.f32 %v609_v57, %v952_v13  ;;  %v1144_v43 = vmax.f32 %v689_v59, %v1016_v21 }
 0x187   :  { %v956_v28 = vmul.f32 0.1, %v613_v14  ;;  %v1020_v29 = vmul.f32 0.1, %v693_v15  ;;  %v615_v32 = vadd.f32 %v614_v24, %v7025_v60  ;;  %1698 = vmatprep.mubr.bf16.mxu0 %v1189_v18  ;;  %v1081_v44 = vmax.f32 %v611_v7, %v953_v22 }
 0x188   :  { %v618_v23 = vpop.f32.mrf.mxu0  ;;  %v698_v35 = vpop.f32.mrf.mxu1 }
 0x189   :  { %v1084_v37 = vmax.f32 %v613_v14, %v956_v28  ;;  %v1148_v39 = vmax.f32 %v693_v15, %v1020_v29  ;;  %v957_v30 = vmul.f32 0.1, %v615_v32  ;;  %1699 = vmatmul.mubr.bf16.gmra.mxu0 %v1188_v16  ;;  %v619_v40 = vadd.f32 %v618_v23, %v7016_v51 }
 0x18a   :  { %v699_v45 = vadd.f32 %v698_v35, %v7016_v51  ;;  %v620_v46 = vpop.f32.mrf.mxu0  ;;  %v7085_v48 = vpop.f32.mrf.mxu1 }
 0x18b   :  { %v1085_v49 = vmax.f32 %v615_v32, %v957_v30  ;;  %v621_v50 = vadd.f32 %v620_v46, %v7025_v60  ;;  %v960_v52 = vmul.f32 0.1, %v619_v40  ;;  %v7088_v19 = vpack.c.bf16 %v1148_v39, %v1144_v43  ;;  %v6330_v43 = vld [vmem:[#allocation10 + $0x70] sm:$0xff]  }
 0x18c   :  { %v622_v53 = vpop.f32.mrf.mxu0  ;;  %v702_v54 = vpop.f32.mrf.mxu1  ;;  %v1192_v59 = vpack.c.bf16 %v1084_v37, %v1080_v36  ;;  %v1024_v61 = vmul.f32 0.1, %v699_v45  ;;  %5656 = vmatprep.subr.bf16.mxu0 %v6330_v43 }
 0x18d   :  { %v623_v56 = vadd.f32 %v622_v53, %v7016_v51  ;;  %v703_v57 = vadd.f32 %v702_v54, %v7016_v51  ;;  %v961_v63 = vmul.f32 0.1, %v621_v50  ;;  %v1193_v4 = vpack.c.bf16 %v1085_v49, %v1081_v44  ;;  %v6331_v44 = vld [vmem:[#allocation10 + $0x30] sm:$0xff]  }
 0x18e   :  { %v624_v1 = vpop.f32.mrf.mxu0  ;;  %v7092_v2 = vpop.f32.mrf.mxu1  ;;  %v1088_v8 = vmax.f32 %v619_v40, %v960_v52  ;;  %v1152_v21 = vmax.f32 %v699_v45, %v1024_v61  ;;  %5657 = vmatpush3.bf16.msra.mxu0 %v6331_v44 }
 0x18f   :  { %v964_v6 = vmul.f32 0.1, %v623_v56  ;;  %v1028_v7 = vmul.f32 0.1, %v703_v57  ;;  %v625_v10 = vadd.f32 %v624_v1, %v7025_v60  ;;  %1708 = vmatprep.mubr.bf16.mxu0 %v1193_v4  ;;  %v1089_v22 = vmax.f32 %v621_v50, %v961_v63 }
 0x190   :  { %v628_v13 = vpop.f32.mrf.mxu0  ;;  %v708_v14 = vpop.f32.mrf.mxu1 }
 0x191   :  { %v1092_v15 = vmax.f32 %v623_v56, %v964_v6  ;;  %v1156_v16 = vmax.f32 %v703_v57, %v1028_v7  ;;  %v629_v17 = vadd.f32 %v628_v13, %v7016_v51  ;;  %v709_v20 = vadd.f32 %v708_v14, %v7016_v51  ;;  %1709 = vmatmul.mubr.bf16.gmra.mxu0 %v1192_v59 }
 0x192   :  { %v965_v24 = vmul.f32 0.1, %v625_v10  ;;  %v630_v18 = vpop.f32.mrf.mxu0  ;;  %v7097_v28 = vpop.f32.mrf.mxu1 }
 0x193   :  { %v631_v29 = vadd.f32 %v630_v18, %v7025_v60  ;;  %v7100_v36 = vpack.c.bf16 %v1156_v16, %v1152_v21  ;;  %v968_v37 = vmul.f32 0.1, %v629_v17  ;;  %v1032_v39 = vmul.f32 0.1, %v709_v20 }
 0x194   :  { %v1093_v32 = vmax.f32 %v625_v10, %v965_v24  ;;  %v632_v23 = vpop.f32.mrf.mxu0  ;;  %v712_v35 = vpop.f32.mrf.mxu1  ;;  %v1196_v30 = vpack.c.bf16 %v1092_v15, %v1088_v8  ;;  %v7871_v16 = vsub.s32 2, %v7006_v25  ;;  %v7870_v21 = vsub.s32 3, %v7006_v25 }
 0x195   :  { %v969_v40 = vmul.f32 0.1, %v631_v29  ;;  %v633_v45 = vadd.f32 %v632_v23, %v7016_v51  ;;  %v713_v46 = vadd.f32 %v712_v35, %v7016_v51  ;;  %v1096_v61 = vmax.f32 %v629_v17, %v968_v37 }
 0x196   :  { %v634_v49 = vpop.f32.mrf.mxu0  ;;  %v7104_v50 = vpop.f32.mrf.mxu1  ;;  %v1197_v52 = vpack.c.bf16 %v1093_v32, %v1089_v22  ;;  %v1160_v6 = vmax.f32 %v709_v20, %v1032_v39  ;;  %v655_v17 = vadd.f32 %v7032_v9, %v7025_v60  ;;  %v651_v37 = vadd.f32 %v7027_v62, %v7025_v60 }
 0x197   :  { %v635_v53 = vadd.f32 %v634_v49, %v7025_v60  ;;  %v972_v54 = vmul.f32 0.1, %v633_v45  ;;  %v1036_v56 = vmul.f32 0.1, %v713_v46  ;;  %v1097_v7 = vmax.f32 %v631_v29, %v969_v40 }
 0x198   :  { %1718 = vmatprep.mubr.bf16.mxu0 %v1197_v52  ;;  %v638_v57 = vpop.f32.mrf.mxu0  ;;  %v718_v59 = vpop.f32.mrf.mxu1  ;;  %v7128_v49 = vrot.slane %v7012_v41, %v7870_v21  ;;  %v7133_v62 = vrot.slane %v7012_v41, %v7871_v16 }
 0x199   :  { %v973_v63 = vmul.f32 0.1, %v635_v53  ;;  %v639_v1 = vadd.f32 %v638_v57, %v7016_v51  ;;  %v719_v4 = vadd.f32 %v718_v59, %v7016_v51  ;;  %1719 = vmatmul.mubr.bf16.gmra.mxu0 %v1196_v30  ;;  %v1100_v8 = vmax.f32 %v633_v45, %v972_v54 }
 0x19a   :  { %v1164_v10 = vmax.f32 %v713_v46, %v1036_v56  ;;  %v640_v13 = vpop.f32.mrf.mxu0  ;;  %v7109_v14 = vpop.f32.mrf.mxu1 }
 0x19b   :  { %v1101_v15 = vmax.f32 %v635_v53, %v973_v63  ;;  %v976_v22 = vmul.f32 0.1, %v639_v1  ;;  %v641_v24 = vadd.f32 %v640_v13, %v7025_v60  ;;  %v1200_v35 = vpack.c.bf16 %v1100_v8, %v1096_v61 }
 0x19c   :  { %v642_v18 = vpop.f32.mrf.mxu0  ;;  %v722_v32 = vpop.f32.mrf.mxu1  ;;  %v7116_v20 = vpack.c.bf16 %v1164_v10, %v1160_v6  ;;  %v1040_v39 = vmul.f32 0.1, %v719_v4  ;;  %v985_v61 = vmul.f32 0.1, %v651_v37  ;;  %v6332_v10 = vld [vmem:[#allocation10 + $0x68] sm:$0xff]  }
 0x19d   :  { %v643_v29 = vadd.f32 %v642_v18, %v7016_v51  ;;  %v723_v23 = vadd.f32 %v722_v32, %v7016_v51  ;;  %v977_v30 = vmul.f32 0.1, %v641_v24  ;;  %v1201_v9 = vpack.c.bf16 %v1101_v15, %v1097_v7  ;;  %5658 = vmatprep.subr.bf16.mxu0 %v6332_v10 }
 0x19e   :  { %v644_v43 = vpop.f32.mrf.mxu0  ;;  %v7122_v44 = vpop.f32.mrf.mxu1  ;;  %v989_v51 = vmul.f32 0.1, %v655_v17  ;;  %v1104_v52 = vmax.f32 %v639_v1, %v976_v22  ;;  %v1168_v63 = vmax.f32 %v719_v4, %v1040_v39  ;;  %v6333_v1 = vld [vmem:[#allocation10 + $0x28] sm:$0xff]   ;;  %v665_v15 = vadd.f32 %v7044_v42, %v7025_v60 }
 0x19f   :  { %v980_v40 = vmul.f32 0.1, %v643_v29  ;;  %v1044_v45 = vmul.f32 0.1, %v723_v23  ;;  %v645_v46 = vadd.f32 %v644_v43, %v7025_v60  ;;  %1728 = vmatprep.mubr.bf16.mxu0 %v1201_v9  ;;  %v1105_v54 = vmax.f32 %v641_v24, %v977_v30  ;;  %5659 = vmatpush3.bf16.msra.mxu0 %v6333_v1 }
 0x1a0   :  { %v761_v53 = vpop.f32.mrf.mxu1  ;;  %v1117_v13 = vmax.f32 %v655_v17, %v989_v51  ;;  %v1113_v4 = vmax.f32 %v651_v37, %v985_v61  ;;  %v997_v30 = vmul.f32 0.1, %v665_v15  ;;  %v671_v10 = vadd.f32 %v7049_v58, %v7025_v60  ;;  %v6334_v58 = vld [vmem:[#allocation10 + $0x60] sm:$0xff]  }
 0x1a1   :  { %v1108_v56 = vmax.f32 %v643_v29, %v980_v40  ;;  %v1172_v57 = vmax.f32 %v723_v23, %v1044_v45  ;;  %v981_v59 = vmul.f32 0.1, %v645_v46  ;;  %1729 = vmatmul.mubr.bf16.gmra.mxu0 %v1200_v35  ;;  %v762_v41 = vadd.f32 %v761_v53, %v7133_v62  ;;  %5660 = vmatprep.subr.bf16.mxu0 %v6334_v58 }
 0x1a2   :  { %v763_v6 = vpop.f32.mrf.mxu1  ;;  %v661_v23 = vadd.f32 %v7037_v27, %v7025_v60  ;;  %v1209_v40 = vpack.c.bf16 %v1117_v13, %v1113_v4  ;;  %v1001_v4 = vmul.f32 0.1, %v671_v10 }
 0x1a3   :  { %v1109_v7 = vmax.f32 %v645_v46, %v981_v59  ;;  %v764_v8 = vadd.f32 %v763_v6, %v7128_v49  ;;  %v7139_v24 = vpack.c.bf16 %v1172_v57, %v1168_v63  ;;  %v1204_v29 = vpack.c.bf16 %v1108_v56, %v1104_v52 }
 0x1a4   :  { %v765_v22 = vpop.f32.mrf.mxu1  ;;  %v922_v43 = vmul.f32 0.1, %v762_v41  ;;  %v993_v46 = vmul.f32 0.1, %v661_v23  ;;  %v675_v56 = vadd.f32 %v7056_v11, %v7025_v60 }
 0x1a5   :  { %v766_v18 = vadd.f32 %v765_v22, %v7133_v62  ;;  %v1205_v32 = vpack.c.bf16 %v1109_v7, %v1105_v54  ;;  %v923_v17 = vmul.f32 0.1, %v764_v8  ;;  %v1125_v54 = vmax.f32 %v665_v15, %v997_v30 }
 0x1a6   :  { %v767_v35 = vpop.f32.mrf.mxu1  ;;  %v1050_v57 = vmax.f32 %v762_v41, %v922_v43  ;;  %v1121_v7 = vmax.f32 %v661_v23, %v993_v46 }
 0x1a7   :  { %v926_v39 = vmul.f32 0.1, %v766_v18  ;;  %v768_v42 = vadd.f32 %v767_v35, %v7128_v49  ;;  %1738 = vmatprep.mubr.bf16.mxu0 %v1205_v32  ;;  %v1051_v52 = vmax.f32 %v764_v8, %v923_v17  ;;  %v6335_v17 = vld [vmem:[#allocation10 + $0x20] sm:$0xff]  }
 0x1a8   :  { %v771_v9 = vpop.f32.mrf.mxu1  ;;  %v1213_v32 = vpack.c.bf16 %v1125_v54, %v1121_v7  ;;  %5661 = vmatpush3.bf16.msra.mxu0 %v6335_v17 }
 0x1a9   :  { %v927_v45 = vmul.f32 0.1, %v768_v42  ;;  %1739 = vmatmul.mubr.bf16.gmra.mxu0 %v1204_v29  ;;  %v1054_v51 = vmax.f32 %v766_v18, %v926_v39  ;;  %v772_v59 = vadd.f32 %v771_v9, %v7133_v62  ;;  %v1005_v18 = vmul.f32 0.1, %v675_v56 }
 0x1aa   :  { %1748 = vmatprep.mubr.bf16.mxu0 %v1209_v40  ;;  %v773_v37 = vpop.f32.mrf.mxu1  ;;  %v685_v9 = vadd.f32 %v7068_v47, %v7025_v60 }
 0x1ab   :  { %v1055_v53 = vmax.f32 %v768_v42, %v927_v45  ;;  %v774_v27 = vadd.f32 %v773_v37, %v7128_v49  ;;  %v1178_v1 = vpack.c.bf16 %v1054_v51, %v1050_v57  ;;  %v930_v11 = vmul.f32 0.1, %v772_v59 }
 0x1ac   :  { %v775_v61 = vpop.f32.mrf.mxu1  ;;  %v1133_v43 = vmax.f32 %v675_v56, %v1005_v18  ;;  %v1129_v37 = vmax.f32 %v671_v10, %v1001_v4  ;;  %v1013_v47 = vmul.f32 0.1, %v685_v9  ;;  %v691_v4 = vadd.f32 %v7073_v5, %v7025_v60  ;;  %v6336_v5 = vld [vmem:[#allocation10 + $0x58] sm:$0xff]  }
 0x1ad   :  { %v776_v63 = vadd.f32 %v775_v61, %v7133_v62  ;;  %v1179_v6 = vpack.c.bf16 %v1055_v53, %v1051_v52  ;;  %v931_v13 = vmul.f32 0.1, %v774_v27  ;;  %v1058_v40 = vmax.f32 %v772_v59, %v930_v11  ;;  %5662 = vmatprep.subr.bf16.mxu0 %v6336_v5 }
 0x1ae   :  { %v777_v8 = vpop.f32.mrf.mxu1  ;;  %v681_v52 = vadd.f32 %v7061_v33, %v7025_v60 }
 0x1af   :  { %v934_v22 = vmul.f32 0.1, %v776_v63  ;;  %v778_v15 = vadd.f32 %v777_v8, %v7128_v49  ;;  %1861 = vmatprep.mubr.bf16.mxu1 %v1179_v6  ;;  %v1059_v39 = vmax.f32 %v774_v27, %v931_v13 }
 0x1b0   :  { %v781_v41 = vpop.f32.mrf.mxu1  ;;  %1862 = vmatmul.mubr.bf16.vlgmr.msra.gmra.mxu1 %v1178_v1  ;;  %v1009_v7 = vmul.f32 0.1, %v681_v52 }
 0x1b1   :  { %v935_v29 = vmul.f32 0.1, %v778_v15  ;;  %1749 = vmatmul.mubr.bf16.gmra.mxu0 %v7040_v34  ;;  %v1062_v23 = vmax.f32 %v776_v63, %v934_v22  ;;  %v782_v45 = vadd.f32 %v781_v41, %v7133_v62  ;;  %v1217_v63 = vpack.c.bf16 %v1133_v43, %v1129_v37 }
 0x1b2   :  { %1758 = vmatprep.mubr.bf16.mxu0 %v1213_v32  ;;  %v783_v35 = vpop.f32.mrf.mxu1  ;;  %v1141_v22 = vmax.f32 %v685_v9, %v1013_v47 }
 0x1b3   :  { %v1063_v42 = vmax.f32 %v778_v15, %v935_v29  ;;  %v784_v30 = vadd.f32 %v783_v35, %v7128_v49  ;;  %v1182_v27 = vpack.c.bf16 %v1062_v23, %v1058_v40  ;;  %v938_v59 = vmul.f32 0.1, %v782_v45 }
 0x1b4   :  { %v785_v46 = vpop.f32.mrf.mxu1  ;;  %v695_v15 = vadd.f32 %v7080_v26, %v7025_v60  ;;  %v1017_v40 = vmul.f32 0.1, %v691_v4 }
 0x1b5   :  { %v786_v34 = vadd.f32 %v785_v46, %v7133_v62  ;;  %v1183_v51 = vpack.c.bf16 %v1063_v42, %v1059_v39  ;;  %v939_v54 = vmul.f32 0.1, %v784_v30  ;;  %v1066_v18 = vmax.f32 %v782_v45, %v938_v59 }
 0x1b6   :  { %v787_v53 = vpop.f32.mrf.mxu1  ;;  %v1021_v42 = vmul.f32 0.1, %v695_v15  ;;  %v1145_v59 = vmax.f32 %v691_v4, %v1017_v40 }
 0x1b7   :  { %v942_v56 = vmul.f32 0.1, %v786_v34  ;;  %v788_v57 = vadd.f32 %v787_v53, %v7128_v49  ;;  %1871 = vmatprep.mubr.bf16.mxu1 %v1183_v51  ;;  %v1067_v33 = vmax.f32 %v784_v30, %v939_v54 }
 0x1b8   :  { %v791_v61 = vpop.f32.mrf.mxu1  ;;  %1872 = vmatmul.mubr.bf16.gmra.mxu1 %v1182_v27  ;;  %v1149_v53 = vmax.f32 %v695_v15, %v1021_v42  ;;  %v705_v27 = vadd.f32 %v7092_v2, %v7025_v60 }
 0x1b9   :  { %v943_v6 = vmul.f32 0.1, %v788_v57  ;;  %1759 = vmatmul.mubr.bf16.gmra.mxu0 %v7052_v3  ;;  %v1070_v10 = vmax.f32 %v786_v34, %v942_v56  ;;  %v792_v11 = vadd.f32 %v791_v61, %v7133_v62  ;;  %v1137_v3 = vmax.f32 %v681_v52, %v1009_v7  ;;  %v6337_v34 = vld [vmem:[#allocation10 + $0x18] sm:$0xff]  }
 0x1ba   :  { %1768 = vmatprep.mubr.bf16.mxu0 %v1217_v63  ;;  %v793_v1 = vpop.f32.mrf.mxu1  ;;  %5663 = vmatpush3.bf16.msra.mxu0 %v6337_v34  ;;  %v701_v61 = vadd.f32 %v7085_v48, %v7025_v60  ;;  %v1029_v2 = vmul.f32 0.1, %v705_v27 }
 0x1bb   :  { %v1071_v8 = vmax.f32 %v788_v57, %v943_v6  ;;  %v794_v13 = vadd.f32 %v793_v1, %v7128_v49  ;;  %v1186_v35 = vpack.c.bf16 %v1070_v10, %v1066_v18  ;;  %v946_v26 = vmul.f32 0.1, %v792_v11 }
 0x1bc   :  { %v795_v41 = vpop.f32.mrf.mxu1  ;;  %v1221_v43 = vpack.c.bf16 %v1141_v22, %v1137_v3  ;;  %v1025_v15 = vmul.f32 0.1, %v701_v61  ;;  %v715_v3 = vadd.f32 %v7104_v50, %v7025_v60 }
 0x1bd   :  { %v796_v32 = vadd.f32 %v795_v41, %v7133_v62  ;;  %v1187_v29 = vpack.c.bf16 %v1071_v8, %v1067_v33  ;;  %v947_v58 = vmul.f32 0.1, %v794_v13  ;;  %v1074_v54 = vmax.f32 %v792_v11, %v946_v26 }
 0x1be   :  { %v797_v23 = vpop.f32.mrf.mxu1  ;;  %v1037_v40 = vmul.f32 0.1, %v715_v3 }
 0x1bf   :  { %v950_v17 = vmul.f32 0.1, %v796_v32  ;;  %v798_v39 = vadd.f32 %v797_v23, %v7128_v49  ;;  %1881 = vmatprep.mubr.bf16.mxu1 %v1187_v29  ;;  %v1075_v51 = vmax.f32 %v794_v13, %v947_v58  ;;  %v1225_v13 = vpack.c.bf16 %v1149_v53, %v1145_v59 }
 0x1c0   :  { %v801_v30 = vpop.f32.mrf.mxu1  ;;  %1882 = vmatmul.mubr.bf16.gmra.mxu1 %v1186_v35  ;;  %v1157_v29 = vmax.f32 %v705_v27, %v1029_v2 }
 0x1c1   :  { %v951_v9 = vmul.f32 0.1, %v798_v39  ;;  %1769 = vmatmul.mubr.bf16.gmra.mxu0 %v7064_v38  ;;  %v1078_v45 = vmax.f32 %v796_v32, %v950_v17  ;;  %v802_v56 = vadd.f32 %v801_v30, %v7133_v62 }
 0x1c2   :  { %1778 = vmatprep.mubr.bf16.mxu0 %v1221_v43  ;;  %v803_v46 = vpop.f32.mrf.mxu1 }
 0x1c3   :  { %v1079_v37 = vmax.f32 %v798_v39, %v951_v9  ;;  %v804_v52 = vadd.f32 %v803_v46, %v7128_v49  ;;  %v1190_v6 = vpack.c.bf16 %v1078_v45, %v1074_v54  ;;  %v954_v33 = vmul.f32 0.1, %v802_v56 }
 0x1c4   :  { %v805_v57 = vpop.f32.mrf.mxu1  ;;  %v711_v39 = vadd.f32 %v7097_v28, %v7025_v60  ;;  %v6338_v28 = vld [vmem:[#allocation10 + $0x50] sm:$0xff]  }
 0x1c5   :  { %v806_v38 = vadd.f32 %v805_v57, %v7133_v62  ;;  %v1191_v47 = vpack.c.bf16 %v1079_v37, %v1075_v51  ;;  %v955_v7 = vmul.f32 0.1, %v804_v52  ;;  %v1082_v4 = vmax.f32 %v802_v56, %v954_v33  ;;  %5664 = vmatprep.subr.bf16.mxu0 %v6338_v28 }
 0x1c6   :  { %v807_v63 = vpop.f32.mrf.mxu1  ;;  %v1033_v34 = vmul.f32 0.1, %v711_v39  ;;  %v1165_v56 = vmax.f32 %v715_v3, %v1037_v40  ;;  %v725_v57 = vadd.f32 %v7122_v44, %v7025_v60 }
 0x1c7   :  { %v958_v10 = vmul.f32 0.1, %v806_v38  ;;  %v808_v1 = vadd.f32 %v807_v63, %v7128_v49  ;;  %1891 = vmatprep.mubr.bf16.mxu1 %v1191_v47  ;;  %v1083_v48 = vmax.f32 %v804_v52, %v955_v7  ;;  %v6339_v52 = vld [vmem:[#allocation10 + $0x10] sm:$0xff]  }
 0x1c8   :  { %v811_v8 = vpop.f32.mrf.mxu1  ;;  %1892 = vmatmul.mubr.bf16.gmra.mxu1 %v1190_v6  ;;  %5665 = vmatpush3.bf16.msra.mxu0 %v6339_v52  ;;  %v1161_v63 = vmax.f32 %v711_v39, %v1033_v34  ;;  %v721_v6 = vadd.f32 %v7109_v14, %v7025_v60  ;;  %v1045_v44 = vmul.f32 0.1, %v725_v57 }
 0x1c9   :  { %v959_v22 = vmul.f32 0.1, %v808_v1  ;;  %1779 = vmatmul.mubr.bf16.gmra.mxu0 %v7076_v12  ;;  %v1086_v18 = vmax.f32 %v806_v38, %v958_v10  ;;  %v812_v23 = vadd.f32 %v811_v8, %v7133_v62  ;;  %v1153_v12 = vmax.f32 %v701_v61, %v1025_v15 }
 0x1ca   :  { %1788 = vmatprep.mubr.bf16.mxu0 %v1225_v13  ;;  %v813_v11 = vpop.f32.mrf.mxu1 }
 0x1cb   :  { %v1087_v41 = vmax.f32 %v808_v1, %v959_v22  ;;  %v814_v32 = vadd.f32 %v813_v11, %v7128_v49  ;;  %v1194_v42 = vpack.c.bf16 %v1086_v18, %v1082_v4  ;;  %v962_v50 = vmul.f32 0.1, %v812_v23 }
 0x1cc   :  { %v815_v35 = vpop.f32.mrf.mxu1  ;;  %v1229_v46 = vpack.c.bf16 %v1157_v29, %v1153_v12  ;;  %v1233_v22 = vpack.c.bf16 %v1165_v56, %v1161_v63  ;;  %v1041_v18 = vmul.f32 0.1, %v721_v6 }
 0x1cd   :  { %v816_v58 = vadd.f32 %v815_v35, %v7133_v62  ;;  %v1195_v17 = vpack.c.bf16 %v1087_v41, %v1083_v48  ;;  %v963_v30 = vmul.f32 0.1, %v814_v32  ;;  %v1090_v38 = vmax.f32 %v812_v23, %v962_v50 }
 0x1ce   :  { %v817_v26 = vpop.f32.mrf.mxu1 }
 0x1cf   :  { %v966_v43 = vmul.f32 0.1, %v816_v58  ;;  %v818_v9 = vadd.f32 %v817_v26, %v7128_v49  ;;  %1901 = vmatprep.mubr.bf16.mxu1 %v1195_v17  ;;  %v1091_v53 = vmax.f32 %v814_v32, %v963_v30  ;;  %v1173_v32 = vmax.f32 %v725_v57, %v1045_v44 }
 0x1d0   :  { %v821_v45 = vpop.f32.mrf.mxu1  ;;  %1902 = vmatmul.mubr.bf16.gmra.mxu1 %v1194_v42 }
 0x1d1   :  { %v967_v5 = vmul.f32 0.1, %v818_v9  ;;  %1789 = vmatmul.mubr.bf16.gmra.mxu0 %v7088_v19  ;;  %v1094_v51 = vmax.f32 %v816_v58, %v966_v43  ;;  %v822_v47 = vadd.f32 %v821_v45, %v7133_v62  ;;  %v1169_v58 = vmax.f32 %v721_v6, %v1041_v18  ;;  %v6340_v45 = vld [vmem:[#allocation10 + $0x48] sm:$0xff]  }
 0x1d2   :  { %1798 = vmatprep.mubr.bf16.mxu0 %v1229_v46  ;;  %v823_v37 = vpop.f32.mrf.mxu1  ;;  %v6341_v46 = vld [vmem:[#allocation10 + $0x8] sm:$0xff]   ;;  %5666 = vmatprep.subr.bf16.mxu0 %v6340_v45 }
 0x1d3   :  { %v1095_v27 = vmax.f32 %v818_v9, %v967_v5  ;;  %v824_v54 = vadd.f32 %v823_v37, %v7128_v49  ;;  %v1198_v7 = vpack.c.bf16 %v1094_v51, %v1090_v38  ;;  %v970_v8 = vmul.f32 0.1, %v822_v47  ;;  %5667 = vmatpush3.bf16.msra.mxu0 %v6341_v46 }
 0x1d4   :  { %v825_v59 = vpop.f32.mrf.mxu1  ;;  %v1237_v43 = vpack.c.bf16 %v1173_v32, %v1169_v58 }
 0x1d5   :  { %v826_v19 = vadd.f32 %v825_v59, %v7133_v62  ;;  %v1199_v61 = vpack.c.bf16 %v1095_v27, %v1091_v53  ;;  %v971_v1 = vmul.f32 0.1, %v824_v54  ;;  %v1098_v29 = vmax.f32 %v822_v47, %v970_v8 }
 0x1d6   :  { %v827_v10 = vpop.f32.mrf.mxu1 }
 0x1d7   :  { %v974_v2 = vmul.f32 0.1, %v826_v19  ;;  %v828_v33 = vadd.f32 %v827_v10, %v7128_v49  ;;  %1911 = vmatprep.mubr.bf16.mxu1 %v1199_v61  ;;  %v1099_v60 = vmax.f32 %v824_v54, %v971_v1 }
 0x1d8   :  { %v831_v13 = vpop.f32.mrf.mxu1  ;;  %1912 = vmatmul.mubr.bf16.gmra.mxu1 %v1198_v7 }
 0x1d9   :  { %v975_v15 = vmul.f32 0.1, %v828_v33  ;;  %1799 = vmatmul.mubr.bf16.gmra.mxu0 %v7100_v36  ;;  %v1102_v11 = vmax.f32 %v826_v19, %v974_v2  ;;  %v832_v3 = vadd.f32 %v831_v13, %v7133_v62 }
 0x1da   :  { %1808 = vmatprep.mubr.bf16.mxu0 %v1233_v22  ;;  %v833_v48 = vpop.f32.mrf.mxu1 }
 0x1db   :  { %v1103_v14 = vmax.f32 %v828_v33, %v975_v15  ;;  %v834_v41 = vadd.f32 %v833_v48, %v7128_v49  ;;  %v1202_v17 = vpack.c.bf16 %v1102_v11, %v1098_v29  ;;  %v978_v26 = vmul.f32 0.1, %v832_v3 }
 0x1dc   :  { %v835_v4 = vpop.f32.mrf.mxu1 }
 0x1dd   :  { %v836_v23 = vadd.f32 %v835_v4, %v7133_v62  ;;  %v1203_v35 = vpack.c.bf16 %v1103_v14, %v1099_v60  ;;  %v979_v36 = vmul.f32 0.1, %v834_v41  ;;  %v1106_v37 = vmax.f32 %v832_v3, %v978_v26 }
 0x1de   :  { %v837_v12 = vpop.f32.mrf.mxu1 }
 0x1df   :  { %v982_v39 = vmul.f32 0.1, %v836_v23  ;;  %v838_v42 = vadd.f32 %v837_v12, %v7128_v49  ;;  %1921 = vmatprep.mubr.bf16.mxu1 %v1203_v35  ;;  %v1107_v5 = vmax.f32 %v834_v41, %v979_v36  ;;  %v6342_v12 = vld [vmem:[#allocation10 + $0x40] sm:$0xff]  }
 0x1e0   :  { %v841_v30 = vpop.f32.mrf.mxu1  ;;  %1922 = vmatmul.mubr.bf16.gmra.mxu1 %v1202_v17  ;;  %v6343_v36 = vld [vmem:[#allocation10] sm:$0xff]   ;;  %5668 = vmatprep.subr.bf16.mxu0 %v6342_v12 }
 0x1e1   :  { %v983_v9 = vmul.f32 0.1, %v838_v42  ;;  %1809 = vmatmul.mubr.bf16.gmra.mxu0 %v7116_v20  ;;  %v1110_v40 = vmax.f32 %v836_v23, %v982_v39  ;;  %v842_v28 = vadd.f32 %v841_v30, %v7133_v62 }
 0x1e2   :  { %1818 = vmatprep.mubr.bf16.mxu0 %v1237_v43  ;;  %v843_v50 = vpop.f32.mrf.mxu1  ;;  %5669 = vmatpush3.bf16.msra.mxu0 %v6343_v36 }
 0x1e3   :  { %v1111_v34 = vmax.f32 %v838_v42, %v983_v9  ;;  %v844_v51 = vadd.f32 %v843_v50, %v7128_v49  ;;  %v1206_v54 = vpack.c.bf16 %v1110_v40, %v1106_v37  ;;  %v986_v47 = vmul.f32 0.1, %v842_v28 }
 0x1e4   :  { %v845_v52 = vpop.f32.mrf.mxu1 }
 0x1e5   :  { %v846_v53 = vadd.f32 %v845_v52, %v7133_v62  ;;  %v1207_v27 = vpack.c.bf16 %v1111_v34, %v1107_v5  ;;  %v987_v56 = vmul.f32 0.1, %v844_v51  ;;  %v1114_v1 = vmax.f32 %v842_v28, %v986_v47 }
 0x1e6   :  { %v847_v20 = vpop.f32.mrf.mxu1 }
 0x1e7   :  { %v990_v57 = vmul.f32 0.1, %v846_v53  ;;  %v848_v38 = vadd.f32 %v847_v20, %v7128_v49  ;;  %1931 = vmatprep.mubr.bf16.mxu1 %v1207_v27  ;;  %v1115_v6 = vmax.f32 %v844_v51, %v987_v56 }
 0x1e8   :  { %v851_v59 = vpop.f32.mrf.mxu1  ;;  %1932 = vmatmul.mubr.bf16.gmra.mxu1 %v1206_v54 }
 0x1e9   :  { %v991_v19 = vmul.f32 0.1, %v848_v38  ;;  %1819 = vmatmul.mubr.bf16.gmra.mxu0 %v7139_v24  ;;  %v1118_v61 = vmax.f32 %v846_v53, %v990_v57  ;;  %v852_v2 = vadd.f32 %v851_v59, %v7133_v62 }
 0x1ea   :  { %v853_v63 = vpop.f32.mrf.mxu1 }
 0x1eb   :  { %v1119_v7 = vmax.f32 %v848_v38, %v991_v19  ;;  %v854_v10 = vadd.f32 %v853_v63, %v7128_v49  ;;  %v1210_v13 = vpack.c.bf16 %v1118_v61, %v1114_v1  ;;  %v994_v24 = vmul.f32 0.1, %v852_v2 }
 0x1ec   :  { %v855_v33 = vpop.f32.mrf.mxu1 }
 0x1ed   :  { %v856_v44 = vadd.f32 %v855_v33, %v7133_v62  ;;  %v1211_v8 = vpack.c.bf16 %v1119_v7, %v1115_v6  ;;  %v995_v15 = vmul.f32 0.1, %v854_v10  ;;  %v1122_v4 = vmax.f32 %v852_v2, %v994_v24 }
 0x1ee   :  { %v857_v22 = vpop.f32.mrf.mxu1 }
 0x1ef   :  { %v998_v18 = vmul.f32 0.1, %v856_v44  ;;  %v858_v11 = vadd.f32 %v857_v22, %v7128_v49  ;;  %1941 = vmatprep.mubr.bf16.mxu1 %v1211_v8  ;;  %v1123_v32 = vmax.f32 %v854_v10, %v995_v15 }
 0x1f0   :  { %v861_v48 = vpop.f32.mrf.mxu1  ;;  %1942 = vmatmul.mubr.bf16.gmra.mxu1 %v1210_v13 }
 0x1f1   :  { %v999_v60 = vmul.f32 0.1, %v858_v11  ;;  %v1126_v14 = vmax.f32 %v856_v44, %v998_v18  ;;  %v862_v23 = vadd.f32 %v861_v48, %v7133_v62 }
 0x1f2   :  { %v863_v41 = vpop.f32.mrf.mxu1 }
 0x1f3   :  { %v1127_v29 = vmax.f32 %v858_v11, %v999_v60  ;;  %v864_v3 = vadd.f32 %v863_v41, %v7128_v49  ;;  %v1214_v39 = vpack.c.bf16 %v1126_v14, %v1122_v4  ;;  %v1002_v9 = vmul.f32 0.1, %v862_v23 }
 0x1f4   :  { %v865_v35 = vpop.f32.mrf.mxu1 }
 0x1f5   :  { %v866_v58 = vadd.f32 %v865_v35, %v7133_v62  ;;  %v1215_v17 = vpack.c.bf16 %v1127_v29, %v1123_v32  ;;  %v1003_v26 = vmul.f32 0.1, %v864_v3  ;;  %v1130_v37 = vmax.f32 %v862_v23, %v1002_v9 }
 0x1f6   :  { %v867_v42 = vpop.f32.mrf.mxu1 }
 0x1f7   :  { %v1006_v30 = vmul.f32 0.1, %v866_v58  ;;  %v868_v43 = vadd.f32 %v867_v42, %v7128_v49  ;;  %1951 = vmatprep.mubr.bf16.mxu1 %v1215_v17  ;;  %v1131_v5 = vmax.f32 %v864_v3, %v1003_v26 }
 0x1f8   :  { %v871_v40 = vpop.f32.mrf.mxu1  ;;  %1952 = vmatmul.mubr.bf16.gmra.mxu1 %v1214_v39 }
 0x1f9   :  { %v1007_v50 = vmul.f32 0.1, %v868_v43  ;;  %v1134_v45 = vmax.f32 %v866_v58, %v1006_v30  ;;  %v872_v28 = vadd.f32 %v871_v40, %v7133_v62 }
 0x1fa   :  { %v873_v46 = vpop.f32.mrf.mxu1 }
 0x1fb   :  { %v1135_v34 = vmax.f32 %v868_v43, %v1007_v50  ;;  %v874_v51 = vadd.f32 %v873_v46, %v7128_v49  ;;  %v1218_v54 = vpack.c.bf16 %v1134_v45, %v1130_v37  ;;  %v1010_v47 = vmul.f32 0.1, %v872_v28 }
 0x1fc   :  { %v875_v52 = vpop.f32.mrf.mxu1 }
 0x1fd   :  { %v876_v53 = vadd.f32 %v875_v52, %v7133_v62  ;;  %v1219_v27 = vpack.c.bf16 %v1135_v34, %v1131_v5  ;;  %v1011_v56 = vmul.f32 0.1, %v874_v51  ;;  %v1138_v1 = vmax.f32 %v872_v28, %v1010_v47 }
 0x1fe   :  { %v877_v20 = vpop.f32.mrf.mxu1 }
 0x1ff   :  { %v1014_v57 = vmul.f32 0.1, %v876_v53  ;;  %v878_v38 = vadd.f32 %v877_v20, %v7128_v49  ;;  %1961 = vmatprep.mubr.bf16.mxu1 %v1219_v27  ;;  %v1139_v6 = vmax.f32 %v874_v51, %v1011_v56 }
 0x200   :  { %v881_v59 = vpop.f32.mrf.mxu1  ;;  %1962 = vmatmul.mubr.bf16.gmra.mxu1 %v1218_v54 }
 0x201   :  { %v1015_v19 = vmul.f32 0.1, %v878_v38  ;;  %v1142_v61 = vmax.f32 %v876_v53, %v1014_v57  ;;  %v882_v2 = vadd.f32 %v881_v59, %v7133_v62 }
 0x202   :  { %v883_v63 = vpop.f32.mrf.mxu1 }
 0x203   :  { %v1143_v7 = vmax.f32 %v878_v38, %v1015_v19  ;;  %v884_v10 = vadd.f32 %v883_v63, %v7128_v49  ;;  %v1222_v13 = vpack.c.bf16 %v1142_v61, %v1138_v1  ;;  %v1018_v24 = vmul.f32 0.1, %v882_v2 }
 0x204   :  { %v885_v33 = vpop.f32.mrf.mxu1 }
 0x205   :  { %v886_v44 = vadd.f32 %v885_v33, %v7133_v62  ;;  %v1223_v8 = vpack.c.bf16 %v1143_v7, %v1139_v6  ;;  %v1019_v15 = vmul.f32 0.1, %v884_v10  ;;  %v1146_v4 = vmax.f32 %v882_v2, %v1018_v24 }
 0x206   :  { %v887_v22 = vpop.f32.mrf.mxu1 }
 0x207   :  { %v1022_v18 = vmul.f32 0.1, %v886_v44  ;;  %v888_v11 = vadd.f32 %v887_v22, %v7128_v49  ;;  %1971 = vmatprep.mubr.bf16.mxu1 %v1223_v8  ;;  %v1147_v32 = vmax.f32 %v884_v10, %v1019_v15 }
 0x208   :  { %v891_v48 = vpop.f32.mrf.mxu1  ;;  %1972 = vmatmul.mubr.bf16.gmra.mxu1 %v1222_v13 }
 0x209   :  { %v1023_v60 = vmul.f32 0.1, %v888_v11  ;;  %v1150_v14 = vmax.f32 %v886_v44, %v1022_v18  ;;  %v892_v23 = vadd.f32 %v891_v48, %v7133_v62 }
 0x20a   :  { %v893_v41 = vpop.f32.mrf.mxu1 }
 0x20b   :  { %v1151_v29 = vmax.f32 %v888_v11, %v1023_v60  ;;  %v894_v3 = vadd.f32 %v893_v41, %v7128_v49  ;;  %v1226_v12 = vpack.c.bf16 %v1150_v14, %v1146_v4  ;;  %v1026_v30 = vmul.f32 0.1, %v892_v23 }
 0x20c   :  { %v895_v35 = vpop.f32.mrf.mxu1 }
 0x20d   :  { %v896_v58 = vadd.f32 %v895_v35, %v7133_v62  ;;  %v1227_v17 = vpack.c.bf16 %v1151_v29, %v1147_v32  ;;  %v1027_v39 = vmul.f32 0.1, %v894_v3  ;;  %v1154_v34 = vmax.f32 %v892_v23, %v1026_v30 }
 0x20e   :  { %v897_v36 = vpop.f32.mrf.mxu1 }
 0x20f   :  { %v1030_v42 = vmul.f32 0.1, %v896_v58  ;;  %v898_v26 = vadd.f32 %v897_v36, %v7128_v49  ;;  %1981 = vmatprep.mubr.bf16.mxu1 %v1227_v17  ;;  %v1155_v45 = vmax.f32 %v894_v3, %v1027_v39 }
 0x210   :  { %v901_v43 = vpop.f32.mrf.mxu1  ;;  %1982 = vmatmul.mubr.bf16.gmra.mxu1 %v1226_v12 }
 0x211   :  { %v1031_v9 = vmul.f32 0.1, %v898_v26  ;;  %v1158_v40 = vmax.f32 %v896_v58, %v1030_v42  ;;  %v902_v51 = vadd.f32 %v901_v43, %v7133_v62 }
 0x212   :  { %v903_v50 = vpop.f32.mrf.mxu1 }
 0x213   :  { %v1159_v46 = vmax.f32 %v898_v26, %v1031_v9  ;;  %v904_v5 = vadd.f32 %v903_v50, %v7128_v49  ;;  %v1230_v53 = vpack.c.bf16 %v1158_v40, %v1154_v34  ;;  %v1034_v57 = vmul.f32 0.1, %v902_v51 }
 0x214   :  { %v905_v37 = vpop.f32.mrf.mxu1 }
 0x215   :  { %v906_v28 = vadd.f32 %v905_v37, %v7133_v62  ;;  %v1231_v52 = vpack.c.bf16 %v1159_v46, %v1155_v45  ;;  %v1035_v54 = vmul.f32 0.1, %v904_v5  ;;  %v1162_v7 = vmax.f32 %v902_v51, %v1034_v57  ;;  %v6344_v51 = vld [vmem:[#allocation11 + $0x38] sm:$0xff]  }
 0x216   :  { %v907_v27 = vpop.f32.mrf.mxu1  ;;  %6038 = vmatprep.subr.bf16.mxu1 %v6344_v51 }
 0x217   :  { %v1038_v20 = vmul.f32 0.1, %v906_v28  ;;  %v908_v56 = vadd.f32 %v907_v27, %v7128_v49  ;;  %1991 = vmatprep.mubr.bf16.mxu1 %v1231_v52  ;;  %v1163_v61 = vmax.f32 %v904_v5, %v1035_v54  ;;  %6039 = vmatpush3.bf16.msra.mxu1 %v6344_v51 }
 0x218   :  { %v911_v38 = vpop.f32.mrf.mxu1  ;;  %1992 = vmatmul.mubr.bf16.gmra.mxu1 %v1230_v53 }
 0x219   :  { %v1039_v47 = vmul.f32 0.1, %v908_v56  ;;  %v1166_v59 = vmax.f32 %v906_v28, %v1038_v20  ;;  %v912_v10 = vadd.f32 %v911_v38, %v7133_v62  ;;  %v1304_v20 = vld [vmem:[%s7855_s4] sm:$0x3] }
 0x21a   :  { %v913_v19 = vpop.f32.mrf.mxu1  ;;  %v7289_v57 = vrot.slane %v1304_v20, %v7019_v55 }
 0x21b   :  { %v1167_v63 = vmax.f32 %v908_v56, %v1039_v47  ;;  %v914_v6 = vadd.f32 %v913_v19, %v7128_v49  ;;  %v1234_v44 = vpack.c.bf16 %v1166_v59, %v1162_v7  ;;  %v1042_v18 = vmul.f32 0.1, %v912_v10  ;;  %v6345_v47 = vld [vmem:[#allocation11 + $0x30] sm:$0xff]  }
 0x21c   :  { %v915_v1 = vpop.f32.mrf.mxu1  ;;  %v7294_v59 = vrot.slane %v1304_v20, %v7010_v31  ;;  %6040 = vmatprep.subr.bf16.mxu1 %v6345_v47 }
 0x21d   :  { %v916_v2 = vadd.f32 %v915_v1, %v7133_v62  ;;  %v1235_v33 = vpack.c.bf16 %v1167_v63, %v1163_v61  ;;  %v1043_v13 = vmul.f32 0.1, %v914_v6  ;;  %v1170_v14 = vmax.f32 %v912_v10, %v1042_v18  ;;  %6041 = vmatpush3.bf16.msra.mxu1 %v6345_v47 }
 0x21e   :  { %v917_v8 = vpop.f32.mrf.mxu1 }
 0x21f   :  { %v1046_v22 = vmul.f32 0.1, %v916_v2  ;;  %v918_v15 = vadd.f32 %v917_v8, %v7128_v49  ;;  %2001 = vmatprep.mubr.bf16.mxu1 %v1235_v33  ;;  %v1171_v48 = vmax.f32 %v914_v6, %v1043_v13 }
 0x220   :  { %2002 = vmatmul.mubr.bf16.gmra.mxu1 %v1234_v44 }
 0x221   :  { %v1047_v11 = vmul.f32 0.1, %v918_v15  ;;  %v1174_v24 = vmax.f32 %v916_v2, %v1046_v22 }
 0x223   :  { %v1175_v60 = vmax.f32 %v918_v15, %v1047_v11  ;;  %v1238_v32 = vpack.c.bf16 %v1174_v24, %v1170_v14 }
 0x225   :  { %v1239_v41 = vpack.c.bf16 %v1175_v60, %v1171_v48 }
 0x227   :  { %2011 = vmatprep.mubr.bf16.mxu1 %v1239_v41  ;;  %v6346_v41 = vld [vmem:[#allocation11 + $0x28] sm:$0xff]  }
 0x228   :  { %2012 = vmatmul.mubr.bf16.gmra.mxu1 %v1238_v32  ;;  %v6347_v32 = vld [vmem:[#allocation11 + $0x20] sm:$0xff]   ;;  %6042 = vmatprep.subr.bf16.mxu1 %v6346_v41 }
 0x229   :  { %6043 = vmatpush3.bf16.msra.mxu1 %v6346_v41 }
 0x22a   :  { %6044 = vmatprep.subr.bf16.mxu1 %v6347_v32 }
 0x22d   :  { %6045 = vmatpush3.bf16.msra.mxu1 %v6347_v32 }
 0x230   :  { %v1670_v62 = vpop.f32.mrf.mxu0 }
 0x231   :  { %v1671_v7 = vadd.f32 %v1670_v62, %v7294_v59 }
 0x232   :  { %v1672_v29 = vpop.f32.mrf.mxu0 }
 0x233   :  { %v1673_v63 = vadd.f32 %v1672_v29, %v7289_v57 }
 0x234   :  { %v1674_v3 = vpop.f32.mrf.mxu0 }
 0x235   :  { %v1675_v1 = vadd.f32 %v1674_v3, %v7294_v59 }
 0x236   :  { %v1676_v4 = vpop.f32.mrf.mxu0 }
 0x237   :  { %v1677_v13 = vadd.f32 %v1676_v4, %v7289_v57 }
 0x238   :  { %v1680_v23 = vpop.f32.mrf.mxu0 }
 0x239   :  { %v1681_v3 = vadd.f32 %v1680_v23, %v7294_v59 }
 0x23a   :  { %v1682_v35 = vpop.f32.mrf.mxu0 }
 0x23b   :  { %v1683_v62 = vadd.f32 %v1682_v35, %v7289_v57  ;;  %v6348_v35 = vld [vmem:[#allocation11 + $0x18] sm:$0xff]  }
 0x23c   :  { %v7237_v58 = vpop.f32.mrf.mxu0  ;;  %6046 = vmatprep.subr.bf16.mxu1 %v6348_v35 }
 0x23d   :  { %v1685_v47 = vadd.f32 %v7237_v58, %v7294_v59  ;;  %6047 = vmatpush3.bf16.msra.mxu1 %v6348_v35 }
 0x23e   :  { %v7239_v49 = vpop.f32.mrf.mxu0 }
 0x23f   :  { %v1687_v23 = vadd.f32 %v7239_v49, %v7289_v57 }
 0x241   :  { %v7241_v17 = vpop.f32.mrf.mxu0 }
 0x243   :  { %v7243_v12 = vpop.f32.mrf.mxu0 }
 0x245   :  { %v7245_v36 = vpop.f32.mrf.mxu0 }
 0x247   :  { %v7247_v39 = vpop.f32.mrf.mxu0 }
 0x249   :  { %v7249_v42 = vpop.f32.mrf.mxu0 }
 0x24b   :  { %v7251_v26 = vpop.f32.mrf.mxu0 }
 0x24c   :  { %v1703_v35 = vadd.f32 %v7251_v26, %v7289_v57 }
 0x24d   :  { %v7253_v30 = vpop.f32.mrf.mxu0 }
 0x24f   :  { %v7255_v43 = vpop.f32.mrf.mxu0 }
 0x250   :  { %v1707_v26 = vadd.f32 %v7255_v43, %v7289_v57 }
 0x251   :  { %v7257_v9 = vpop.f32.mrf.mxu0 }
 0x252   :  { %v1711_v43 = vadd.f32 %v7257_v9, %v7294_v59 }
 0x253   :  { %v7259_v40 = vpop.f32.mrf.mxu0 }
 0x255   :  { %v7261_v50 = vpop.f32.mrf.mxu0 }
 0x257   :  { %v7263_v45 = vpop.f32.mrf.mxu0 }
 0x259   :  { %v7265_v46 = vpop.f32.mrf.mxu0 }
 0x25b   :  { %v7267_v5 = vpop.f32.mrf.mxu0 }
 0x25d   :  { %v7269_v34 = vpop.f32.mrf.mxu0 }
 0x25f   :  { %v7271_v37 = vpop.f32.mrf.mxu0 }
 0x261   :  { %v7273_v28 = vpop.f32.mrf.mxu0 }
 0x263   :  { %v7275_v52 = vpop.f32.mrf.mxu0 }
 0x265   :  { %v7277_v53 = vpop.f32.mrf.mxu0 }
 0x267   :  { %v7279_v27 = vpop.f32.mrf.mxu0 }
 0x269   :  { %v7281_v54 = vpop.f32.mrf.mxu0 }
 0x26b   :  { %v7286_v56 = vpop.f32.mrf.mxu0 }
 0x26d   :  { %v7291_v38 = vpop.f32.mrf.mxu0 }
 0x26f   :  { %v7296_v19 = vpop.f32.mrf.mxu0 }
 0x270   :  { %v1863_v61 = vpop.f32.mrf.mxu1 }
 0x271   :  { %v7299_v6 = vpop.f32.mrf.mxu0  ;;  %v1864_v44 = vadd.f32 %v1863_v61, %v1671_v7 }
 0x272   :  { %v1865_v10 = vpop.f32.mrf.mxu1 }
 0x273   :  { %v7303_v2 = vpop.f32.mrf.mxu0  ;;  %v1866_v33 = vadd.f32 %v1865_v10, %v1673_v63  ;;  %v2022_v60 = vmul.f32 0.1, %v1864_v44 }
 0x274   :  { %v1867_v8 = vpop.f32.mrf.mxu1 }
 0x275   :  { %v1868_v22 = vadd.f32 %v1867_v8, %v1675_v1  ;;  %v7306_v15 = vpop.f32.mrf.mxu0  ;;  %v2023_v11 = vmul.f32 0.1, %v1866_v33  ;;  %v2086_v10 = vmax.f32 %v1864_v44, %v2022_v60  ;;  %v1693_v60 = vadd.f32 %v7243_v12, %v7289_v57  ;;  %v6350_v12 = vld [vmem:[#allocation11 + $0x8] sm:$0xff]  }
 0x276   :  { %v1869_v18 = vpop.f32.mrf.mxu1 }
 0x277   :  { %v2024_v24 = vmul.f32 0.1, %v1868_v22  ;;  %v1870_v48 = vadd.f32 %v1869_v18, %v1677_v13  ;;  %v7310_v20 = vpop.f32.mrf.mxu0  ;;  %v2087_v61 = vmax.f32 %v1866_v33, %v2023_v11 }
 0x278   :  { %v1873_v14 = vpop.f32.mrf.mxu1 }
 0x279   :  { %v2025_v29 = vmul.f32 0.1, %v1870_v48  ;;  %v2088_v51 = vmax.f32 %v1868_v22, %v2024_v24  ;;  %v1874_v1 = vadd.f32 %v1873_v14, %v1681_v3  ;;  %v7316_v24 = vpop.f32.mrf.mxu0  ;;  %v1691_v14 = vadd.f32 %v7241_v17, %v7294_v59 }
 0x27a   :  { %v1875_v4 = vpop.f32.mrf.mxu1 }
 0x27b   :  { %v2089_v63 = vmax.f32 %v1870_v48, %v2025_v29  ;;  %v1876_v7 = vadd.f32 %v1875_v4, %v1683_v62  ;;  %v2150_v18 = vpack.c.bf16 %v2088_v51, %v2086_v10  ;;  %v2026_v11 = vmul.f32 0.1, %v1874_v1  ;;  %v6349_v48 = vld [vmem:[#allocation11 + $0x10] sm:$0xff]   ;;  %v7322_v41 = vpop.f32.mrf.mxu0 }
 0x27c   :  { %v1877_v8 = vpop.f32.mrf.mxu1  ;;  %6048 = vmatprep.subr.bf16.mxu1 %v6349_v48 }
 0x27d   :  { %v1878_v13 = vadd.f32 %v1877_v8, %v1685_v47  ;;  %v2151_v22 = vpack.c.bf16 %v2089_v63, %v2087_v61  ;;  %v2027_v16 = vmul.f32 0.1, %v1876_v7  ;;  %v2090_v4 = vmax.f32 %v1874_v1, %v2026_v11  ;;  %v7328_v8 = vpop.f32.mrf.mxu0  ;;  %6049 = vmatpush3.bf16.msra.mxu1 %v6349_v48 }
 0x27e   :  { %v1879_v21 = vpop.f32.mrf.mxu1  ;;  %v1697_v63 = vadd.f32 %v7247_v39, %v7289_v57  ;;  %6050 = vmatprep.subr.bf16.mxu1 %v6350_v12  ;;  %v1701_v39 = vadd.f32 %v7249_v42, %v7294_v59 }
 0x27f   :  { %v2028_v58 = vmul.f32 0.1, %v1878_v13  ;;  %v1880_v33 = vadd.f32 %v1879_v21, %v1687_v23  ;;  %2349 = vmatprep.mubr.bf16.mxu0 %v2151_v22  ;;  %v1695_v21 = vadd.f32 %v7245_v36, %v7294_v59  ;;  %v2091_v32 = vmax.f32 %v1876_v7, %v2027_v16 }
 0x280   :  { %v1883_v44 = vpop.f32.mrf.mxu1  ;;  %2350 = vmatmul.mubr.bf16.vlgmr.msra.gmra.mxu0 %v2150_v18 }
 0x281   :  { %v2029_v49 = vmul.f32 0.1, %v1880_v33  ;;  %v2092_v62 = vmax.f32 %v1878_v13, %v2028_v58  ;;  %v1884_v47 = vadd.f32 %v1883_v44, %v1691_v14  ;;  %v7334_v58 = vpop.f32.mrf.mxu0  ;;  %v1705_v44 = vadd.f32 %v7253_v30, %v7294_v59  ;;  %6051 = vmatpush3.bf16.msra.mxu1 %v6350_v12 }
 0x282   :  { %v1885_v29 = vpop.f32.mrf.mxu1 }
 0x283   :  { %v2093_v3 = vmax.f32 %v1880_v33, %v2029_v49  ;;  %v1886_v51 = vadd.f32 %v1885_v29, %v1693_v60  ;;  %v2152_v13 = vpack.c.bf16 %v2092_v62, %v2090_v4  ;;  %v2030_v7 = vmul.f32 0.1, %v1884_v47  ;;  %v7340_v42 = vpop.f32.mrf.mxu0 }
 0x284   :  { %v1887_v61 = vpop.f32.mrf.mxu1 }
 0x285   :  { %v1888_v17 = vadd.f32 %v1887_v61, %v1695_v21  ;;  %v2153_v10 = vpack.c.bf16 %v2093_v3, %v2091_v32  ;;  %v2031_v22 = vmul.f32 0.1, %v1886_v51  ;;  %v2094_v14 = vmax.f32 %v1884_v47, %v2030_v7 }
 0x286   :  { %v1889_v23 = vpop.f32.mrf.mxu1  ;;  %v1713_v47 = vadd.f32 %v7259_v40, %v7289_v57  ;;  %v1717_v40 = vadd.f32 %v7263_v45, %v7289_v57  ;;  %v1721_v45 = vadd.f32 %v7265_v46, %v7294_v59 }
 0x287   :  { %v2032_v36 = vmul.f32 0.1, %v1888_v17  ;;  %v1890_v16 = vadd.f32 %v1889_v23, %v1697_v63  ;;  %2357 = vmatprep.mubr.bf16.mxu0 %v2153_v10  ;;  %v2095_v60 = vmax.f32 %v1886_v51, %v2031_v22  ;;  %v7346_v10 = vpop.f32.mrf.mxu0  ;;  %v1715_v22 = vadd.f32 %v7261_v50, %v7294_v59 }
 0x288   :  { %v1893_v1 = vpop.f32.mrf.mxu1  ;;  %2358 = vmatmul.mubr.bf16.gmra.mxu0 %v2152_v13 }
 0x289   :  { %v2033_v18 = vmul.f32 0.1, %v1890_v16  ;;  %v2096_v33 = vmax.f32 %v1888_v17, %v2032_v36  ;;  %v1894_v62 = vadd.f32 %v1893_v1, %v1701_v39 }
 0x28a   :  { %v1895_v11 = vpop.f32.mrf.mxu1 }
 0x28b   :  { %v2097_v48 = vmax.f32 %v1890_v16, %v2033_v18  ;;  %v1896_v49 = vadd.f32 %v1895_v11, %v1703_v35  ;;  %v2154_v4 = vpack.c.bf16 %v2096_v33, %v2094_v14  ;;  %v2034_v30 = vmul.f32 0.1, %v1894_v62  ;;  %v7352_v11 = vpop.f32.mrf.mxu0 }
 0x28c   :  { %v1897_v29 = vpop.f32.mrf.mxu1 }
 0x28d   :  { %v1898_v21 = vadd.f32 %v1897_v29, %v1705_v44  ;;  %v2155_v32 = vpack.c.bf16 %v2097_v48, %v2095_v60  ;;  %v2035_v61 = vmul.f32 0.1, %v1896_v49  ;;  %v2098_v1 = vmax.f32 %v1894_v62, %v2034_v30 }
 0x28e   :  { %v1899_v3 = vpop.f32.mrf.mxu1  ;;  %v1723_v62 = vadd.f32 %v7267_v5, %v7289_v57  ;;  %v1727_v5 = vadd.f32 %v7271_v37, %v7289_v57  ;;  %v1731_v37 = vadd.f32 %v7273_v28, %v7294_v59 }
 0x28f   :  { %v2036_v63 = vmul.f32 0.1, %v1898_v21  ;;  %v1900_v17 = vadd.f32 %v1899_v3, %v1707_v26  ;;  %2365 = vmatprep.mubr.bf16.mxu0 %v2155_v32  ;;  %v2099_v36 = vmax.f32 %v1896_v49, %v2035_v61  ;;  %v7358_v26 = vpop.f32.mrf.mxu0  ;;  %v1725_v3 = vadd.f32 %v7269_v34, %v7294_v59 }
 0x290   :  { %v1903_v51 = vpop.f32.mrf.mxu1  ;;  %2366 = vmatmul.mubr.bf16.gmra.mxu0 %v2154_v4 }
 0x291   :  { %v2037_v12 = vmul.f32 0.1, %v1900_v17  ;;  %v2100_v23 = vmax.f32 %v1898_v21, %v2036_v63  ;;  %v1904_v35 = vadd.f32 %v1903_v51, %v1711_v43  ;;  %v7364_v43 = vpop.f32.mrf.mxu0 }
 0x292   :  { %v1905_v13 = vpop.f32.mrf.mxu1 }
 0x293   :  { %v2101_v16 = vmax.f32 %v1900_v17, %v2037_v12  ;;  %v1906_v7 = vadd.f32 %v1905_v13, %v1713_v47  ;;  %v2156_v44 = vpack.c.bf16 %v2100_v23, %v2098_v1  ;;  %v2038_v50 = vmul.f32 0.1, %v1904_v35 }
 0x294   :  { %v1907_v18 = vpop.f32.mrf.mxu1 }
 0x295   :  { %v1908_v39 = vadd.f32 %v1907_v18, %v1715_v22  ;;  %v2157_v33 = vpack.c.bf16 %v2101_v16, %v2099_v36  ;;  %v2039_v60 = vmul.f32 0.1, %v1906_v7  ;;  %v2102_v17 = vmax.f32 %v1904_v35, %v2038_v50  ;;  %v7370_v35 = vpop.f32.mrf.mxu0 }
 0x296   :  { %v1909_v9 = vpop.f32.mrf.mxu1 }
 0x297   :  { %v2040_v48 = vmul.f32 0.1, %v1908_v39  ;;  %v1910_v14 = vadd.f32 %v1909_v9, %v1717_v40  ;;  %2373 = vmatprep.mubr.bf16.mxu0 %v2157_v33  ;;  %v2103_v4 = vmax.f32 %v1906_v7, %v2039_v60  ;;  %v1733_v7 = vadd.f32 %v7275_v52, %v7289_v57 }
 0x298   :  { %v1913_v49 = vpop.f32.mrf.mxu1  ;;  %2374 = vmatmul.mubr.bf16.gmra.mxu0 %v2156_v44  ;;  %v1737_v52 = vadd.f32 %v7279_v27, %v7289_v57  ;;  %v1741_v27 = vadd.f32 %v7281_v54, %v7294_v59 }
 0x299   :  { %v2041_v29 = vmul.f32 0.1, %v1910_v14  ;;  %v2104_v21 = vmax.f32 %v1908_v39, %v2040_v48  ;;  %v1914_v30 = vadd.f32 %v1913_v49, %v1721_v45  ;;  %v1735_v39 = vadd.f32 %v7277_v53, %v7294_v59 }
 0x29a   :  { %v1915_v32 = vpop.f32.mrf.mxu1 }
 0x29b   :  { %v2105_v61 = vmax.f32 %v1910_v14, %v2041_v29  ;;  %v1916_v63 = vadd.f32 %v1915_v32, %v1723_v62  ;;  %v2158_v46 = vpack.c.bf16 %v2104_v21, %v2102_v17  ;;  %v2042_v34 = vmul.f32 0.1, %v1914_v30  ;;  %v7376_v62 = vpop.f32.mrf.mxu0 }
 0x29c   :  { %v1917_v51 = vpop.f32.mrf.mxu1 }
 0x29d   :  { %v1918_v47 = vadd.f32 %v1917_v51, %v1725_v3  ;;  %v2159_v12 = vpack.c.bf16 %v2105_v61, %v2103_v4  ;;  %v2043_v13 = vmul.f32 0.1, %v1916_v63  ;;  %v2106_v60 = vmax.f32 %v1914_v30, %v2042_v34 }
 0x29e   :  { %v1919_v23 = vpop.f32.mrf.mxu1  ;;  %v1743_v4 = vadd.f32 %v7286_v56, %v7289_v57  ;;  %v1745_v51 = vadd.f32 %v7291_v38, %v7294_v59  ;;  %v1747_v56 = vadd.f32 %v7296_v19, %v7289_v57  ;;  %v1751_v19 = vadd.f32 %v7299_v6, %v7294_v59 }
 0x29f   :  { %v2044_v22 = vmul.f32 0.1, %v1918_v47  ;;  %v1920_v36 = vadd.f32 %v1919_v23, %v1727_v5  ;;  %2381 = vmatprep.mubr.bf16.mxu0 %v2159_v12  ;;  %v2107_v33 = vmax.f32 %v1916_v63, %v2043_v13  ;;  %v7382_v63 = vpop.f32.mrf.mxu0 }
 0x2a0   :  { %v1923_v16 = vpop.f32.mrf.mxu1  ;;  %2382 = vmatmul.mubr.bf16.gmra.mxu0 %v2158_v46 }
 0x2a1   :  { %v2045_v1 = vmul.f32 0.1, %v1920_v36  ;;  %v2108_v18 = vmax.f32 %v1918_v47, %v2044_v22  ;;  %v1924_v48 = vadd.f32 %v1923_v16, %v1731_v37  ;;  %v7388_v34 = vpop.f32.mrf.mxu0 }
 0x2a2   :  { %v1925_v40 = vpop.f32.mrf.mxu1 }
 0x2a3   :  { %v2109_v9 = vmax.f32 %v1920_v36, %v2045_v1  ;;  %v1926_v44 = vadd.f32 %v1925_v40, %v1733_v7  ;;  %v2160_v28 = vpack.c.bf16 %v2108_v18, %v2106_v60  ;;  %v2046_v53 = vmul.f32 0.1, %v1924_v48 }
 0x2a4   :  { %v1927_v14 = vpop.f32.mrf.mxu1  ;;  %v1753_v40 = vadd.f32 %v7303_v2, %v7289_v57  ;;  %v1755_v60 = vadd.f32 %v7306_v15, %v7294_v59  ;;  %v1757_v2 = vadd.f32 %v7310_v20, %v7289_v57  ;;  %v1761_v20 = vadd.f32 %v7316_v24, %v7294_v59 }
 0x2a5   :  { %v1928_v50 = vadd.f32 %v1927_v14, %v1735_v39  ;;  %v2161_v49 = vpack.c.bf16 %v2109_v9, %v2107_v33  ;;  %v2047_v45 = vmul.f32 0.1, %v1926_v44  ;;  %v2110_v46 = vmax.f32 %v1924_v48, %v2046_v53  ;;  %v7394_v33 = vpop.f32.mrf.mxu0 }
 0x2a6   :  { %v1929_v29 = vpop.f32.mrf.mxu1 }
 0x2a7   :  { %v2048_v21 = vmul.f32 0.1, %v1928_v50  ;;  %v1930_v32 = vadd.f32 %v1929_v29, %v1737_v52  ;;  %2389 = vmatprep.mubr.bf16.mxu0 %v2161_v49  ;;  %v2111_v5 = vmax.f32 %v1926_v44, %v2047_v45 }
 0x2a8   :  { %v1933_v3 = vpop.f32.mrf.mxu1  ;;  %2390 = vmatmul.mubr.bf16.gmra.mxu0 %v2160_v28 }
 0x2a9   :  { %v2049_v61 = vmul.f32 0.1, %v1930_v32  ;;  %v2112_v17 = vmax.f32 %v1928_v50, %v2048_v21  ;;  %v1934_v23 = vadd.f32 %v1933_v3, %v1741_v27  ;;  %v7400_v21 = vpop.f32.mrf.mxu0  ;;  %v1763_v27 = vadd.f32 %v7322_v41, %v7289_v57 }
 0x2aa   :  { %v1935_v30 = vpop.f32.mrf.mxu1  ;;  %v1767_v41 = vadd.f32 %v7334_v58, %v7289_v57  ;;  %v1771_v58 = vadd.f32 %v7340_v42, %v7294_v59 }
 0x2ab   :  { %v2113_v47 = vmax.f32 %v1930_v32, %v2049_v61  ;;  %v1936_v12 = vadd.f32 %v1935_v30, %v1743_v4  ;;  %v2162_v54 = vpack.c.bf16 %v2112_v17, %v2110_v46  ;;  %v2050_v38 = vmul.f32 0.1, %v1934_v23  ;;  %v7406_v30 = vpop.f32.mrf.mxu0 }
 0x2ac   :  { %v1937_v13 = vpop.f32.mrf.mxu1 }
 0x2ad   :  { %v1938_v22 = vadd.f32 %v1937_v13, %v1745_v51  ;;  %v2163_v36 = vpack.c.bf16 %v2113_v47, %v2111_v5  ;;  %v2051_v7 = vmul.f32 0.1, %v1936_v12  ;;  %v2114_v50 = vmax.f32 %v1934_v23, %v2050_v38 }
 0x2ae   :  { %v1939_v16 = vpop.f32.mrf.mxu1  ;;  %v1765_v47 = vadd.f32 %v7328_v8, %v7294_v59 }
 0x2af   :  { %v2052_v1 = vmul.f32 0.1, %v1938_v22  ;;  %v1940_v37 = vadd.f32 %v1939_v16, %v1747_v56  ;;  %2397 = vmatprep.mubr.bf16.mxu0 %v2163_v36  ;;  %v2115_v48 = vmax.f32 %v1936_v12, %v2051_v7  ;;  %v7412_v16 = vpop.f32.mrf.mxu0 }
 0x2b0   :  { %v1943_v18 = vpop.f32.mrf.mxu1  ;;  %2398 = vmatmul.mubr.bf16.gmra.mxu0 %v2162_v54 }
 0x2b1   :  { %v2053_v39 = vmul.f32 0.1, %v1940_v37  ;;  %v2116_v9 = vmax.f32 %v1938_v22, %v2052_v1  ;;  %v1944_v49 = vadd.f32 %v1943_v18, %v1751_v19  ;;  %v7418_v19 = vpop.f32.mrf.mxu0 }
 0x2b2   :  { %v1945_v44 = vpop.f32.mrf.mxu1 }
 0x2b3   :  { %v2117_v14 = vmax.f32 %v1940_v37, %v2053_v39  ;;  %v1946_v52 = vadd.f32 %v1945_v44, %v1753_v40  ;;  %v2164_v6 = vpack.c.bf16 %v2116_v9, %v2114_v50  ;;  %v2054_v15 = vmul.f32 0.1, %v1944_v49 }
 0x2b4   :  { %v1947_v28 = vpop.f32.mrf.mxu1  ;;  %v1773_v40 = vadd.f32 %v7346_v10, %v7289_v57  ;;  %v1777_v10 = vadd.f32 %v7358_v26, %v7289_v57  ;;  %v1781_v26 = vadd.f32 %v7364_v43, %v7294_v59 }
 0x2b5   :  { %v1948_v29 = vadd.f32 %v1947_v28, %v1755_v60  ;;  %v2165_v45 = vpack.c.bf16 %v2117_v14, %v2115_v48  ;;  %v2055_v53 = vmul.f32 0.1, %v1946_v52  ;;  %v2118_v13 = vmax.f32 %v1944_v49, %v2054_v15 }
 0x2b6   :  { %v1949_v32 = vpop.f32.mrf.mxu1  ;;  %v1775_v60 = vadd.f32 %v7352_v11, %v7294_v59  ;;  %v1783_v15 = vadd.f32 %v7370_v35, %v7289_v57  ;;  %v1787_v35 = vadd.f32 %v7382_v63, %v7289_v57 }
 0x2b7   :  { %v2056_v3 = vmul.f32 0.1, %v1948_v29  ;;  %v1950_v4 = vadd.f32 %v1949_v32, %v1757_v2  ;;  %2405 = vmatprep.mubr.bf16.mxu0 %v2165_v45  ;;  %v2119_v12 = vmax.f32 %v1946_v52, %v2055_v53  ;;  %v7424_v45 = vpop.f32.mrf.mxu0 }
 0x2b8   :  { %v1953_v61 = vpop.f32.mrf.mxu1  ;;  %2406 = vmatmul.mubr.bf16.gmra.mxu0 %v2164_v6 }
 0x2b9   :  { %v2057_v17 = vmul.f32 0.1, %v1950_v4  ;;  %v2120_v51 = vmax.f32 %v1948_v29, %v2056_v3  ;;  %v1954_v56 = vadd.f32 %v1953_v61, %v1761_v20 }
 0x2ba   :  { %v1955_v5 = vpop.f32.mrf.mxu1 }
 0x2bb   :  { %v2121_v46 = vmax.f32 %v1950_v4, %v2057_v17  ;;  %v1956_v23 = vadd.f32 %v1955_v5, %v1763_v27  ;;  %v2166_v24 = vpack.c.bf16 %v2120_v51, %v2118_v13  ;;  %v2058_v8 = vmul.f32 0.1, %v1954_v56  ;;  %v7430_v27 = vpop.f32.mrf.mxu0 }
 0x2bc   :  { %v1957_v22 = vpop.f32.mrf.mxu1  ;;  %v1785_v51 = vadd.f32 %v7376_v62, %v7294_v59 }
 0x2bd   :  { %v1958_v36 = vadd.f32 %v1957_v22, %v1765_v47  ;;  %v2167_v54 = vpack.c.bf16 %v2121_v46, %v2119_v12  ;;  %v2059_v1 = vmul.f32 0.1, %v1956_v23  ;;  %v2122_v50 = vmax.f32 %v1954_v56, %v2058_v8  ;;  %v7436_v43 = vpop.f32.mrf.mxu0 }
 0x2be   :  { %v1959_v7 = vpop.f32.mrf.mxu1  ;;  %v1791_v8 = vadd.f32 %v7388_v34, %v7294_v59 }
 0x2bf   :  { %v2060_v37 = vmul.f32 0.1, %v1958_v36  ;;  %v1960_v38 = vadd.f32 %v1959_v7, %v1767_v41  ;;  %2413 = vmatprep.mubr.bf16.mxu0 %v2167_v54  ;;  %v2123_v48 = vmax.f32 %v1956_v23, %v2059_v1  ;;  %v6351_v41 = vld [vmem:[#allocation11] sm:$0xff]  }
 0x2c0   :  { %v1963_v18 = vpop.f32.mrf.mxu1  ;;  %2414 = vmatmul.mubr.bf16.gmra.mxu0 %v2166_v24  ;;  %6052 = vmatprep.subr.bf16.mxu1 %v6351_v41 }
 0x2c1   :  { %v2061_v39 = vmul.f32 0.1, %v1960_v38  ;;  %v2124_v9 = vmax.f32 %v1958_v36, %v2060_v37  ;;  %v1964_v49 = vadd.f32 %v1963_v18, %v1771_v58  ;;  %6053 = vmatpush3.bf16.msra.mxu1 %v6351_v41  ;;  %v1812_v18 = vpop.f32.mrf.mxu0  ;;  %v1795_v58 = vadd.f32 %v7400_v21, %v7294_v59 }
 0x2c2   :  { %v1965_v44 = vpop.f32.mrf.mxu1  ;;  %v1813_v41 = vadd.f32 %v1812_v18, %v7289_v57 }
 0x2c3   :  { %v2125_v14 = vmax.f32 %v1960_v38, %v2061_v39  ;;  %v1966_v52 = vadd.f32 %v1965_v44, %v1773_v40  ;;  %v2168_v42 = vpack.c.bf16 %v2124_v9, %v2122_v50  ;;  %v2062_v11 = vmul.f32 0.1, %v1964_v49 }
 0x2c4   :  { %v1967_v28 = vpop.f32.mrf.mxu1  ;;  %v1793_v38 = vadd.f32 %v7394_v33, %v7289_v57  ;;  %v1797_v50 = vadd.f32 %v7406_v30, %v7289_v57 }
 0x2c5   :  { %v1968_v2 = vadd.f32 %v1967_v28, %v1775_v60  ;;  %v2169_v29 = vpack.c.bf16 %v2125_v14, %v2123_v48  ;;  %v2063_v32 = vmul.f32 0.1, %v1966_v52  ;;  %v2126_v46 = vmax.f32 %v1964_v49, %v2062_v11  ;;  %v1814_v28 = vpop.f32.mrf.mxu0 }
 0x2c6   :  { %v1969_v6 = vpop.f32.mrf.mxu1 }
 0x2c7   :  { %v2064_v53 = vmul.f32 0.1, %v1968_v2  ;;  %v1970_v3 = vadd.f32 %v1969_v6, %v1777_v10  ;;  %2421 = vmatprep.mubr.bf16.mxu0 %v2169_v29  ;;  %v2127_v5 = vmax.f32 %v1966_v52, %v2063_v32  ;;  %v1803_v32 = vadd.f32 %v7418_v19, %v7289_v57  ;;  %v1816_v30 = vpop.f32.mrf.mxu0 }
 0x2c8   :  { %v1973_v4 = vpop.f32.mrf.mxu1  ;;  %2422 = vmatmul.mubr.bf16.gmra.mxu0 %v2168_v42 }
 0x2c9   :  { %v2065_v61 = vmul.f32 0.1, %v1970_v3  ;;  %v2128_v17 = vmax.f32 %v1968_v2, %v2064_v53  ;;  %v1974_v23 = vadd.f32 %v1973_v4, %v1781_v26 }
 0x2ca   :  { %v1975_v20 = vpop.f32.mrf.mxu1 }
 0x2cb   :  { %v2129_v47 = vmax.f32 %v1970_v3, %v2065_v61  ;;  %v1976_v12 = vadd.f32 %v1975_v20, %v1783_v15  ;;  %v2170_v36 = vpack.c.bf16 %v2128_v17, %v2126_v46  ;;  %v2066_v62 = vmul.f32 0.1, %v1974_v23  ;;  %v1820_v46 = vpop.f32.mrf.mxu0 }
 0x2cc   :  { %v1977_v13 = vpop.f32.mrf.mxu1  ;;  %v1801_v3 = vadd.f32 %v7412_v16, %v7294_v59  ;;  %v1805_v15 = vadd.f32 %v7424_v45, %v7294_v59 }
 0x2cd   :  { %v1978_v56 = vadd.f32 %v1977_v13, %v1785_v51  ;;  %v2171_v22 = vpack.c.bf16 %v2129_v47, %v2127_v5  ;;  %v2067_v24 = vmul.f32 0.1, %v1976_v12  ;;  %v2130_v48 = vmax.f32 %v1974_v23, %v2066_v62 }
 0x2ce   :  { %v1979_v54 = vpop.f32.mrf.mxu1  ;;  %v1807_v47 = vadd.f32 %v7430_v27, %v7289_v57 }
 0x2cf   :  { %v2068_v7 = vmul.f32 0.1, %v1978_v56  ;;  %v1980_v1 = vadd.f32 %v1979_v54, %v1787_v35  ;;  %2429 = vmatprep.mubr.bf16.mxu0 %v2171_v22  ;;  %v2131_v9 = vmax.f32 %v1976_v12, %v2067_v24  ;;  %v1811_v54 = vadd.f32 %v7436_v43, %v7294_v59  ;;  %v1822_v24 = vpop.f32.mrf.mxu0 }
 0x2d0   :  { %v1983_v37 = vpop.f32.mrf.mxu1  ;;  %2430 = vmatmul.mubr.bf16.gmra.mxu0 %v2170_v36 }
 0x2d1   :  { %v2069_v63 = vmul.f32 0.1, %v1980_v1  ;;  %v2132_v40 = vmax.f32 %v1978_v56, %v2068_v7  ;;  %v1984_v14 = vadd.f32 %v1983_v37, %v1791_v8  ;;  %v1824_v18 = vpop.f32.mrf.mxu0 }
 0x2d2   :  { %v1985_v39 = vpop.f32.mrf.mxu1 }
 0x2d3   :  { %v2133_v44 = vmax.f32 %v1980_v1, %v2069_v63  ;;  %v1986_v60 = vadd.f32 %v1985_v39, %v1793_v38  ;;  %v2172_v10 = vpack.c.bf16 %v2132_v40, %v2130_v48  ;;  %v2070_v6 = vmul.f32 0.1, %v1984_v14 }
 0x2d4   :  { %v1987_v52 = vpop.f32.mrf.mxu1  ;;  %v1815_v1 = vadd.f32 %v1814_v28, %v7294_v59  ;;  %v1817_v39 = vadd.f32 %v1816_v30, %v7289_v57  ;;  %v1821_v28 = vadd.f32 %v1820_v46, %v7294_v59 }
 0x2d5   :  { %v1988_v33 = vadd.f32 %v1987_v52, %v1795_v58  ;;  %v2173_v49 = vpack.c.bf16 %v2133_v44, %v2131_v9  ;;  %v2071_v2 = vmul.f32 0.1, %v1986_v60  ;;  %v2134_v20 = vmax.f32 %v1984_v14, %v2070_v6 }
 0x2d6   :  { %v1989_v34 = vpop.f32.mrf.mxu1 }
 0x2d7   :  { %v2072_v29 = vmul.f32 0.1, %v1988_v33  ;;  %v1990_v42 = vadd.f32 %v1989_v34, %v1797_v50  ;;  %2437 = vmatprep.mubr.bf16.mxu0 %v2173_v49  ;;  %v2135_v61 = vmax.f32 %v1986_v60, %v2071_v2 }
 0x2d8   :  { %v1993_v21 = vpop.f32.mrf.mxu1  ;;  %2438 = vmatmul.mubr.bf16.gmra.mxu0 %v2172_v10  ;;  %v1826_v10 = vpop.f32.mrf.mxu0 }
 0x2d9   :  { %v2073_v53 = vmul.f32 0.1, %v1990_v42  ;;  %v2136_v11 = vmax.f32 %v1988_v33, %v2072_v29  ;;  %v1994_v51 = vadd.f32 %v1993_v21, %v1801_v3  ;;  %v1823_v33 = vadd.f32 %v1822_v24, %v7289_v57 }
 0x2da   :  { %v1995_v4 = vpop.f32.mrf.mxu1  ;;  %v1825_v29 = vadd.f32 %v1824_v18, %v7294_v59  ;;  %v1827_v30 = vadd.f32 %v1826_v10, %v7289_v57 }
 0x2db   :  { %v2137_v26 = vmax.f32 %v1990_v42, %v2073_v53  ;;  %v1996_v17 = vadd.f32 %v1995_v4, %v1803_v32  ;;  %v2174_v23 = vpack.c.bf16 %v2136_v11, %v2134_v20  ;;  %v2074_v22 = vmul.f32 0.1, %v1994_v51 }
 0x2dc   :  { %v1997_v5 = vpop.f32.mrf.mxu1 }
 0x2dd   :  { %v1998_v19 = vadd.f32 %v1997_v5, %v1805_v15  ;;  %v2175_v12 = vpack.c.bf16 %v2137_v26, %v2135_v61  ;;  %v2075_v13 = vmul.f32 0.1, %v1996_v17  ;;  %v2138_v63 = vmax.f32 %v1994_v51, %v2074_v22 }
 0x2de   :  { %v1999_v16 = vpop.f32.mrf.mxu1 }
 0x2df   :  { %v2076_v35 = vmul.f32 0.1, %v1998_v19  ;;  %v2000_v56 = vadd.f32 %v1999_v16, %v1807_v47  ;;  %2445 = vmatprep.mubr.bf16.mxu0 %v2175_v12  ;;  %v2139_v62 = vmax.f32 %v1996_v17, %v2075_v13  ;;  %v7467_v16 = vld [vmem:[%s7857_s6] ss:$0 sm:$0xff] }
 0x2e0   :  { %v2003_v45 = vpop.f32.mrf.mxu1  ;;  %2446 = vmatmul.mubr.bf16.gmra.mxu0 %v2174_v23 }
 0x2e1   :  { %v2077_v36 = vmul.f32 0.1, %v2000_v56  ;;  %v2140_v27 = vmax.f32 %v1998_v19, %v2076_v35  ;;  %v2004_v8 = vadd.f32 %v2003_v45, %v1811_v54 }
 0x2e2   :  { %v2005_v7 = vpop.f32.mrf.mxu1 }
 0x2e3   :  { %v2141_v37 = vmax.f32 %v2000_v56, %v2077_v36  ;;  %v2006_v38 = vadd.f32 %v2005_v7, %v1813_v41  ;;  %v2176_v44 = vpack.c.bf16 %v2140_v27, %v2138_v63  ;;  %v2078_v52 = vmul.f32 0.1, %v2004_v8  ;;  %v6352_v27 = vld [vmem:[#allocation13 + $0x38] sm:$0xff]  }
 0x2e4   :  { %v2007_v40 = vpop.f32.mrf.mxu1  ;;  %6086 = vmatprep.subr.bf16.mxu1 %v6352_v27 }
 0x2e5   :  { %v2008_v58 = vadd.f32 %v2007_v40, %v1815_v1  ;;  %v2177_v9 = vpack.c.bf16 %v2141_v37, %v2139_v62  ;;  %v2079_v48 = vmul.f32 0.1, %v2006_v38  ;;  %v2142_v32 = vmax.f32 %v2004_v8, %v2078_v52 }
 0x2e6   :  { %v2009_v60 = vpop.f32.mrf.mxu1 }
 0x2e7   :  { %v2080_v43 = vmul.f32 0.1, %v2008_v58  ;;  %v2010_v14 = vadd.f32 %v2009_v60, %v1817_v39  ;;  %2453 = vmatprep.mubr.bf16.mxu0 %v2177_v9  ;;  %v2143_v42 = vmax.f32 %v2006_v38, %v2079_v48 }
 0x2e8   :  { %v2013_v50 = vpop.f32.mrf.mxu1  ;;  %2454 = vmatmul.mubr.bf16.gmra.mxu0 %v2176_v44 }
 0x2e9   :  { %v2081_v49 = vmul.f32 0.1, %v2010_v14  ;;  %v2144_v34 = vmax.f32 %v2008_v58, %v2080_v43  ;;  %v2014_v53 = vadd.f32 %v2013_v50, %v1821_v28 }
 0x2ea   :  { %v2015_v2 = vpop.f32.mrf.mxu1 }
 0x2eb   :  { %v2145_v6 = vmax.f32 %v2010_v14, %v2081_v49  ;;  %v2016_v21 = vadd.f32 %v2015_v2, %v1823_v33  ;;  %v2178_v15 = vpack.c.bf16 %v2144_v34, %v2142_v32  ;;  %v2082_v51 = vmul.f32 0.1, %v2014_v53  ;;  %v6353_v34 = vld [vmem:[#allocation13 + $0x30] sm:$0xff]  }
 0x2ec   :  { %v2017_v3 = vpop.f32.mrf.mxu1 }
 0x2ed   :  { %v2018_v11 = vadd.f32 %v2017_v3, %v1825_v29  ;;  %v2179_v4 = vpack.c.bf16 %v2145_v6, %v2143_v42  ;;  %v2083_v26 = vmul.f32 0.1, %v2016_v21  ;;  %v2146_v12 = vmax.f32 %v2014_v53, %v2082_v51  ;;  %v6354_v53 = vld [vmem:[#allocation13 + $0x28] sm:$0xff]  }
 0x2ee   :  { %v2019_v61 = vpop.f32.mrf.mxu1 }
 0x2ef   :  { %v2084_v17 = vmul.f32 0.1, %v2018_v11  ;;  %v2020_v20 = vadd.f32 %v2019_v61, %v1827_v30  ;;  %2461 = vmatprep.mubr.bf16.mxu0 %v2179_v4  ;;  %v2147_v47 = vmax.f32 %v2016_v21, %v2083_v26 }
 0x2f0   :  { %2462 = vmatmul.mubr.bf16.gmra.mxu0 %v2178_v15 }
 0x2f1   :  { %v2085_v5 = vmul.f32 0.1, %v2020_v20  ;;  %v2148_v59 = vmax.f32 %v2018_v11, %v2084_v17  ;;  %v6355_v17 = vld [vmem:[#allocation13 + $0x20] sm:$0xff]  }
 0x2f3   :  { %v2149_v19 = vmax.f32 %v2020_v20, %v2085_v5  ;;  %v2180_v23 = vpack.c.bf16 %v2148_v59, %v2146_v12  ;;  %v6356_v12 = vld [vmem:[#allocation13 + $0x18] sm:$0xff]  }
 0x2f5   :  { %v2181_v46 = vpack.c.bf16 %v2149_v19, %v2147_v47 }
 0x2f7   :  { %2469 = vmatprep.mubr.bf16.mxu0 %v2181_v46 }
 0x2f8   :  { %2470 = vmatmul.mubr.bf16.gmra.mxu0 %v2180_v23 }
 0x2f9   :  { %3322 = vmatprep.mubr.bf16.mxu0 %v6762_v0 }
 0x340   :  { %v5670_v57 = vpop.f32.mrf.mxu0 }
 0x342   :  { %v5671_v13 = vpop.f32.mrf.mxu0 }
 0x343   :  { %v5672_v35 = vadd.f32 %v5671_v13, %v5670_v57 }
 0x344   :  { %v5673_v56 = vpop.f32.mrf.mxu0 }
 0x345   :  { %v2352_v22 = vadd.f32 %v5672_v35, %v7467_v16 }
 0x346   :  { %v5674_v45 = vpop.f32.mrf.mxu0 }
 0x347   :  { %v5675_v41 = vadd.f32 %v5674_v45, %v5673_v56  ;;  %v2478_v54 = vmul.f32 0.1, %v2352_v22  ;;  %v6357_v45 = vld [vmem:[#allocation13 + $0x10] sm:$0xff]  }
 0x348   :  { %v5676_v36 = vpop.f32.mrf.mxu0 }
 0x349   :  { %v2355_v24 = vadd.f32 %v5675_v41, %v7467_v16  ;;  %v2510_v38 = vmax.f32 %v2352_v22, %v2478_v54 }
 0x34a   :  { %v5677_v7 = vpop.f32.mrf.mxu0 }
 0x34b   :  { %v2479_v1 = vmul.f32 0.1, %v2355_v24  ;;  %v5678_v62 = vadd.f32 %v5677_v7, %v5676_v36 }
 0x34c   :  { %v5679_v37 = vpop.f32.mrf.mxu0 }
 0x34d   :  { %v2511_v63 = vmax.f32 %v2355_v24, %v2479_v1  ;;  %v2360_v8 = vadd.f32 %v5678_v62, %v7467_v16 }
 0x34e   :  { %v5680_v40 = vpop.f32.mrf.mxu0 }
 0x34f   :  { %v5681_v39 = vadd.f32 %v5680_v40, %v5679_v37  ;;  %v2542_v58 = vpack.c.bf16 %v2511_v63, %v2510_v38  ;;  %v2480_v18 = vmul.f32 0.1, %v2360_v8 }
 0x350   :  { %v5682_v9 = vpop.f32.mrf.mxu0 }
 0x351   :  { %v2363_v44 = vadd.f32 %v5681_v39, %v7467_v16  ;;  %6054 = vmatprep.mubr.bf16.mxu1 %v2542_v58  ;;  %v2512_v52 = vmax.f32 %v2360_v8, %v2480_v18 }
 0x352   :  { %v5683_v60 = vpop.f32.mrf.mxu0 }
 0x353   :  { %v2481_v48 = vmul.f32 0.1, %v2363_v44  ;;  %v5684_v43 = vadd.f32 %v5683_v60, %v5682_v9 }
 0x354   :  { %v5685_v14 = vpop.f32.mrf.mxu0 }
 0x355   :  { %v2513_v50 = vmax.f32 %v2363_v44, %v2481_v48  ;;  %v2368_v33 = vadd.f32 %v5684_v43, %v7467_v16 }
 0x356   :  { %v5686_v49 = vpop.f32.mrf.mxu0 }
 0x357   :  { %v2543_v28 = vpack.c.bf16 %v2513_v50, %v2512_v52  ;;  %v5687_v10 = vadd.f32 %v5686_v49, %v5685_v14  ;;  %v2482_v29 = vmul.f32 0.1, %v2368_v33 }
 0x358   :  { %v5688_v2 = vpop.f32.mrf.mxu0 }
 0x359   :  { %v2371_v42 = vadd.f32 %v5687_v10, %v7467_v16  ;;  %6055 = vmatmul.mubr.bf16.vlgmr.msra.gmra.mxu1 %v2543_v28  ;;  %v2514_v30 = vmax.f32 %v2368_v33, %v2482_v29 }
 0x35a   :  { %v5689_v6 = vpop.f32.mrf.mxu0  ;;  %6087 = vmatpush3.bf16.msra.mxu1 %v6352_v27 }
 0x35b   :  { %v2483_v21 = vmul.f32 0.1, %v2371_v42  ;;  %v5690_v32 = vadd.f32 %v5689_v6, %v5688_v2  ;;  %6088 = vmatprep.subr.bf16.mxu1 %v6353_v34 }
 0x35c   :  { %v5691_v3 = vpop.f32.mrf.mxu0 }
 0x35d   :  { %v2515_v11 = vmax.f32 %v2371_v42, %v2483_v21  ;;  %v2376_v4 = vadd.f32 %v5690_v32, %v7467_v16 }
 0x35e   :  { %v5692_v15 = vpop.f32.mrf.mxu0  ;;  %6089 = vmatpush3.bf16.msra.mxu1 %v6353_v34 }
 0x35f   :  { %v5693_v61 = vadd.f32 %v5692_v15, %v5691_v3  ;;  %v2544_v26 = vpack.c.bf16 %v2515_v11, %v2514_v30  ;;  %6090 = vmatprep.subr.bf16.mxu1 %v6354_v53  ;;  %v2484_v51 = vmul.f32 0.1, %v2376_v4 }
 0x360   :  { %v5694_v20 = vpop.f32.mrf.mxu0 }
 0x361   :  { %v2379_v5 = vadd.f32 %v5693_v61, %v7467_v16  ;;  %6058 = vmatprep.mubr.bf16.mxu1 %v2544_v26  ;;  %v2516_v23 = vmax.f32 %v2376_v4, %v2484_v51 }
 0x362   :  { %v5695_v59 = vpop.f32.mrf.mxu0  ;;  %6091 = vmatpush3.bf16.msra.mxu1 %v6354_v53 }
 0x363   :  { %v2485_v47 = vmul.f32 0.1, %v2379_v5  ;;  %v5696_v19 = vadd.f32 %v5695_v59, %v5694_v20  ;;  %6092 = vmatprep.subr.bf16.mxu1 %v6355_v17 }
 0x364   :  { %v5697_v46 = vpop.f32.mrf.mxu0 }
 0x365   :  { %v2517_v57 = vmax.f32 %v2379_v5, %v2485_v47  ;;  %v2384_v13 = vadd.f32 %v5696_v19, %v7467_v16 }
 0x366   :  { %v5698_v35 = vpop.f32.mrf.mxu0  ;;  %6093 = vmatpush3.bf16.msra.mxu1 %v6355_v17 }
 0x367   :  { %v5699_v56 = vadd.f32 %v5698_v35, %v5697_v46  ;;  %v2545_v22 = vpack.c.bf16 %v2517_v57, %v2516_v23  ;;  %6094 = vmatprep.subr.bf16.mxu1 %v6356_v12  ;;  %v2486_v36 = vmul.f32 0.1, %v2384_v13 }
 0x368   :  { %v5700_v41 = vpop.f32.mrf.mxu0 }
 0x369   :  { %v2387_v54 = vadd.f32 %v5699_v56, %v7467_v16  ;;  %6059 = vmatmul.mubr.bf16.gmra.mxu1 %v2545_v22  ;;  %v2518_v62 = vmax.f32 %v2384_v13, %v2486_v36 }
 0x36a   :  { %v5701_v24 = vpop.f32.mrf.mxu0  ;;  %6095 = vmatpush3.bf16.msra.mxu1 %v6356_v12 }
 0x36b   :  { %v2487_v27 = vmul.f32 0.1, %v2387_v54  ;;  %v5702_v7 = vadd.f32 %v5701_v24, %v5700_v41  ;;  %6096 = vmatprep.subr.bf16.mxu1 %v6357_v45 }
 0x36c   :  { %v5703_v1 = vpop.f32.mrf.mxu0 }
 0x36d   :  { %v2519_v37 = vmax.f32 %v2387_v54, %v2487_v27  ;;  %v2392_v38 = vadd.f32 %v5702_v7, %v7467_v16 }
 0x36e   :  { %v5704_v63 = vpop.f32.mrf.mxu0  ;;  %6097 = vmatpush3.bf16.msra.mxu1 %v6357_v45 }
 0x36f   :  { %v5705_v8 = vadd.f32 %v5704_v63, %v5703_v1  ;;  %v2546_v40 = vpack.c.bf16 %v2519_v37, %v2518_v62  ;;  %v2488_v58 = vmul.f32 0.1, %v2392_v38 }
 0x370   :  { %v5706_v39 = vpop.f32.mrf.mxu0 }
 0x371   :  { %v2395_v9 = vadd.f32 %v5705_v8, %v7467_v16  ;;  %6062 = vmatprep.mubr.bf16.mxu1 %v2546_v40  ;;  %v2520_v43 = vmax.f32 %v2392_v38, %v2488_v58 }
 0x372   :  { %v5707_v18 = vpop.f32.mrf.mxu0 }
 0x373   :  { %v2489_v44 = vmul.f32 0.1, %v2395_v9  ;;  %v5708_v60 = vadd.f32 %v5707_v18, %v5706_v39 }
 0x374   :  { %v5709_v48 = vpop.f32.mrf.mxu0 }
 0x375   :  { %v2521_v14 = vmax.f32 %v2395_v9, %v2489_v44  ;;  %v2400_v52 = vadd.f32 %v5708_v60, %v7467_v16 }
 0x376   :  { %v5710_v50 = vpop.f32.mrf.mxu0 }
 0x377   :  { %v5711_v33 = vadd.f32 %v5710_v50, %v5709_v48  ;;  %v2547_v49 = vpack.c.bf16 %v2521_v14, %v2520_v43  ;;  %v2490_v10 = vmul.f32 0.1, %v2400_v52 }
 0x378   :  { %v5712_v28 = vpop.f32.mrf.mxu0 }
 0x379   :  { %v2403_v34 = vadd.f32 %v5711_v33, %v7467_v16  ;;  %6063 = vmatmul.mubr.bf16.gmra.mxu1 %v2547_v49  ;;  %v2522_v21 = vmax.f32 %v2400_v52, %v2490_v10 }
 0x37a   :  { %v5713_v2 = vpop.f32.mrf.mxu0 }
 0x37b   :  { %v2491_v29 = vmul.f32 0.1, %v2403_v34  ;;  %v5714_v42 = vadd.f32 %v5713_v2, %v5712_v28 }
 0x37c   :  { %v5715_v6 = vpop.f32.mrf.mxu0 }
 0x37d   :  { %v2523_v32 = vmax.f32 %v2403_v34, %v2491_v29  ;;  %v2408_v53 = vadd.f32 %v5714_v42, %v7467_v16  ;;  %v6358_v29 = vld [vmem:[#allocation13 + $0x8] sm:$0xff]  }
 0x37e   :  { %v5716_v3 = vpop.f32.mrf.mxu0  ;;  %6098 = vmatprep.subr.bf16.mxu1 %v6358_v29 }
 0x37f   :  { %v5717_v30 = vadd.f32 %v5716_v3, %v5715_v6  ;;  %v2548_v11 = vpack.c.bf16 %v2523_v32, %v2522_v21  ;;  %v2492_v15 = vmul.f32 0.1, %v2408_v53  ;;  %6099 = vmatpush3.bf16.msra.mxu1 %v6358_v29 }
 0x380   :  { %v5718_v4 = vpop.f32.mrf.mxu0 }
 0x381   :  { %v2411_v61 = vadd.f32 %v5717_v30, %v7467_v16  ;;  %6066 = vmatprep.mubr.bf16.mxu1 %v2548_v11  ;;  %v2524_v5 = vmax.f32 %v2408_v53, %v2492_v15  ;;  %v6359_v15 = vld [vmem:[#allocation13] sm:$0xff]  }
 0x382   :  { %v5719_v26 = vpop.f32.mrf.mxu0  ;;  %6100 = vmatprep.subr.bf16.mxu1 %v6359_v15 }
 0x383   :  { %v2493_v17 = vmul.f32 0.1, %v2411_v61  ;;  %v5720_v20 = vadd.f32 %v5719_v26, %v5718_v4  ;;  %6101 = vmatpush3.bf16.msra.mxu1 %v6359_v15  ;;  %v6371_v15 = vld [vmem:[#allocation14 + $0x44] ss:$8 sps:$4 sm:$0xff]  }
 0x384   :  { %v5721_v51 = vpop.f32.mrf.mxu0 }
 0x385   :  { %v2525_v59 = vmax.f32 %v2411_v61, %v2493_v17  ;;  %v2416_v47 = vadd.f32 %v5720_v20, %v7467_v16 }
 0x386   :  { %v5722_v19 = vpop.f32.mrf.mxu0 }
 0x387   :  { %v5723_v12 = vadd.f32 %v5722_v19, %v5721_v51  ;;  %v2549_v46 = vpack.c.bf16 %v2525_v59, %v2524_v5  ;;  %v2494_v57 = vmul.f32 0.1, %v2416_v47 }
 0x388   :  { %v5724_v23 = vpop.f32.mrf.mxu0 }
 0x389   :  { %v2419_v13 = vadd.f32 %v5723_v12, %v7467_v16  ;;  %6067 = vmatmul.mubr.bf16.gmra.mxu1 %v2549_v46  ;;  %v2526_v41 = vmax.f32 %v2416_v47, %v2494_v57 }
 0x38a   :  { %v5725_v35 = vpop.f32.mrf.mxu0 }
 0x38b   :  { %v2495_v56 = vmul.f32 0.1, %v2419_v13  ;;  %v5726_v22 = vadd.f32 %v5725_v35, %v5724_v23 }
 0x38c   :  { %v5727_v45 = vpop.f32.mrf.mxu0 }
 0x38d   :  { %v2527_v36 = vmax.f32 %v2419_v13, %v2495_v56  ;;  %v2424_v54 = vadd.f32 %v5726_v22, %v7467_v16 }
 0x38e   :  { %v5728_v24 = vpop.f32.mrf.mxu0 }
 0x38f   :  { %v5729_v27 = vadd.f32 %v5728_v24, %v5727_v45  ;;  %v2550_v7 = vpack.c.bf16 %v2527_v36, %v2526_v41  ;;  %v2496_v62 = vmul.f32 0.1, %v2424_v54 }
 0x390   :  { %v5730_v1 = vpop.f32.mrf.mxu0 }
 0x391   :  { %v2427_v37 = vadd.f32 %v5729_v27, %v7467_v16  ;;  %6070 = vmatprep.mubr.bf16.mxu1 %v2550_v7  ;;  %v2528_v39 = vmax.f32 %v2424_v54, %v2496_v62 }
 0x392   :  { %v5731_v38 = vpop.f32.mrf.mxu0 }
 0x393   :  { %v2497_v63 = vmul.f32 0.1, %v2427_v37  ;;  %v5732_v8 = vadd.f32 %v5731_v38, %v5730_v1 }
 0x394   :  { %v5733_v40 = vpop.f32.mrf.mxu0 }
 0x395   :  { %v2529_v58 = vmax.f32 %v2427_v37, %v2497_v63  ;;  %v2432_v9 = vadd.f32 %v5732_v8, %v7467_v16 }
 0x396   :  { %v5734_v18 = vpop.f32.mrf.mxu0 }
 0x397   :  { %v5735_v44 = vadd.f32 %v5734_v18, %v5733_v40  ;;  %v2551_v60 = vpack.c.bf16 %v2529_v58, %v2528_v39  ;;  %v2498_v43 = vmul.f32 0.1, %v2432_v9 }
 0x398   :  { %v5736_v48 = vpop.f32.mrf.mxu0 }
 0x399   :  { %v2435_v14 = vadd.f32 %v5735_v44, %v7467_v16  ;;  %6071 = vmatmul.mubr.bf16.gmra.mxu1 %v2551_v60  ;;  %v2530_v28 = vmax.f32 %v2432_v9, %v2498_v43 }
 0x39a   :  { %v5737_v52 = vpop.f32.mrf.mxu0 }
 0x39b   :  { %v2499_v50 = vmul.f32 0.1, %v2435_v14  ;;  %v5738_v33 = vadd.f32 %v5737_v52, %v5736_v48 }
 0x39c   :  { %v5739_v49 = vpop.f32.mrf.mxu0 }
 0x39d   :  { %v2531_v10 = vmax.f32 %v2435_v14, %v2499_v50  ;;  %v2440_v34 = vadd.f32 %v5738_v33, %v7467_v16 }
 0x39e   :  { %v5740_v2 = vpop.f32.mrf.mxu0 }
 0x39f   :  { %v5741_v42 = vadd.f32 %v5740_v2, %v5739_v49  ;;  %v2552_v6 = vpack.c.bf16 %v2531_v10, %v2530_v28  ;;  %v2500_v32 = vmul.f32 0.1, %v2440_v34 }
 0x3a0   :  { %v5742_v21 = vpop.f32.mrf.mxu0 }
 0x3a1   :  { %v2443_v53 = vadd.f32 %v5741_v42, %v7467_v16  ;;  %6074 = vmatprep.mubr.bf16.mxu1 %v2552_v6  ;;  %v2532_v61 = vmax.f32 %v2440_v34, %v2500_v32  ;;  %v6362_v32 = vld [vmem:[#allocation14 + $0x74] ss:$8 sps:$4 sm:$0xff]  }
 0x3a2   :  { %v5743_v3 = vpop.f32.mrf.mxu0  ;;  %3290 = vmatprep.subr.bf16.mxu0 %v6362_v32 }
 0x3a3   :  { %v2501_v30 = vmul.f32 0.1, %v2443_v53  ;;  %v5744_v11 = vadd.f32 %v5743_v3, %v5742_v21  ;;  %v6360_v21 = vld [vmem:[#allocation14 + $0x70] ss:$8 sps:$4 sm:$0xff]   ;;  %v6365_v3 = vld [vmem:[#allocation14 + $0x64] ss:$8 sps:$4 sm:$0xff]  }
 0x3a4   :  { %v5745_v4 = vpop.f32.mrf.mxu0  ;;  %3291 = vmatpush1.bf16.msra.mxu0 %v6360_v21 }
 0x3a5   :  { %v2533_v26 = vmax.f32 %v2443_v53, %v2501_v30  ;;  %v2448_v17 = vadd.f32 %v5744_v11, %v7467_v16  ;;  %v6363_v53 = vld [vmem:[#allocation14 + $0x60] ss:$8 sps:$4 sm:$0xff]   ;;  %3292 = vmatprep.subr.bf16.mxu0 %v6365_v3  ;;  %v6366_v30 = vld [vmem:[#allocation14 + $0x50] ss:$8 sps:$4 sm:$0xff]   ;;  %v6368_v11 = vld [vmem:[#allocation14 + $0x54] ss:$8 sps:$4 sm:$0xff]  }
 0x3a6   :  { %v5746_v20 = vpop.f32.mrf.mxu0 }
 0x3a7   :  { %v5747_v51 = vadd.f32 %v5746_v20, %v5745_v4  ;;  %v2553_v5 = vpack.c.bf16 %v2533_v26, %v2532_v61  ;;  %v2502_v47 = vmul.f32 0.1, %v2448_v17  ;;  %v6369_v26 = vld [vmem:[#allocation14 + $0x40] ss:$8 sps:$4 sm:$0xff]   ;;  %v6374_v20 = vld [vmem:[#allocation14 + $0x34] ss:$8 sps:$4 sm:$0xff]  }
 0x3a8   :  { %v5748_v59 = vpop.f32.mrf.mxu0  ;;  %3293 = vmatpush1.bf16.msra.mxu0 %v6363_v53 }
 0x3a9   :  { %v2451_v19 = vadd.f32 %v5747_v51, %v7467_v16  ;;  %6075 = vmatmul.mubr.bf16.gmra.mxu1 %v2553_v5  ;;  %v2534_v13 = vmax.f32 %v2448_v17, %v2502_v47  ;;  %3294 = vmatprep.subr.bf16.mxu0 %v6368_v11 }
 0x3aa   :  { %v5749_v12 = vpop.f32.mrf.mxu0 }
 0x3ab   :  { %v2503_v46 = vmul.f32 0.1, %v2451_v19  ;;  %v5750_v23 = vadd.f32 %v5749_v12, %v5748_v59 }
 0x3ac   :  { %v5751_v57 = vpop.f32.mrf.mxu0  ;;  %3295 = vmatpush1.bf16.msra.mxu0 %v6366_v30 }
 0x3ad   :  { %v2535_v35 = vmax.f32 %v2451_v19, %v2503_v46  ;;  %v2456_v56 = vadd.f32 %v5750_v23, %v7467_v16  ;;  %3296 = vmatprep.subr.bf16.mxu0 %v6371_v15  ;;  %v6372_v19 = vld [vmem:[#allocation14 + $0x30] ss:$8 sps:$4 sm:$0xff]  }
 0x3ae   :  { %v5752_v22 = vpop.f32.mrf.mxu0 }
 0x3af   :  { %v5753_v45 = vadd.f32 %v5752_v22, %v5751_v57  ;;  %v2554_v41 = vpack.c.bf16 %v2535_v35, %v2534_v13  ;;  %v2504_v54 = vmul.f32 0.1, %v2456_v56  ;;  %v6377_v57 = vld [vmem:[#allocation14 + $0x24] ss:$8 sps:$4 sm:$0xff]   ;;  %v6375_v22 = vld [vmem:[#allocation14 + $0x20] ss:$8 sps:$4 sm:$0xff]  }
 0x3b0   :  { %v5754_v36 = vpop.f32.mrf.mxu0  ;;  %3297 = vmatpush1.bf16.msra.mxu0 %v6369_v26 }
 0x3b1   :  { %v2459_v24 = vadd.f32 %v5753_v45, %v7467_v16  ;;  %6078 = vmatprep.mubr.bf16.mxu1 %v2554_v41  ;;  %v2536_v37 = vmax.f32 %v2456_v56, %v2504_v54  ;;  %3298 = vmatprep.subr.bf16.mxu0 %v6374_v20 }
 0x3b2   :  { %v5755_v27 = vpop.f32.mrf.mxu0 }
 0x3b3   :  { %v2505_v7 = vmul.f32 0.1, %v2459_v24  ;;  %v5756_v1 = vadd.f32 %v5755_v27, %v5754_v36  ;;  %v6380_v36 = vld [vmem:[#allocation14 + $0x14] ss:$8 sps:$4 sm:$0xff]  }
 0x3b4   :  { %v5757_v62 = vpop.f32.mrf.mxu0  ;;  %3299 = vmatpush1.bf16.msra.mxu0 %v6372_v19 }
 0x3b5   :  { %v2537_v38 = vmax.f32 %v2459_v24, %v2505_v7  ;;  %v2464_v63 = vadd.f32 %v5756_v1, %v7467_v16  ;;  %3300 = vmatprep.subr.bf16.mxu0 %v6377_v57  ;;  %v6378_v7 = vld [vmem:[#allocation14 + $0x10] ss:$8 sps:$4 sm:$0xff]   ;;  %v6383_v1 = vld [vmem:[#allocation14 + $0x4] ss:$8 sps:$4 sm:$0xff]  }
 0x3b6   :  { %v5758_v8 = vpop.f32.mrf.mxu0 }
 0x3b7   :  { %v5759_v40 = vadd.f32 %v5758_v8, %v5757_v62  ;;  %v2555_v39 = vpack.c.bf16 %v2537_v38, %v2536_v37  ;;  %v2506_v9 = vmul.f32 0.1, %v2464_v63  ;;  %v6381_v38 = vld [vmem:[#allocation14] ss:$8 sps:$4 sm:$0xff]  }
 0x3b8   :  { %v5760_v58 = vpop.f32.mrf.mxu0  ;;  %3301 = vmatpush1.bf16.msra.mxu0 %v6375_v22 }
 0x3b9   :  { %v2467_v18 = vadd.f32 %v5759_v40, %v7467_v16  ;;  %6079 = vmatmul.mubr.bf16.gmra.mxu1 %v2555_v39  ;;  %v2538_v14 = vmax.f32 %v2464_v63, %v2506_v9  ;;  %3302 = vmatprep.subr.bf16.mxu0 %v6380_v36 }
 0x3ba   :  { %v5761_v44 = vpop.f32.mrf.mxu0 }
 0x3bb   :  { %v2507_v60 = vmul.f32 0.1, %v2467_v18  ;;  %v5762_v48 = vadd.f32 %v5761_v44, %v5760_v58 }
 0x3bc   :  { %v5763_v43 = vpop.f32.mrf.mxu0  ;;  %3303 = vmatpush1.bf16.msra.mxu0 %v6378_v7 }
 0x3bd   :  { %v2539_v52 = vmax.f32 %v2467_v18, %v2507_v60  ;;  %v2472_v50 = vadd.f32 %v5762_v48, %v7467_v16  ;;  %3304 = vmatprep.subr.bf16.mxu0 %v6383_v1 }
 0x3be   :  { %v5764_v33 = vpop.f32.mrf.mxu0 }
 0x3bf   :  { %v5765_v49 = vadd.f32 %v5764_v33, %v5763_v43  ;;  %v2556_v28 = vpack.c.bf16 %v2539_v52, %v2538_v14  ;;  %v2508_v10 = vmul.f32 0.1, %v2472_v50 }
 0x3c0   :  { %3305 = vmatpush1.bf16.msra.mxu0 %v6381_v38 }
 0x3c1   :  { %v2475_v34 = vadd.f32 %v5765_v49, %v7467_v16  ;;  %6082 = vmatprep.mubr.bf16.mxu1 %v2556_v28  ;;  %v2540_v29 = vmax.f32 %v2472_v50, %v2508_v10  ;;  %v7504_v16 = vld [vmem:[%s7859_s8] ss:$0 sm:$0xff] }
 0x3c3   :  { %v2509_v2 = vmul.f32 0.1, %v2475_v34 }
 0x3c5   :  { %v2541_v42 = vmax.f32 %v2475_v34, %v2509_v2 }
 0x3c7   :  { %v2557_v6 = vpack.c.bf16 %v2541_v42, %v2540_v29 }
 0x3c9   :  { %6083 = vmatmul.mubr.bf16.gmra.mxu1 %v2557_v6 }
 0x419   :  { %v6056_v4 = vpop.f32.mrf.mxu1 }
 0x41a   :  { %v2672_v51 = vadd.f32 %v6056_v4, %v7504_v16 }
 0x41b   :  { %v2663_v61 = vpop.f32.mrf.mxu1 }
 0x41c   :  { %v2664_v17 = vadd.f32 %v7504_v16, %v2663_v61  ;;  %v2792_v13 = vmul.f32 0.1, %v2672_v51 }
 0x41d   :  { %v6057_v5 = vpop.f32.mrf.mxu1 }
 0x41e   :  { %v2675_v59 = vadd.f32 %v6057_v5, %v7504_v16  ;;  %v2790_v12 = vmul.f32 0.1, %v2664_v17  ;;  %v2824_v54 = vmax.f32 %v2672_v51, %v2792_v13 }
 0x41f   :  { %v2666_v47 = vpop.f32.mrf.mxu1 }
 0x420   :  { %v2793_v46 = vmul.f32 0.1, %v2675_v59  ;;  %v2667_v23 = vadd.f32 %v7504_v16, %v2666_v47  ;;  %v2822_v45 = vmax.f32 %v2664_v17, %v2790_v12 }
 0x422   :  { %v2791_v35 = vmul.f32 0.1, %v2667_v23  ;;  %v2825_v56 = vmax.f32 %v2675_v59, %v2793_v46 }
 0x424   :  { %v2823_v41 = vmax.f32 %v2667_v23, %v2791_v35  ;;  %v2855_v27 = vpack.c.bf16 %v2825_v56, %v2824_v54 }
 0x426   :  { %v2854_v24 = vpack.c.bf16 %v2823_v41, %v2822_v45 }
 0x428   :  { %6102 = vmatprep.mubr.bf16.mxu1 %v2854_v24 }
 0x429   :  { %v6060_v62 = vpop.f32.mrf.mxu1  ;;  %6103 = vmatmul.mubr.bf16.vlgmr.msra.gmra.mxu1 %v2855_v27 }
 0x42a   :  { %v2688_v8 = vadd.f32 %v6060_v62, %v7504_v16 }
 0x42b   :  { %v2679_v37 = vpop.f32.mrf.mxu1 }
 0x42c   :  { %v2680_v63 = vadd.f32 %v7504_v16, %v2679_v37  ;;  %v2796_v60 = vmul.f32 0.1, %v2688_v8 }
 0x42d   :  { %v6061_v40 = vpop.f32.mrf.mxu1 }
 0x42e   :  { %v2691_v39 = vadd.f32 %v6061_v40, %v7504_v16  ;;  %v2794_v9 = vmul.f32 0.1, %v2680_v63  ;;  %v2828_v50 = vmax.f32 %v2688_v8, %v2796_v60 }
 0x42f   :  { %v2682_v58 = vpop.f32.mrf.mxu1 }
 0x430   :  { %v2797_v18 = vmul.f32 0.1, %v2691_v39  ;;  %v2683_v44 = vadd.f32 %v7504_v16, %v2682_v58  ;;  %v2826_v14 = vmax.f32 %v2680_v63, %v2794_v9 }
 0x432   :  { %v2795_v48 = vmul.f32 0.1, %v2683_v44  ;;  %v2829_v43 = vmax.f32 %v2691_v39, %v2797_v18 }
 0x434   :  { %v2827_v52 = vmax.f32 %v2683_v44, %v2795_v48  ;;  %v2857_v49 = vpack.c.bf16 %v2829_v43, %v2828_v50 }
 0x436   :  { %v2856_v33 = vpack.c.bf16 %v2827_v52, %v2826_v14 }
 0x438   :  { %6106 = vmatprep.mubr.bf16.mxu1 %v2856_v33 }
 0x439   :  { %v6064_v28 = vpop.f32.mrf.mxu1  ;;  %6107 = vmatmul.mubr.bf16.gmra.mxu1 %v2857_v49 }
 0x43a   :  { %v2704_v2 = vadd.f32 %v6064_v28, %v7504_v16 }
 0x43b   :  { %v2695_v10 = vpop.f32.mrf.mxu1 }
 0x43c   :  { %v2696_v34 = vadd.f32 %v7504_v16, %v2695_v10  ;;  %v2800_v3 = vmul.f32 0.1, %v2704_v2 }
 0x43d   :  { %v6065_v29 = vpop.f32.mrf.mxu1 }
 0x43e   :  { %v2707_v42 = vadd.f32 %v6065_v29, %v7504_v16  ;;  %v2798_v21 = vmul.f32 0.1, %v2696_v34  ;;  %v2832_v61 = vmax.f32 %v2704_v2, %v2800_v3 }
 0x43f   :  { %v2698_v6 = vpop.f32.mrf.mxu1 }
 0x440   :  { %v2801_v32 = vmul.f32 0.1, %v2707_v42  ;;  %v2699_v53 = vadd.f32 %v7504_v16, %v2698_v6  ;;  %v2830_v4 = vmax.f32 %v2696_v34, %v2798_v21 }
 0x442   :  { %v2799_v30 = vmul.f32 0.1, %v2699_v53  ;;  %v2833_v11 = vmax.f32 %v2707_v42, %v2801_v32 }
 0x444   :  { %v2831_v15 = vmax.f32 %v2699_v53, %v2799_v30  ;;  %v2859_v17 = vpack.c.bf16 %v2833_v11, %v2832_v61 }
 0x446   :  { %v2858_v26 = vpack.c.bf16 %v2831_v15, %v2830_v4 }
 0x448   :  { %6110 = vmatprep.mubr.bf16.mxu1 %v2858_v26 }
 0x449   :  { %v6068_v20 = vpop.f32.mrf.mxu1  ;;  %6111 = vmatmul.mubr.bf16.gmra.mxu1 %v2859_v17 }
 0x44a   :  { %v2720_v59 = vadd.f32 %v6068_v20, %v7504_v16 }
 0x44b   :  { %v2711_v51 = vpop.f32.mrf.mxu1 }
 0x44c   :  { %v2712_v5 = vadd.f32 %v7504_v16, %v2711_v51  ;;  %v2804_v13 = vmul.f32 0.1, %v2720_v59 }
 0x44d   :  { %v6069_v47 = vpop.f32.mrf.mxu1 }
 0x44e   :  { %v2723_v19 = vadd.f32 %v6069_v47, %v7504_v16  ;;  %v2802_v46 = vmul.f32 0.1, %v2712_v5  ;;  %v2836_v41 = vmax.f32 %v2720_v59, %v2804_v13 }
 0x44f   :  { %v2714_v12 = vpop.f32.mrf.mxu1 }
 0x450   :  { %v2805_v23 = vmul.f32 0.1, %v2723_v19  ;;  %v2715_v57 = vadd.f32 %v7504_v16, %v2714_v12  ;;  %v2834_v22 = vmax.f32 %v2712_v5, %v2802_v46 }
 0x452   :  { %v2803_v35 = vmul.f32 0.1, %v2715_v57  ;;  %v2837_v56 = vmax.f32 %v2723_v19, %v2805_v23 }
 0x454   :  { %v2835_v45 = vmax.f32 %v2715_v57, %v2803_v35  ;;  %v2861_v54 = vpack.c.bf16 %v2837_v56, %v2836_v41 }
 0x456   :  { %v2860_v36 = vpack.c.bf16 %v2835_v45, %v2834_v22 }
 0x458   :  { %6114 = vmatprep.mubr.bf16.mxu1 %v2860_v36 }
 0x459   :  { %v6072_v24 = vpop.f32.mrf.mxu1  ;;  %6115 = vmatmul.mubr.bf16.gmra.mxu1 %v2861_v54 }
 0x45a   :  { %v2736_v1 = vadd.f32 %v6072_v24, %v7504_v16 }
 0x45b   :  { %v2727_v27 = vpop.f32.mrf.mxu1 }
 0x45c   :  { %v2728_v7 = vadd.f32 %v7504_v16, %v2727_v27  ;;  %v2808_v39 = vmul.f32 0.1, %v2736_v1 }
 0x45d   :  { %v6073_v62 = vpop.f32.mrf.mxu1 }
 0x45e   :  { %v2739_v37 = vadd.f32 %v6073_v62, %v7504_v16  ;;  %v2806_v63 = vmul.f32 0.1, %v2728_v7  ;;  %v2840_v60 = vmax.f32 %v2736_v1, %v2808_v39 }
 0x45f   :  { %v2730_v38 = vpop.f32.mrf.mxu1 }
 0x460   :  { %v2809_v8 = vmul.f32 0.1, %v2739_v37  ;;  %v2731_v40 = vadd.f32 %v7504_v16, %v2730_v38  ;;  %v2838_v18 = vmax.f32 %v2728_v7, %v2806_v63 }
 0x462   :  { %v2807_v58 = vmul.f32 0.1, %v2731_v40  ;;  %v2841_v9 = vmax.f32 %v2739_v37, %v2809_v8 }
 0x464   :  { %v2839_v44 = vmax.f32 %v2731_v40, %v2807_v58  ;;  %v2863_v43 = vpack.c.bf16 %v2841_v9, %v2840_v60  ;;  %v7541_v60 = vld [vmem:[%s7861_s10] ss:$0 sm:$0xff] }
 0x466   :  { %v2862_v48 = vpack.c.bf16 %v2839_v44, %v2838_v18  ;;  %v6386_v18 = vld [vmem:[#allocation16 + $0xec] ss:$16 sps:$4 sm:$0xff]  }
 0x467   :  { %4242 = vmatprep.subr.bf16.mxu0 %v6386_v18 }
 0x468   :  { %6118 = vmatprep.mubr.bf16.mxu1 %v2862_v48 }
 0x469   :  { %v6076_v14 = vpop.f32.mrf.mxu1  ;;  %6119 = vmatmul.mubr.bf16.gmra.mxu1 %v2863_v43 }
 0x46a   :  { %v2752_v33 = vadd.f32 %v6076_v14, %v7504_v16 }
 0x46b   :  { %v2743_v52 = vpop.f32.mrf.mxu1 }
 0x46c   :  { %v2744_v50 = vadd.f32 %v7504_v16, %v2743_v52  ;;  %v2812_v42 = vmul.f32 0.1, %v2752_v33 }
 0x46d   :  { %v6077_v49 = vpop.f32.mrf.mxu1 }
 0x46e   :  { %v2755_v28 = vadd.f32 %v6077_v49, %v7504_v16  ;;  %v2810_v34 = vmul.f32 0.1, %v2744_v50  ;;  %v2844_v3 = vmax.f32 %v2752_v33, %v2812_v42  ;;  %v6416_v42 = vld [vmem:[#allocation16 + $0xc4] ss:$16 sps:$4 sm:$0xff]  }
 0x46f   :  { %v2746_v10 = vpop.f32.mrf.mxu1 }
 0x470   :  { %v2813_v2 = vmul.f32 0.1, %v2755_v28  ;;  %v2747_v29 = vadd.f32 %v7504_v16, %v2746_v10  ;;  %v2842_v32 = vmax.f32 %v2744_v50, %v2810_v34  ;;  %v6410_v10 = vld [vmem:[#allocation16 + $0xe4] ss:$16 sps:$4 sm:$0xff]  }
 0x471   :  { %4049 = vmatprep.subr.bf16.mxu1 %v6410_v10  ;;  %v6441_v10 = vld [vmem:[#allocation16] ss:$16 sps:$4 sm:$0xff]  }
 0x472   :  { %v2811_v6 = vmul.f32 0.1, %v2747_v29  ;;  %v2845_v21 = vmax.f32 %v2755_v28, %v2813_v2  ;;  %v6408_v28 = vld [vmem:[#allocation16 + $0xe0] ss:$16 sps:$4 sm:$0xff]  }
 0x473   :  { %4050 = vmatpush1.bf16.msra.mxu1 %v6408_v28  ;;  %v6407_v28 = vld [vmem:[#allocation16 + $0xc] ss:$16 sps:$4 sm:$0xff]  }
 0x474   :  { %v2843_v53 = vmax.f32 %v2747_v29, %v2811_v6  ;;  %v2865_v11 = vpack.c.bf16 %v2845_v21, %v2844_v3  ;;  %v6384_v6 = vld [vmem:[#allocation16 + $0xe8] ss:$16 sps:$4 sm:$0xff]   ;;  %v6414_v3 = vld [vmem:[#allocation16 + $0xc0] ss:$16 sps:$4 sm:$0xff]   ;;  %4051 = vmatprep.subr.bf16.mxu1 %v6416_v42 }
 0x476   :  { %v2864_v30 = vpack.c.bf16 %v2843_v53, %v2842_v32  ;;  %v6389_v53 = vld [vmem:[#allocation16 + $0xcc] ss:$16 sps:$4 sm:$0xff]  }
 0x477   :  { %4052 = vmatpush1.bf16.msra.mxu1 %v6414_v3  ;;  %v6444_v3 = vld [vmem:[#allocation16 + $0x1e0] ss:$16 sps:$4 sm:$0xff]  }
 0x478   :  { %6122 = vmatprep.mubr.bf16.mxu1 %v2864_v30  ;;  %v6419_v30 = vld [vmem:[#allocation16 + $0xa4] ss:$16 sps:$4 sm:$0xff]  }
 0x479   :  { %v6080_v4 = vpop.f32.mrf.mxu1  ;;  %6123 = vmatmul.mubr.bf16.gmra.mxu1 %v2865_v11  ;;  %4053 = vmatprep.subr.bf16.mxu1 %v6419_v30  ;;  %v6452_v30 = vld [vmem:[#allocation16 + $0x1c4] ss:$16 sps:$4 sm:$0xff]  }
 0x47a   :  { %v2768_v26 = vadd.f32 %v6080_v4, %v7504_v16 }
 0x47b   :  { %v2759_v15 = vpop.f32.mrf.mxu1 }
 0x47c   :  { %v2760_v61 = vadd.f32 %v7504_v16, %v2759_v15  ;;  %v2816_v19 = vmul.f32 0.1, %v2768_v26  ;;  %v6387_v15 = vld [vmem:[#allocation16 + $0xc8] ss:$16 sps:$4 sm:$0xff]  }
 0x47d   :  { %v6081_v17 = vpop.f32.mrf.mxu1 }
 0x47e   :  { %v2771_v20 = vadd.f32 %v6081_v17, %v7504_v16  ;;  %v2814_v5 = vmul.f32 0.1, %v2760_v61  ;;  %v2848_v13 = vmax.f32 %v2768_v26, %v2816_v19  ;;  %v6392_v26 = vld [vmem:[#allocation16 + $0xac] ss:$16 sps:$4 sm:$0xff]   ;;  %v6417_v17 = vld [vmem:[#allocation16 + $0xa0] ss:$16 sps:$4 sm:$0xff]  }
 0x47f   :  { %v2762_v51 = vpop.f32.mrf.mxu1  ;;  %v6390_v19 = vld [vmem:[#allocation16 + $0xa8] ss:$16 sps:$4 sm:$0xff]   ;;  %4054 = vmatpush1.bf16.msra.mxu1 %v6417_v17 }
 0x480   :  { %v2817_v59 = vmul.f32 0.1, %v2771_v20  ;;  %v2763_v47 = vadd.f32 %v7504_v16, %v2762_v51  ;;  %v2846_v23 = vmax.f32 %v2760_v61, %v2814_v5  ;;  %v6425_v51 = vld [vmem:[#allocation16 + $0x84] ss:$16 sps:$4 sm:$0xff]  }
 0x481   :  { %4055 = vmatprep.subr.bf16.mxu1 %v6425_v51  ;;  %v6450_v51 = vld [vmem:[#allocation16 + $0x1c0] ss:$16 sps:$4 sm:$0xff]  }
 0x482   :  { %v2815_v12 = vmul.f32 0.1, %v2763_v47  ;;  %v2849_v46 = vmax.f32 %v2771_v20, %v2817_v59 }
 0x484   :  { %v2847_v57 = vmax.f32 %v2763_v47, %v2815_v12  ;;  %v2867_v56 = vpack.c.bf16 %v2849_v46, %v2848_v13  ;;  %v6395_v46 = vld [vmem:[#allocation16 + $0x8c] ss:$16 sps:$4 sm:$0xff]   ;;  %v6428_v13 = vld [vmem:[#allocation16 + $0x64] ss:$16 sps:$4 sm:$0xff]  }
 0x486   :  { %v2866_v35 = vpack.c.bf16 %v2847_v57, %v2846_v23  ;;  %v6423_v23 = vld [vmem:[#allocation16 + $0x80] ss:$16 sps:$4 sm:$0xff]  }
 0x487   :  { %4056 = vmatpush1.bf16.msra.mxu1 %v6423_v23  ;;  %v6453_v23 = vld [vmem:[#allocation16 + $0x1a0] ss:$16 sps:$4 sm:$0xff]  }
 0x488   :  { %6126 = vmatprep.mubr.bf16.mxu1 %v2866_v35  ;;  %4057 = vmatprep.subr.bf16.mxu1 %v6428_v13  ;;  %v6461_v13 = vld [vmem:[#allocation16 + $0x184] ss:$16 sps:$4 sm:$0xff]  }
 0x489   :  { %v6084_v22 = vpop.f32.mrf.mxu1  ;;  %6127 = vmatmul.mubr.bf16.gmra.mxu1 %v2867_v56 }
 0x48a   :  { %v2784_v36 = vadd.f32 %v6084_v22, %v7504_v16  ;;  %v6393_v22 = vld [vmem:[#allocation16 + $0x88] ss:$16 sps:$4 sm:$0xff]  }
 0x48b   :  { %v2775_v45 = vpop.f32.mrf.mxu1 }
 0x48c   :  { %v2776_v41 = vadd.f32 %v7504_v16, %v2775_v45  ;;  %v2820_v37 = vmul.f32 0.1, %v2784_v36 }
 0x48d   :  { %v6085_v54 = vpop.f32.mrf.mxu1 }
 0x48e   :  { %v2787_v24 = vadd.f32 %v6085_v54, %v7504_v16  ;;  %v2818_v7 = vmul.f32 0.1, %v2776_v41  ;;  %v2852_v39 = vmax.f32 %v2784_v36, %v2820_v37  ;;  %v6398_v36 = vld [vmem:[#allocation16 + $0x6c] ss:$16 sps:$4 sm:$0xff]   ;;  %v6426_v54 = vld [vmem:[#allocation16 + $0x60] ss:$16 sps:$4 sm:$0xff]  }
 0x48f   :  { %v2778_v27 = vpop.f32.mrf.mxu1  ;;  %4058 = vmatpush1.bf16.msra.mxu1 %v6426_v54  ;;  %v6459_v54 = vld [vmem:[#allocation16 + $0x180] ss:$16 sps:$4 sm:$0xff]  }
 0x490   :  { %v2821_v1 = vmul.f32 0.1, %v2787_v24  ;;  %v2779_v62 = vadd.f32 %v7504_v16, %v2778_v27  ;;  %v2850_v8 = vmax.f32 %v2776_v41, %v2818_v7 }
 0x492   :  { %v2819_v38 = vmul.f32 0.1, %v2779_v62  ;;  %v2853_v63 = vmax.f32 %v2787_v24, %v2821_v1  ;;  %v6434_v24 = vld [vmem:[#allocation16 + $0x44] ss:$16 sps:$4 sm:$0xff]  }
 0x493   :  { %4059 = vmatprep.subr.bf16.mxu1 %v6434_v24 }
 0x494   :  { %v2851_v40 = vmax.f32 %v2779_v62, %v2819_v38  ;;  %v2869_v9 = vpack.c.bf16 %v2853_v63, %v2852_v39  ;;  %v6396_v62 = vld [vmem:[#allocation16 + $0x68] ss:$16 sps:$4 sm:$0xff]   ;;  %v6401_v63 = vld [vmem:[#allocation16 + $0x4c] ss:$16 sps:$4 sm:$0xff]  }
 0x496   :  { %v2868_v58 = vpack.c.bf16 %v2851_v40, %v2850_v8  ;;  %v6432_v8 = vld [vmem:[#allocation16 + $0x40] ss:$16 sps:$4 sm:$0xff]   ;;  %v6437_v40 = vld [vmem:[#allocation16 + $0x24] ss:$16 sps:$4 sm:$0xff]  }
 0x497   :  { %4060 = vmatpush1.bf16.msra.mxu1 %v6432_v8 }
 0x498   :  { %6130 = vmatprep.mubr.bf16.mxu1 %v2868_v58  ;;  %4061 = vmatprep.subr.bf16.mxu1 %v6437_v40 }
 0x499   :  { %6131 = vmatmul.mubr.bf16.gmra.mxu1 %v2869_v9  ;;  %v6399_v9 = vld [vmem:[#allocation16 + $0x48] ss:$16 sps:$4 sm:$0xff]  }
 0x4e9   :  { %v6104_v44 = vpop.f32.mrf.mxu1 }
 0x4ea   :  { %v2984_v34 = vadd.f32 %v6104_v44, %v7541_v60  ;;  %v6404_v44 = vld [vmem:[#allocation16 + $0x2c] ss:$16 sps:$4 sm:$0xff]  }
 0x4eb   :  { %v2975_v48 = vpop.f32.mrf.mxu1 }
 0x4ec   :  { %v2976_v16 = vadd.f32 %v7541_v60, %v2975_v48  ;;  %v3104_v11 = vmul.f32 0.1, %v2984_v34  ;;  %v6435_v48 = vld [vmem:[#allocation16 + $0x20] ss:$16 sps:$4 sm:$0xff]  }
 0x4ed   :  { %v6105_v43 = vpop.f32.mrf.mxu1  ;;  %4062 = vmatpush1.bf16.msra.mxu1 %v6435_v48 }
 0x4ee   :  { %v3102_v52 = vmul.f32 0.1, %v2976_v16  ;;  %v2987_v33 = vadd.f32 %v6105_v43, %v7541_v60  ;;  %v3136_v5 = vmax.f32 %v2984_v34, %v3104_v11  ;;  %v6443_v43 = vld [vmem:[#allocation16 + $0x4] ss:$16 sps:$4 sm:$0xff]  }
 0x4ef   :  { %v2978_v14 = vpop.f32.mrf.mxu1  ;;  %4063 = vmatprep.subr.bf16.mxu1 %v6443_v43 }
 0x4f0   :  { %v2979_v50 = vadd.f32 %v7541_v60, %v2978_v14  ;;  %v3134_v2 = vmax.f32 %v2976_v16, %v3102_v52  ;;  %v3105_v21 = vmul.f32 0.1, %v2987_v33 }
 0x4f1   :  { %4064 = vmatpush1.bf16.msra.mxu1 %v6441_v10 }
 0x4f2   :  { %v3103_v49 = vmul.f32 0.1, %v2979_v50  ;;  %v3137_v61 = vmax.f32 %v2987_v33, %v3105_v21  ;;  %v6402_v33 = vld [vmem:[#allocation16 + $0x28] ss:$16 sps:$4 sm:$0xff]  }
 0x4f4   :  { %v3135_v29 = vmax.f32 %v2979_v50, %v3103_v49  ;;  %v3167_v12 = vpack.c.bf16 %v3137_v61, %v3136_v5  ;;  %v6411_v61 = vld [vmem:[#allocation16 + $0x1e8] ss:$16 sps:$4 sm:$0xff]   ;;  %v6455_v5 = vld [vmem:[#allocation16 + $0x1a4] ss:$16 sps:$4 sm:$0xff]  }
 0x4f6   :  { %v3166_v32 = vpack.c.bf16 %v3135_v29, %v3134_v2  ;;  %v6446_v2 = vld [vmem:[#allocation16 + $0x1e4] ss:$16 sps:$4 sm:$0xff]  }
 0x4f7   :  { %4065 = vmatprep.subr.bf16.mxu1 %v6446_v2 }
 0x4f8   :  { %3323 = vmatmul.mubr.bf16.vlgmr.msra.gmra.mxu0 %v3166_v32  ;;  %4066 = vmatpush2.bf16.msra.mxu1 %v6444_v3  ;;  %v6464_v3 = vld [vmem:[#allocation16 + $0x164] ss:$16 sps:$4 sm:$0xff]  }
 0x4f9   :  { %v6108_v4 = vpop.f32.mrf.mxu1  ;;  %3332 = vmatprep.mubr.bf16.mxu0 %v6762_v0  ;;  %4243 = vmatpush1.bf16.msra.mxu0 %v6384_v6  ;;  %v6405_v6 = vld [vmem:[#allocation16 + $0x8] ss:$16 sps:$4 sm:$0xff]  }
 0x4fa   :  { %4244 = vmatprep.subr.bf16.mxu0 %v6389_v53  ;;  %v3000_v27 = vadd.f32 %v6108_v4, %v7541_v60  ;;  %v6413_v53 = vld [vmem:[#allocation16 + $0x1ec] ss:$16 sps:$4 sm:$0xff]   ;;  %4067 = vmatprep.subr.bf16.mxu1 %v6452_v30 }
 0x4fb   :  { %v2991_v20 = vpop.f32.mrf.mxu1 }
 0x4fc   :  { %v2992_v59 = vadd.f32 %v7541_v60, %v2991_v20  ;;  %v3108_v39 = vmul.f32 0.1, %v3000_v27  ;;  %v6422_v20 = vld [vmem:[#allocation16 + $0x1cc] ss:$16 sps:$4 sm:$0xff]   ;;  %4068 = vmatpush2.bf16.msra.mxu1 %v6450_v51  ;;  %v6468_v51 = vld [vmem:[#allocation16 + $0x140] ss:$16 sps:$4 sm:$0xff]  }
 0x4fd   :  { %v6109_v47 = vpop.f32.mrf.mxu1  ;;  %4245 = vmatpush1.bf16.msra.mxu0 %v6387_v15  ;;  %4069 = vmatprep.subr.bf16.mxu1 %v6455_v5 }
 0x4fe   :  { %4246 = vmatprep.subr.bf16.mxu0 %v6392_v26  ;;  %v3106_v35 = vmul.f32 0.1, %v2992_v59  ;;  %v3003_v45 = vadd.f32 %v6109_v47, %v7541_v60  ;;  %v3140_v14 = vmax.f32 %v3000_v27, %v3108_v39  ;;  %v6447_v39 = vld [vmem:[#allocation16 + $0x168] ss:$16 sps:$4 sm:$0xff]  }
 0x4ff   :  { %v2994_v57 = vpop.f32.mrf.mxu1 }
 0x500   :  { %v2995_v56 = vadd.f32 %v7541_v60, %v2994_v57  ;;  %3333 = vmatmul.mubr.bf16.gmra.mxu0 %v3167_v12  ;;  %v3138_v7 = vmax.f32 %v2992_v59, %v3106_v35  ;;  %v3109_v37 = vmul.f32 0.1, %v3003_v45  ;;  %4070 = vmatpush2.bf16.msra.mxu1 %v6453_v23 }
 0x501   :  { %3342 = vmatprep.mubr.bf16.mxu0 %v6762_v0  ;;  %4247 = vmatpush1.bf16.msra.mxu0 %v6390_v19  ;;  %v6420_v19 = vld [vmem:[#allocation16 + $0x1c8] ss:$16 sps:$4 sm:$0xff]  }
 0x502   :  { %v3107_v41 = vmul.f32 0.1, %v2995_v56  ;;  %4248 = vmatprep.subr.bf16.mxu0 %v6395_v46  ;;  %v3141_v18 = vmax.f32 %v3003_v45, %v3109_v37  ;;  %v6431_v46 = vld [vmem:[#allocation16 + $0x1ac] ss:$16 sps:$4 sm:$0xff]   ;;  %v6429_v45 = vld [vmem:[#allocation16 + $0x1a8] ss:$16 sps:$4 sm:$0xff]   ;;  %4071 = vmatprep.subr.bf16.mxu1 %v6461_v13 }
 0x503   :  { %v6471_v13 = vld [vmem:[#allocation16 + $0x120] ss:$16 sps:$4 sm:$0xff]  }
 0x504   :  { %v3139_v1 = vmax.f32 %v2995_v56, %v3107_v41  ;;  %v3169_v49 = vpack.c.bf16 %v3141_v18, %v3140_v14  ;;  %4072 = vmatpush2.bf16.msra.mxu1 %v6459_v54  ;;  %v6458_v18 = vld [vmem:[#allocation16 + $0x14c] ss:$16 sps:$4 sm:$0xff]  }
 0x505   :  { %4249 = vmatpush1.bf16.msra.mxu0 %v6393_v22  ;;  %4073 = vmatprep.subr.bf16.mxu1 %v6464_v3 }
 0x506   :  { %v3168_v38 = vpack.c.bf16 %v3139_v1, %v3138_v7  ;;  %4250 = vmatprep.subr.bf16.mxu0 %v6398_v36  ;;  %v6440_v36 = vld [vmem:[#allocation16 + $0x18c] ss:$16 sps:$4 sm:$0xff]   ;;  %v6438_v1 = vld [vmem:[#allocation16 + $0x188] ss:$16 sps:$4 sm:$0xff]  }
 0x508   :  { %3343 = vmatmul.mubr.bf16.gmra.mxu0 %v3168_v38  ;;  %v6449_v38 = vld [vmem:[#allocation16 + $0x16c] ss:$16 sps:$4 sm:$0xff]  }
 0x509   :  { %v6112_v58 = vpop.f32.mrf.mxu1  ;;  %3352 = vmatprep.mubr.bf16.mxu0 %v6762_v0  ;;  %4251 = vmatpush1.bf16.msra.mxu0 %v6396_v62 }
 0x50a   :  { %4252 = vmatprep.subr.bf16.mxu0 %v6401_v63  ;;  %v3016_v11 = vadd.f32 %v6112_v58, %v7541_v60 }
 0x50b   :  { %v3007_v16 = vpop.f32.mrf.mxu1 }
 0x50c   :  { %v3008_v52 = vadd.f32 %v7541_v60, %v3007_v16  ;;  %v3112_v59 = vmul.f32 0.1, %v3016_v11  ;;  %v6456_v16 = vld [vmem:[#allocation16 + $0x148] ss:$16 sps:$4 sm:$0xff]  }
 0x50d   :  { %v6113_v50 = vpop.f32.mrf.mxu1  ;;  %4253 = vmatpush1.bf16.msra.mxu0 %v6399_v9 }
 0x50e   :  { %4254 = vmatprep.subr.bf16.mxu0 %v6404_v44  ;;  %v3110_v29 = vmul.f32 0.1, %v3008_v52  ;;  %v3019_v21 = vadd.f32 %v6113_v50, %v7541_v60  ;;  %v3144_v35 = vmax.f32 %v3016_v11, %v3112_v59  ;;  %v6462_v11 = vld [vmem:[#allocation16 + $0x160] ss:$16 sps:$4 sm:$0xff]  }
 0x50f   :  { %v3010_v34 = vpop.f32.mrf.mxu1  ;;  %4074 = vmatpush2.bf16.msra.mxu1 %v6462_v11 }
 0x510   :  { %v3011_v42 = vadd.f32 %v7541_v60, %v3010_v34  ;;  %3353 = vmatmul.mubr.bf16.gmra.mxu0 %v3169_v49  ;;  %v3142_v4 = vmax.f32 %v3008_v52, %v3110_v29  ;;  %v3113_v26 = vmul.f32 0.1, %v3019_v21 }
 0x511   :  { %3362 = vmatprep.mubr.bf16.mxu0 %v6762_v0  ;;  %4255 = vmatpush1.bf16.msra.mxu0 %v6402_v33 }
 0x512   :  { %v3111_v32 = vmul.f32 0.1, %v3011_v42  ;;  %4256 = vmatprep.subr.bf16.mxu0 %v6407_v28  ;;  %v3145_v12 = vmax.f32 %v3019_v21, %v3113_v26  ;;  %v6470_v26 = vld [vmem:[#allocation16 + $0x144] ss:$16 sps:$4 sm:$0xff]  }
 0x513   :  { %4075 = vmatprep.subr.bf16.mxu1 %v6470_v26 }
 0x514   :  { %v3143_v15 = vmax.f32 %v3011_v42, %v3111_v32  ;;  %v3171_v41 = vpack.c.bf16 %v3145_v12, %v3144_v35  ;;  %4076 = vmatpush2.bf16.msra.mxu1 %v6468_v51  ;;  %v6467_v12 = vld [vmem:[#allocation16 + $0x12c] ss:$16 sps:$4 sm:$0xff]  }
 0x515   :  { %4257 = vmatpush1.bf16.msra.mxu0 %v6405_v6 }
 0x516   :  { %v3170_v17 = vpack.c.bf16 %v3143_v15, %v3142_v4  ;;  %4258 = vmatprep.subr.bf16.mxu0 %v6413_v53 }
 0x518   :  { %3363 = vmatmul.mubr.bf16.gmra.mxu0 %v3170_v17 }
 0x519   :  { %v6116_v47 = vpop.f32.mrf.mxu1  ;;  %3372 = vmatprep.mubr.bf16.mxu0 %v6762_v0  ;;  %4259 = vmatpush2.bf16.msra.mxu0 %v6411_v61 }
 0x51a   :  { %4260 = vmatprep.subr.bf16.mxu0 %v6422_v20  ;;  %v3032_v63 = vadd.f32 %v6116_v47, %v7541_v60 }
 0x51b   :  { %v3023_v57 = vpop.f32.mrf.mxu1 }
 0x51c   :  { %v3024_v56 = vadd.f32 %v7541_v60, %v3023_v57  ;;  %v3116_v44 = vmul.f32 0.1, %v3032_v63 }
 0x51d   :  { %v6117_v22 = vpop.f32.mrf.mxu1  ;;  %4261 = vmatpush2.bf16.msra.mxu0 %v6420_v19  ;;  %v6465_v19 = vld [vmem:[#allocation16 + $0x128] ss:$16 sps:$4 sm:$0xff]  }
 0x51e   :  { %4262 = vmatprep.subr.bf16.mxu0 %v6431_v46  ;;  %v3114_v27 = vmul.f32 0.1, %v3024_v56  ;;  %v3035_v62 = vadd.f32 %v6117_v22, %v7541_v60  ;;  %v3148_v52 = vmax.f32 %v3032_v63, %v3116_v44  ;;  %v6473_v46 = vld [vmem:[#allocation16 + $0x124] ss:$16 sps:$4 sm:$0xff]   ;;  %v6476_v22 = vld [vmem:[#allocation16 + $0x10c] ss:$16 sps:$4 sm:$0xff]  }
 0x51f   :  { %v3026_v24 = vpop.f32.mrf.mxu1  ;;  %4077 = vmatprep.subr.bf16.mxu1 %v6473_v46 }
 0x520   :  { %v3027_v7 = vadd.f32 %v7541_v60, %v3026_v24  ;;  %3373 = vmatmul.mubr.bf16.gmra.mxu0 %v3171_v41  ;;  %v3146_v8 = vmax.f32 %v3024_v56, %v3114_v27  ;;  %v3117_v58 = vmul.f32 0.1, %v3035_v62  ;;  %4078 = vmatpush2.bf16.msra.mxu1 %v6471_v13  ;;  %v6474_v24 = vld [vmem:[#allocation16 + $0x108] ss:$16 sps:$4 sm:$0xff]   ;;  %v6477_v27 = vld [vmem:[#allocation16 + $0x100] ss:$16 sps:$4 sm:$0xff]  }
 0x521   :  { %3382 = vmatprep.mubr.bf16.mxu0 %v6762_v0  ;;  %4263 = vmatpush2.bf16.msra.mxu0 %v6429_v45  ;;  %v6479_v45 = vld [vmem:[#allocation16 + $0x104] ss:$16 sps:$4 sm:$0xff]  }
 0x522   :  { %v3115_v37 = vmul.f32 0.1, %v3027_v7  ;;  %4264 = vmatprep.subr.bf16.mxu0 %v6440_v36  ;;  %v3149_v43 = vmax.f32 %v3035_v62, %v3117_v58  ;;  %4079 = vmatprep.subr.bf16.mxu1 %v6479_v45 }
 0x524   :  { %v3147_v40 = vmax.f32 %v3027_v7, %v3115_v37  ;;  %v3173_v49 = vpack.c.bf16 %v3149_v43, %v3148_v52  ;;  %4080 = vmatpush2.bf16.msra.mxu1 %v6477_v27 }
 0x525   :  { %4265 = vmatpush2.bf16.msra.mxu0 %v6438_v1 }
 0x526   :  { %v3172_v9 = vpack.c.bf16 %v3147_v40, %v3146_v8  ;;  %4266 = vmatprep.subr.bf16.mxu0 %v6449_v38 }
 0x528   :  { %3383 = vmatmul.mubr.bf16.gmra.mxu0 %v3172_v9 }
 0x529   :  { %v6120_v48 = vpop.f32.mrf.mxu1  ;;  %3392 = vmatprep.mubr.bf16.mxu0 %v6762_v0  ;;  %4267 = vmatpush2.bf16.msra.mxu0 %v6447_v39 }
 0x52a   :  { %4268 = vmatprep.subr.bf16.mxu0 %v6458_v18  ;;  %v3048_v42 = vadd.f32 %v6120_v48, %v7541_v60 }
 0x52b   :  { %v3039_v14 = vpop.f32.mrf.mxu1 }
 0x52c   :  { %v3040_v50 = vadd.f32 %v7541_v60, %v3039_v14  ;;  %v3120_v30 = vmul.f32 0.1, %v3048_v42 }
 0x52d   :  { %v6121_v33 = vpop.f32.mrf.mxu1  ;;  %4269 = vmatpush2.bf16.msra.mxu0 %v6456_v16 }
 0x52e   :  { %v3118_v10 = vmul.f32 0.1, %v3040_v50  ;;  %v3051_v2 = vadd.f32 %v6121_v33, %v7541_v60  ;;  %v3152_v17 = vmax.f32 %v3048_v42, %v3120_v30  ;;  %4270 = vmatprep.subr.bf16.mxu0 %v6467_v12 }
 0x52f   :  { %v3042_v28 = vpop.f32.mrf.mxu1 }
 0x530   :  { %v3043_v34 = vadd.f32 %v7541_v60, %v3042_v28  ;;  %3393 = vmatmul.mubr.bf16.gmra.mxu0 %v3173_v49  ;;  %v3150_v6 = vmax.f32 %v3040_v50, %v3118_v10  ;;  %v3121_v32 = vmul.f32 0.1, %v3051_v2 }
 0x531   :  { %3402 = vmatprep.mubr.bf16.mxu0 %v6762_v0  ;;  %4271 = vmatpush2.bf16.msra.mxu0 %v6465_v19 }
 0x532   :  { %v3119_v29 = vmul.f32 0.1, %v3043_v34  ;;  %v3153_v15 = vmax.f32 %v3051_v2, %v3121_v32  ;;  %4272 = vmatprep.subr.bf16.mxu0 %v6476_v22 }
 0x534   :  { %v3151_v21 = vmax.f32 %v3043_v34, %v3119_v29  ;;  %v3175_v59 = vpack.c.bf16 %v3153_v15, %v3152_v17 }
 0x535   :  { %4273 = vmatpush2.bf16.msra.mxu0 %v6474_v24 }
 0x536   :  { %v3174_v53 = vpack.c.bf16 %v3151_v21, %v3150_v6 }
 0x538   :  { %3403 = vmatmul.mubr.bf16.gmra.mxu0 %v3174_v53 }
 0x539   :  { %v6124_v4 = vpop.f32.mrf.mxu1  ;;  %3412 = vmatprep.mubr.bf16.mxu0 %v6762_v0 }
 0x53a   :  { %v3064_v41 = vadd.f32 %v6124_v4, %v7541_v60 }
 0x53b   :  { %v3055_v61 = vpop.f32.mrf.mxu1 }
 0x53c   :  { %v3056_v20 = vadd.f32 %v7541_v60, %v3055_v61  ;;  %v3124_v62 = vmul.f32 0.1, %v3064_v41 }
 0x53d   :  { %v6125_v5 = vpop.f32.mrf.mxu1 }
 0x53e   :  { %v3122_v23 = vmul.f32 0.1, %v3056_v20  ;;  %v3067_v35 = vadd.f32 %v6125_v5, %v7541_v60  ;;  %v3156_v8 = vmax.f32 %v3064_v41, %v3124_v62 }
 0x53f   :  { %v3058_v47 = vpop.f32.mrf.mxu1 }
 0x540   :  { %v3059_v57 = vadd.f32 %v7541_v60, %v3058_v47  ;;  %3413 = vmatmul.mubr.bf16.gmra.mxu0 %v3175_v59  ;;  %v3154_v36 = vmax.f32 %v3056_v20, %v3122_v23  ;;  %v3125_v7 = vmul.f32 0.1, %v3067_v35  ;;  %v6480_v59 = vld [vmem:[#allocation17 + $0x78] sm:$0xff]  }
 0x541   :  { %3422 = vmatprep.mubr.bf16.mxu0 %v6762_v0  ;;  %5814 = vmatprep.subr.bf16.mxu1 %v6480_v59  ;;  %v6482_v47 = vld [vmem:[#allocation17 + $0xf8] sm:$0xff]  }
 0x542   :  { %v3123_v56 = vmul.f32 0.1, %v3059_v57  ;;  %v3157_v38 = vmax.f32 %v3067_v35, %v3125_v7  ;;  %5926 = vmatprep.subr.bf16.mxu0 %v6482_v47 }
 0x544   :  { %v3155_v54 = vmax.f32 %v3059_v57, %v3123_v56  ;;  %v3177_v58 = vpack.c.bf16 %v3157_v38, %v3156_v8 }
 0x546   :  { %v3176_v1 = vpack.c.bf16 %v3155_v54, %v3154_v36 }
 0x548   :  { %3423 = vmatmul.mubr.bf16.gmra.mxu0 %v3176_v1 }
 0x549   :  { %v6128_v37 = vpop.f32.mrf.mxu1  ;;  %3432 = vmatprep.mubr.bf16.mxu0 %v6762_v0 }
 0x54a   :  { %v3080_v43 = vadd.f32 %v6128_v37, %v7541_v60 }
 0x54b   :  { %v3071_v63 = vpop.f32.mrf.mxu1 }
 0x54c   :  { %v3072_v40 = vadd.f32 %v7541_v60, %v3071_v63  ;;  %v3128_v49 = vmul.f32 0.1, %v3080_v43 }
 0x54d   :  { %v6129_v39 = vpop.f32.mrf.mxu1 }
 0x54e   :  { %v3126_v18 = vmul.f32 0.1, %v3072_v40  ;;  %v3083_v48 = vadd.f32 %v6129_v39, %v7541_v60  ;;  %v3160_v2 = vmax.f32 %v3080_v43, %v3128_v49 }
 0x54f   :  { %v3074_v9 = vpop.f32.mrf.mxu1 }
 0x550   :  { %v3075_v44 = vadd.f32 %v7541_v60, %v3074_v9  ;;  %3433 = vmatmul.mubr.bf16.gmra.mxu0 %v3177_v58  ;;  %v3158_v14 = vmax.f32 %v3072_v40, %v3126_v18  ;;  %v3129_v50 = vmul.f32 0.1, %v3083_v48  ;;  %v6481_v58 = vld [vmem:[#allocation17 + $0x38] sm:$0xff]  }
 0x551   :  { %3442 = vmatprep.mubr.bf16.mxu0 %v6762_v0  ;;  %v6483_v9 = vld [vmem:[#allocation17 + $0xb8] sm:$0xff]  }
 0x552   :  { %v3127_v16 = vmul.f32 0.1, %v3075_v44  ;;  %v3161_v10 = vmax.f32 %v3083_v48, %v3129_v50  ;;  %v6484_v48 = vld [vmem:[#allocation17 + $0x70] sm:$0xff]  }
 0x554   :  { %v3159_v52 = vmax.f32 %v3075_v44, %v3127_v16  ;;  %v3179_v6 = vpack.c.bf16 %v3161_v10, %v3160_v2  ;;  %v6486_v16 = vld [vmem:[#allocation17 + $0xf0] sm:$0xff]  }
 0x555   :  { %v6487_v10 = vld [vmem:[#allocation17 + $0xb0] sm:$0xff]  }
 0x556   :  { %v3178_v33 = vpack.c.bf16 %v3159_v52, %v3158_v14 }
 0x558   :  { %3443 = vmatmul.mubr.bf16.gmra.mxu0 %v3178_v33 }
 0x559   :  { %v6132_v28 = vpop.f32.mrf.mxu1  ;;  %3452 = vmatprep.mubr.bf16.mxu0 %v6762_v0 }
 0x55a   :  { %v3096_v11 = vadd.f32 %v6132_v28, %v7541_v60  ;;  %v6485_v28 = vld [vmem:[#allocation17 + $0x30] sm:$0xff]  }
 0x55b   :  { %v3087_v34 = vpop.f32.mrf.mxu1 }
 0x55c   :  { %v3088_v29 = vadd.f32 %v7541_v60, %v3087_v34  ;;  %v3132_v17 = vmul.f32 0.1, %v3096_v11 }
 0x55d   :  { %v6133_v42 = vpop.f32.mrf.mxu1 }
 0x55e   :  { %v3130_v32 = vmul.f32 0.1, %v3088_v29  ;;  %v3099_v3 = vadd.f32 %v6133_v42, %v7541_v60  ;;  %v3164_v51 = vmax.f32 %v3096_v11, %v3132_v17  ;;  %v6490_v42 = vld [vmem:[#allocation17 + $0xe8] sm:$0xff]  }
 0x55f   :  { %v3090_v21 = vpop.f32.mrf.mxu1 }
 0x560   :  { %v3091_v53 = vadd.f32 %v7541_v60, %v3090_v21  ;;  %3453 = vmatmul.mubr.bf16.gmra.mxu0 %v3179_v6  ;;  %v3162_v4 = vmax.f32 %v3088_v29, %v3130_v32  ;;  %v3133_v61 = vmul.f32 0.1, %v3099_v3  ;;  %v3198_v60 = vld [vmem:[%s7863_s12] sm:$0x3]  ;;  %v6488_v29 = vld [vmem:[#allocation17 + $0x68] sm:$0xff]  }
 0x561   :  { %3462 = vmatprep.mubr.bf16.mxu0 %v6762_v0  ;;  %v7594_v19 = vrot.slane %v3198_v60, %v7019_v55  ;;  %v7597_v12 = vrot.slane %v3198_v60, %v7010_v31 }
 0x562   :  { %v3131_v30 = vmul.f32 0.1, %v3091_v53  ;;  %v3165_v20 = vmax.f32 %v3099_v3, %v3133_v61  ;;  %v6491_v61 = vld [vmem:[#allocation17 + $0xa8] sm:$0xff]  }
 0x564   :  { %v3163_v15 = vmax.f32 %v3091_v53, %v3131_v30  ;;  %v3181_v5 = vpack.c.bf16 %v3165_v20, %v3164_v51  ;;  %v6492_v20 = vld [vmem:[#allocation17 + $0x60] sm:$0xff]  }
 0x565   :  { %v6494_v51 = vld [vmem:[#allocation17 + $0xe0] sm:$0xff]  }
 0x566   :  { %v3180_v26 = vpack.c.bf16 %v3163_v15, %v3162_v4  ;;  %v6489_v15 = vld [vmem:[#allocation17 + $0x28] sm:$0xff]  }
 0x568   :  { %3463 = vmatmul.mubr.bf16.gmra.mxu0 %v3180_v26 }
 0x569   :  { %3472 = vmatprep.mubr.bf16.mxu0 %v6762_v0 }
 0x570   :  { %3473 = vmatmul.mubr.bf16.gmra.mxu0 %v3181_v5 }
 0x5b8   :  { %v3324_v46 = vpop.f32.mrf.mxu0 }
 0x5b9   :  { %v3325_v57 = vadd.f32 %v3324_v46, %v7597_v12 }
 0x5ba   :  { %v3326_v0 = vpop.f32.mrf.mxu0 }
 0x5bb   :  { %v3327_v23 = vadd.f32 %v3326_v0, %v7594_v19  ;;  %v3483_v36 = vmul.f32 0.1, %v3325_v57 }
 0x5bc   :  { %v3328_v13 = vpop.f32.mrf.mxu0 }
 0x5bd   :  { %v3329_v35 = vadd.f32 %v3328_v13, %v7597_v12  ;;  %v3484_v22 = vmul.f32 0.1, %v3327_v23  ;;  %v3547_v38 = vmax.f32 %v3325_v57, %v3483_v36  ;;  %v6495_v57 = vld [vmem:[#allocation17 + $0xa0] sm:$0xff]  }
 0x5be   :  { %v3330_v56 = vpop.f32.mrf.mxu0 }
 0x5bf   :  { %v3485_v45 = vmul.f32 0.1, %v3329_v35  ;;  %v3331_v41 = vadd.f32 %v3330_v56, %v7594_v19  ;;  %v3548_v1 = vmax.f32 %v3327_v23, %v3484_v22  ;;  %v6493_v23 = vld [vmem:[#allocation17 + $0x20] sm:$0xff]   ;;  %v6496_v56 = vld [vmem:[#allocation17 + $0x58] sm:$0xff]  }
 0x5c0   :  { %v3334_v54 = vpop.f32.mrf.mxu0  ;;  %v6498_v22 = vld [vmem:[#allocation17 + $0xd8] sm:$0xff]  }
 0x5c1   :  { %v3486_v24 = vmul.f32 0.1, %v3331_v41  ;;  %v3549_v27 = vmax.f32 %v3329_v35, %v3485_v45  ;;  %v3335_v63 = vadd.f32 %v3334_v54, %v7597_v12 }
 0x5c2   :  { %v3336_v7 = vpop.f32.mrf.mxu0 }
 0x5c3   :  { %v3550_v62 = vmax.f32 %v3331_v41, %v3486_v24  ;;  %v3337_v37 = vadd.f32 %v3336_v7, %v7594_v19  ;;  %v3611_v18 = vpack.c.bf16 %v3549_v27, %v3547_v38  ;;  %v3487_v50 = vmul.f32 0.1, %v3335_v63 }
 0x5c4   :  { %v3338_v8 = vpop.f32.mrf.mxu0 }
 0x5c5   :  { %v3339_v40 = vadd.f32 %v3338_v8, %v7597_v12  ;;  %v3612_v39 = vpack.c.bf16 %v3550_v62, %v3548_v1  ;;  %v3488_v43 = vmul.f32 0.1, %v3337_v37  ;;  %v3551_v53 = vmax.f32 %v3335_v63, %v3487_v50  ;;  %v6497_v62 = vld [vmem:[#allocation17 + $0x18] sm:$0xff]   ;;  %v6500_v8 = vld [vmem:[#allocation17 + $0x50] sm:$0xff]   ;;  %v6504_v50 = vld [vmem:[#allocation17 + $0x48] sm:$0xff]  }
 0x5c6   :  { %v3340_v44 = vpop.f32.mrf.mxu0 }
 0x5c7   :  { %v3489_v14 = vmul.f32 0.1, %v3339_v40  ;;  %v3341_v52 = vadd.f32 %v3340_v44, %v7594_v19  ;;  %4081 = vmatprep.mubr.bf16.mxu1 %v3612_v39  ;;  %4274 = vmatprep.mubr.bf16.mxu0 %v3612_v39  ;;  %v3552_v6 = vmax.f32 %v3337_v37, %v3488_v43  ;;  %v6499_v37 = vld [vmem:[#allocation17 + $0x98] sm:$0xff]   ;;  %v6503_v43 = vld [vmem:[#allocation17 + $0x90] sm:$0xff]  }
 0x5c8   :  { %v3344_v33 = vpop.f32.mrf.mxu0  ;;  %4082 = vmatmul.mubr.bf16.vlgmr.msra.gmra.mxu1 %v3611_v18  ;;  %4275 = vmatmul.mubr.bf16.vlgmr.msra.gmra.mxu0 %v3611_v18 }
 0x5c9   :  { %v3490_v49 = vmul.f32 0.1, %v3341_v52  ;;  %5815 = vmatpush3.bf16.msra.mxu1 %v6481_v58  ;;  %5927 = vmatpush3.bf16.msra.mxu0 %v6483_v9  ;;  %v3553_v34 = vmax.f32 %v3339_v40, %v3489_v14  ;;  %v3345_v3 = vadd.f32 %v3344_v33, %v7597_v12  ;;  %v6502_v40 = vld [vmem:[#allocation17 + $0xd0] sm:$0xff]   ;;  %v6506_v33 = vld [vmem:[#allocation17 + $0xc8] sm:$0xff]  }
 0x5ca   :  { %v3346_v2 = vpop.f32.mrf.mxu0  ;;  %5816 = vmatprep.subr.bf16.mxu1 %v6484_v48  ;;  %5928 = vmatprep.subr.bf16.mxu0 %v6486_v16  ;;  %v6501_v16 = vld [vmem:[#allocation17 + $0x10] sm:$0xff]  }
 0x5cb   :  { %v3554_v21 = vmax.f32 %v3341_v52, %v3490_v49  ;;  %v3347_v32 = vadd.f32 %v3346_v2, %v7594_v19  ;;  %v3613_v26 = vpack.c.bf16 %v3553_v34, %v3551_v53  ;;  %v3491_v60 = vmul.f32 0.1, %v3345_v3 }
 0x5cc   :  { %v3348_v30 = vpop.f32.mrf.mxu0 }
 0x5cd   :  { %v3349_v11 = vadd.f32 %v3348_v30, %v7597_v12  ;;  %v3614_v4 = vpack.c.bf16 %v3554_v21, %v3552_v6  ;;  %5817 = vmatpush3.bf16.msra.mxu1 %v6485_v28  ;;  %5929 = vmatpush3.bf16.msra.mxu0 %v6487_v10  ;;  %v3492_v5 = vmul.f32 0.1, %v3347_v32  ;;  %v3555_v54 = vmax.f32 %v3345_v3, %v3491_v60  ;;  %v6505_v21 = vld [vmem:[#allocation17 + $0x8] sm:$0xff]  }
 0x5ce   :  { %v3350_v17 = vpop.f32.mrf.mxu0  ;;  %5818 = vmatprep.subr.bf16.mxu1 %v6488_v29  ;;  %5930 = vmatprep.subr.bf16.mxu0 %v6490_v42 }
 0x5cf   :  { %v3493_v59 = vmul.f32 0.1, %v3349_v11  ;;  %v3351_v47 = vadd.f32 %v3350_v17, %v7594_v19  ;;  %4091 = vmatprep.mubr.bf16.mxu1 %v3614_v4  ;;  %4284 = vmatprep.mubr.bf16.mxu0 %v3614_v4  ;;  %v3556_v45 = vmax.f32 %v3347_v32, %v3492_v5  ;;  %v6507_v32 = vld [vmem:[#allocation17 + $0x88] sm:$0xff]  }
 0x5d0   :  { %v3354_v46 = vpop.f32.mrf.mxu0  ;;  %4092 = vmatmul.mubr.bf16.gmra.mxu1 %v3613_v26  ;;  %4285 = vmatmul.mubr.bf16.gmra.mxu0 %v3613_v26 }
 0x5d1   :  { %v3494_v0 = vmul.f32 0.1, %v3351_v47  ;;  %5819 = vmatpush3.bf16.msra.mxu1 %v6489_v15  ;;  %5931 = vmatpush3.bf16.msra.mxu0 %v6491_v61  ;;  %v3557_v13 = vmax.f32 %v3349_v11, %v3493_v59  ;;  %v3355_v24 = vadd.f32 %v3354_v46, %v7597_v12 }
 0x5d2   :  { %v3356_v35 = vpop.f32.mrf.mxu0  ;;  %5820 = vmatprep.subr.bf16.mxu1 %v6492_v20  ;;  %5932 = vmatprep.subr.bf16.mxu0 %v6494_v51 }
 0x5d3   :  { %v3558_v41 = vmax.f32 %v3351_v47, %v3494_v0  ;;  %v3357_v36 = vadd.f32 %v3356_v35, %v7594_v19  ;;  %v3615_v38 = vpack.c.bf16 %v3557_v13, %v3555_v54  ;;  %v3495_v18 = vmul.f32 0.1, %v3355_v24 }
 0x5d4   :  { %v3358_v27 = vpop.f32.mrf.mxu0 }
 0x5d5   :  { %v3359_v7 = vadd.f32 %v3358_v27, %v7597_v12  ;;  %v3616_v1 = vpack.c.bf16 %v3558_v41, %v3556_v45  ;;  %5821 = vmatpush3.bf16.msra.mxu1 %v6493_v23  ;;  %5933 = vmatpush3.bf16.msra.mxu0 %v6495_v57  ;;  %v3496_v39 = vmul.f32 0.1, %v3357_v36  ;;  %v3559_v34 = vmax.f32 %v3355_v24, %v3495_v18 }
 0x5d6   :  { %v3360_v63 = vpop.f32.mrf.mxu0  ;;  %5822 = vmatprep.subr.bf16.mxu1 %v6496_v56  ;;  %5934 = vmatprep.subr.bf16.mxu0 %v6498_v22 }
 0x5d7   :  { %v3497_v58 = vmul.f32 0.1, %v3359_v7  ;;  %v3361_v9 = vadd.f32 %v3360_v63, %v7594_v19  ;;  %4101 = vmatprep.mubr.bf16.mxu1 %v3616_v1  ;;  %4294 = vmatprep.mubr.bf16.mxu0 %v3616_v1  ;;  %v3560_v49 = vmax.f32 %v3357_v36, %v3496_v39 }
 0x5d8   :  { %v3364_v44 = vpop.f32.mrf.mxu0  ;;  %4102 = vmatmul.mubr.bf16.gmra.mxu1 %v3615_v38  ;;  %4295 = vmatmul.mubr.bf16.gmra.mxu0 %v3615_v38 }
 0x5d9   :  { %v3498_v48 = vmul.f32 0.1, %v3361_v9  ;;  %5823 = vmatpush3.bf16.msra.mxu1 %v6497_v62  ;;  %5935 = vmatpush3.bf16.msra.mxu0 %v6499_v37  ;;  %v3561_v14 = vmax.f32 %v3359_v7, %v3497_v58  ;;  %v3365_v2 = vadd.f32 %v3364_v44, %v7597_v12 }
 0x5da   :  { %v3366_v52 = vpop.f32.mrf.mxu0  ;;  %5824 = vmatprep.subr.bf16.mxu1 %v6500_v8  ;;  %5936 = vmatprep.subr.bf16.mxu0 %v6502_v40 }
 0x5db   :  { %v3562_v28 = vmax.f32 %v3361_v9, %v3498_v48  ;;  %v3367_v10 = vadd.f32 %v3366_v52, %v7594_v19  ;;  %v3617_v53 = vpack.c.bf16 %v3561_v14, %v3559_v34  ;;  %v3499_v15 = vmul.f32 0.1, %v3365_v2 }
 0x5dc   :  { %v3368_v29 = vpop.f32.mrf.mxu0 }
 0x5dd   :  { %v3369_v42 = vadd.f32 %v3368_v29, %v7597_v12  ;;  %v3618_v6 = vpack.c.bf16 %v3562_v28, %v3560_v49  ;;  %5825 = vmatpush3.bf16.msra.mxu1 %v6501_v16  ;;  %5937 = vmatpush3.bf16.msra.mxu0 %v6503_v43  ;;  %v3500_v30 = vmul.f32 0.1, %v3367_v10  ;;  %v3563_v47 = vmax.f32 %v3365_v2, %v3499_v15 }
 0x5de   :  { %v3370_v3 = vpop.f32.mrf.mxu0  ;;  %5826 = vmatprep.subr.bf16.mxu1 %v6504_v50  ;;  %5938 = vmatprep.subr.bf16.mxu0 %v6506_v33 }
 0x5df   :  { %v3501_v11 = vmul.f32 0.1, %v3369_v42  ;;  %v3371_v4 = vadd.f32 %v3370_v3, %v7594_v19  ;;  %4111 = vmatprep.mubr.bf16.mxu1 %v3618_v6  ;;  %4304 = vmatprep.mubr.bf16.mxu0 %v3618_v6  ;;  %v3564_v51 = vmax.f32 %v3367_v10, %v3500_v30 }
 0x5e0   :  { %v3374_v61 = vpop.f32.mrf.mxu0  ;;  %4112 = vmatmul.mubr.bf16.gmra.mxu1 %v3617_v53  ;;  %4305 = vmatmul.mubr.bf16.gmra.mxu0 %v3617_v53 }
 0x5e1   :  { %v3502_v26 = vmul.f32 0.1, %v3371_v4  ;;  %5827 = vmatpush3.bf16.msra.mxu1 %v6505_v21  ;;  %5939 = vmatpush3.bf16.msra.mxu0 %v6507_v32  ;;  %v3565_v17 = vmax.f32 %v3369_v42, %v3501_v11  ;;  %v3375_v60 = vadd.f32 %v3374_v61, %v7597_v12 }
 0x5e2   :  { %v3376_v20 = vpop.f32.mrf.mxu0 }
 0x5e3   :  { %v3566_v5 = vmax.f32 %v3371_v4, %v3502_v26  ;;  %v3377_v59 = vadd.f32 %v3376_v20, %v7594_v19  ;;  %v3619_v57 = vpack.c.bf16 %v3565_v17, %v3563_v47  ;;  %v3503_v45 = vmul.f32 0.1, %v3375_v60 }
 0x5e4   :  { %v3378_v46 = vpop.f32.mrf.mxu0 }
 0x5e5   :  { %v3379_v0 = vadd.f32 %v3378_v46, %v7597_v12  ;;  %v3620_v23 = vpack.c.bf16 %v3566_v5, %v3564_v51  ;;  %v3504_v35 = vmul.f32 0.1, %v3377_v59  ;;  %v3567_v62 = vmax.f32 %v3375_v60, %v3503_v45 }
 0x5e6   :  { %v3380_v13 = vpop.f32.mrf.mxu0 }
 0x5e7   :  { %v3505_v56 = vmul.f32 0.1, %v3379_v0  ;;  %v3381_v22 = vadd.f32 %v3380_v13, %v7594_v19  ;;  %4121 = vmatprep.mubr.bf16.mxu1 %v3620_v23  ;;  %4314 = vmatprep.mubr.bf16.mxu0 %v3620_v23  ;;  %v3568_v27 = vmax.f32 %v3377_v59, %v3504_v35 }
 0x5e8   :  { %v3384_v41 = vpop.f32.mrf.mxu0  ;;  %4122 = vmatmul.mubr.bf16.gmra.mxu1 %v3619_v57  ;;  %4315 = vmatmul.mubr.bf16.gmra.mxu0 %v3619_v57 }
 0x5e9   :  { %v3506_v36 = vmul.f32 0.1, %v3381_v22  ;;  %v3569_v54 = vmax.f32 %v3379_v0, %v3505_v56  ;;  %v3385_v37 = vadd.f32 %v3384_v41, %v7597_v12 }
 0x5ea   :  { %v3386_v24 = vpop.f32.mrf.mxu0 }
 0x5eb   :  { %v3570_v7 = vmax.f32 %v3381_v22, %v3506_v36  ;;  %v3387_v1 = vadd.f32 %v3386_v24, %v7594_v19  ;;  %v3621_v40 = vpack.c.bf16 %v3569_v54, %v3567_v62  ;;  %v3507_v44 = vmul.f32 0.1, %v3385_v37 }
 0x5ec   :  { %v3388_v38 = vpop.f32.mrf.mxu0 }
 0x5ed   :  { %v3389_v63 = vadd.f32 %v3388_v38, %v7597_v12  ;;  %v3622_v8 = vpack.c.bf16 %v3570_v7, %v3568_v27  ;;  %v3508_v58 = vmul.f32 0.1, %v3387_v1  ;;  %v3571_v49 = vmax.f32 %v3385_v37, %v3507_v44 }
 0x5ee   :  { %v3390_v39 = vpop.f32.mrf.mxu0 }
 0x5ef   :  { %v3509_v9 = vmul.f32 0.1, %v3389_v63  ;;  %v3391_v18 = vadd.f32 %v3390_v39, %v7594_v19  ;;  %4131 = vmatprep.mubr.bf16.mxu1 %v3622_v8  ;;  %4324 = vmatprep.mubr.bf16.mxu0 %v3622_v8  ;;  %v3572_v52 = vmax.f32 %v3387_v1, %v3508_v58 }
 0x5f0   :  { %v3394_v48 = vpop.f32.mrf.mxu0  ;;  %4132 = vmatmul.mubr.bf16.gmra.mxu1 %v3621_v40  ;;  %4325 = vmatmul.mubr.bf16.gmra.mxu0 %v3621_v40 }
 0x5f1   :  { %v3510_v16 = vmul.f32 0.1, %v3391_v18  ;;  %v3573_v43 = vmax.f32 %v3389_v63, %v3509_v9  ;;  %v3395_v28 = vadd.f32 %v3394_v48, %v7597_v12 }
 0x5f2   :  { %v3396_v14 = vpop.f32.mrf.mxu0 }
 0x5f3   :  { %v3574_v50 = vmax.f32 %v3391_v18, %v3510_v16  ;;  %v3397_v33 = vadd.f32 %v3396_v14, %v7594_v19  ;;  %v3623_v29 = vpack.c.bf16 %v3573_v43, %v3571_v49  ;;  %v3511_v53 = vmul.f32 0.1, %v3395_v28  ;;  %v6508_v49 = vld [vmem:[#allocation17 + $0x40] sm:$0xff]  }
 0x5f4   :  { %v3398_v10 = vpop.f32.mrf.mxu0  ;;  %5828 = vmatprep.subr.bf16.mxu1 %v6508_v49 }
 0x5f5   :  { %v3399_v34 = vadd.f32 %v3398_v10, %v7597_v12  ;;  %v3624_v2 = vpack.c.bf16 %v3574_v50, %v3572_v52  ;;  %v3512_v6 = vmul.f32 0.1, %v3397_v33  ;;  %v3575_v17 = vmax.f32 %v3395_v28, %v3511_v53 }
 0x5f6   :  { %v3400_v42 = vpop.f32.mrf.mxu0 }
 0x5f7   :  { %v3513_v21 = vmul.f32 0.1, %v3399_v34  ;;  %v3401_v32 = vadd.f32 %v3400_v42, %v7594_v19  ;;  %4141 = vmatprep.mubr.bf16.mxu1 %v3624_v2  ;;  %4334 = vmatprep.mubr.bf16.mxu0 %v3624_v2  ;;  %v3576_v15 = vmax.f32 %v3397_v33, %v3512_v6  ;;  %v6510_v6 = vld [vmem:[#allocation17 + $0xc0] sm:$0xff]  }
 0x5f8   :  { %v3404_v3 = vpop.f32.mrf.mxu0  ;;  %4142 = vmatmul.mubr.bf16.gmra.mxu1 %v3623_v29  ;;  %4335 = vmatmul.mubr.bf16.gmra.mxu0 %v3623_v29 }
 0x5f9   :  { %v3514_v30 = vmul.f32 0.1, %v3401_v32  ;;  %v3577_v11 = vmax.f32 %v3399_v34, %v3513_v21  ;;  %v3405_v20 = vadd.f32 %v3404_v3, %v7597_v12  ;;  %v6509_v34 = vld [vmem:[#allocation17] sm:$0xff]   ;;  %5940 = vmatprep.subr.bf16.mxu0 %v6510_v6 }
 0x5fa   :  { %v3406_v4 = vpop.f32.mrf.mxu0  ;;  %v6511_v21 = vld [vmem:[#allocation17 + $0x80] sm:$0xff]   ;;  %5829 = vmatpush3.bf16.msra.mxu1 %v6509_v34 }
 0x5fb   :  { %v3578_v61 = vmax.f32 %v3401_v32, %v3514_v30  ;;  %v3407_v26 = vadd.f32 %v3406_v4, %v7594_v19  ;;  %v3625_v47 = vpack.c.bf16 %v3577_v11, %v3575_v17  ;;  %v3515_v57 = vmul.f32 0.1, %v3405_v20  ;;  %5941 = vmatpush3.bf16.msra.mxu0 %v6511_v21 }
 0x5fc   :  { %v3408_v51 = vpop.f32.mrf.mxu0 }
 0x5fd   :  { %v3409_v5 = vadd.f32 %v3408_v51, %v7597_v12  ;;  %v3626_v59 = vpack.c.bf16 %v3578_v61, %v3576_v15  ;;  %v3516_v46 = vmul.f32 0.1, %v3407_v26  ;;  %v3579_v54 = vmax.f32 %v3405_v20, %v3515_v57 }
 0x5fe   :  { %v3410_v60 = vpop.f32.mrf.mxu0 }
 0x5ff   :  { %v3517_v0 = vmul.f32 0.1, %v3409_v5  ;;  %v3411_v23 = vadd.f32 %v3410_v60, %v7594_v19  ;;  %4151 = vmatprep.mubr.bf16.mxu1 %v3626_v59  ;;  %4344 = vmatprep.mubr.bf16.mxu0 %v3626_v59  ;;  %v3580_v45 = vmax.f32 %v3407_v26, %v3516_v46 }
 0x600   :  { %v3414_v13 = vpop.f32.mrf.mxu0  ;;  %4152 = vmatmul.mubr.bf16.gmra.mxu1 %v3625_v47  ;;  %4345 = vmatmul.mubr.bf16.gmra.mxu0 %v3625_v47 }
 0x601   :  { %v3518_v35 = vmul.f32 0.1, %v3411_v23  ;;  %v3581_v56 = vmax.f32 %v3409_v5, %v3517_v0  ;;  %v3415_v24 = vadd.f32 %v3414_v13, %v7597_v12 }
 0x602   :  { %v3416_v22 = vpop.f32.mrf.mxu0 }
 0x603   :  { %v3582_v41 = vmax.f32 %v3411_v23, %v3518_v35  ;;  %v3417_v36 = vadd.f32 %v3416_v22, %v7594_v19  ;;  %v3627_v62 = vpack.c.bf16 %v3581_v56, %v3579_v54  ;;  %v3519_v40 = vmul.f32 0.1, %v3415_v24 }
 0x604   :  { %v3418_v27 = vpop.f32.mrf.mxu0 }
 0x605   :  { %v3419_v7 = vadd.f32 %v3418_v27, %v7597_v12  ;;  %v3628_v1 = vpack.c.bf16 %v3582_v41, %v3580_v45  ;;  %v3520_v38 = vmul.f32 0.1, %v3417_v36  ;;  %v3583_v43 = vmax.f32 %v3415_v24, %v3519_v40 }
 0x606   :  { %v3420_v37 = vpop.f32.mrf.mxu0 }
 0x607   :  { %v3521_v63 = vmul.f32 0.1, %v3419_v7  ;;  %v3421_v8 = vadd.f32 %v3420_v37, %v7594_v19  ;;  %4161 = vmatprep.mubr.bf16.mxu1 %v3628_v1  ;;  %4354 = vmatprep.mubr.bf16.mxu0 %v3628_v1  ;;  %v3584_v44 = vmax.f32 %v3417_v36, %v3520_v38 }
 0x608   :  { %v3424_v39 = vpop.f32.mrf.mxu0  ;;  %4162 = vmatmul.mubr.bf16.gmra.mxu1 %v3627_v62  ;;  %4355 = vmatmul.mubr.bf16.gmra.mxu0 %v3627_v62 }
 0x609   :  { %v3522_v58 = vmul.f32 0.1, %v3421_v8  ;;  %v3585_v9 = vmax.f32 %v3419_v7, %v3521_v63  ;;  %v3425_v14 = vadd.f32 %v3424_v39, %v7597_v12 }
 0x60a   :  { %v3426_v18 = vpop.f32.mrf.mxu0 }
 0x60b   :  { %v3586_v48 = vmax.f32 %v3421_v8, %v3522_v58  ;;  %v3427_v16 = vadd.f32 %v3426_v18, %v7594_v19  ;;  %v3629_v28 = vpack.c.bf16 %v3585_v9, %v3583_v43  ;;  %v3523_v32 = vmul.f32 0.1, %v3425_v14 }
 0x60c   :  { %v3428_v52 = vpop.f32.mrf.mxu0 }
 0x60d   :  { %v3429_v50 = vadd.f32 %v3428_v52, %v7597_v12  ;;  %v3630_v33 = vpack.c.bf16 %v3586_v48, %v3584_v44  ;;  %v3524_v2 = vmul.f32 0.1, %v3427_v16  ;;  %v3587_v26 = vmax.f32 %v3425_v14, %v3523_v32 }
 0x60e   :  { %v3430_v10 = vpop.f32.mrf.mxu0 }
 0x60f   :  { %v3525_v29 = vmul.f32 0.1, %v3429_v50  ;;  %v3431_v42 = vadd.f32 %v3430_v10, %v7594_v19  ;;  %4171 = vmatprep.mubr.bf16.mxu1 %v3630_v33  ;;  %4364 = vmatprep.mubr.bf16.mxu0 %v3630_v33  ;;  %v3588_v4 = vmax.f32 %v3427_v16, %v3524_v2 }
 0x610   :  { %v3434_v53 = vpop.f32.mrf.mxu0  ;;  %4172 = vmatmul.mubr.bf16.gmra.mxu1 %v3629_v28  ;;  %4365 = vmatmul.mubr.bf16.gmra.mxu0 %v3629_v28 }
 0x611   :  { %v3526_v3 = vmul.f32 0.1, %v3431_v42  ;;  %v3589_v30 = vmax.f32 %v3429_v50, %v3525_v29  ;;  %v3435_v17 = vadd.f32 %v3434_v53, %v7597_v12 }
 0x612   :  { %v3436_v11 = vpop.f32.mrf.mxu0 }
 0x613   :  { %v3590_v15 = vmax.f32 %v3431_v42, %v3526_v3  ;;  %v3437_v61 = vadd.f32 %v3436_v11, %v7594_v19  ;;  %v3631_v59 = vpack.c.bf16 %v3589_v30, %v3587_v26  ;;  %v3527_v23 = vmul.f32 0.1, %v3435_v17 }
 0x614   :  { %v3438_v20 = vpop.f32.mrf.mxu0 }
 0x615   :  { %v3439_v51 = vadd.f32 %v3438_v20, %v7597_v12  ;;  %v3632_v5 = vpack.c.bf16 %v3590_v15, %v3588_v4  ;;  %v3528_v60 = vmul.f32 0.1, %v3437_v61  ;;  %v3591_v36 = vmax.f32 %v3435_v17, %v3527_v23 }
 0x616   :  { %v3440_v47 = vpop.f32.mrf.mxu0 }
 0x617   :  { %v3529_v46 = vmul.f32 0.1, %v3439_v51  ;;  %v3441_v0 = vadd.f32 %v3440_v47, %v7594_v19  ;;  %4181 = vmatprep.mubr.bf16.mxu1 %v3632_v5  ;;  %4374 = vmatprep.mubr.bf16.mxu0 %v3632_v5  ;;  %v3592_v22 = vmax.f32 %v3437_v61, %v3528_v60 }
 0x618   :  { %v3444_v57 = vpop.f32.mrf.mxu0  ;;  %4182 = vmatmul.mubr.bf16.gmra.mxu1 %v3631_v59  ;;  %4375 = vmatmul.mubr.bf16.gmra.mxu0 %v3631_v59 }
 0x619   :  { %v3530_v13 = vmul.f32 0.1, %v3441_v0  ;;  %v3593_v35 = vmax.f32 %v3439_v51, %v3529_v46  ;;  %v3445_v54 = vadd.f32 %v3444_v57, %v7597_v12 }
 0x61a   :  { %v3446_v56 = vpop.f32.mrf.mxu0 }
 0x61b   :  { %v3594_v45 = vmax.f32 %v3441_v0, %v3530_v13  ;;  %v3447_v41 = vadd.f32 %v3446_v56, %v7594_v19  ;;  %v3633_v1 = vpack.c.bf16 %v3593_v35, %v3591_v36  ;;  %v3531_v8 = vmul.f32 0.1, %v3445_v54 }
 0x61c   :  { %v3448_v24 = vpop.f32.mrf.mxu0 }
 0x61d   :  { %v3449_v27 = vadd.f32 %v3448_v24, %v7597_v12  ;;  %v3634_v7 = vpack.c.bf16 %v3594_v45, %v3592_v22  ;;  %v3532_v37 = vmul.f32 0.1, %v3447_v41  ;;  %v3595_v16 = vmax.f32 %v3445_v54, %v3531_v8 }
 0x61e   :  { %v3450_v62 = vpop.f32.mrf.mxu0 }
 0x61f   :  { %v3533_v38 = vmul.f32 0.1, %v3449_v27  ;;  %v3451_v63 = vadd.f32 %v3450_v62, %v7594_v19  ;;  %4191 = vmatprep.mubr.bf16.mxu1 %v3634_v7  ;;  %4384 = vmatprep.mubr.bf16.mxu0 %v3634_v7  ;;  %v3596_v18 = vmax.f32 %v3447_v41, %v3532_v37 }
 0x620   :  { %v3454_v40 = vpop.f32.mrf.mxu0  ;;  %4192 = vmatmul.mubr.bf16.gmra.mxu1 %v3633_v1  ;;  %4385 = vmatmul.mubr.bf16.gmra.mxu0 %v3633_v1 }
 0x621   :  { %v3534_v39 = vmul.f32 0.1, %v3451_v63  ;;  %v3597_v58 = vmax.f32 %v3449_v27, %v3533_v38  ;;  %v3455_v43 = vadd.f32 %v3454_v40, %v7597_v12 }
 0x622   :  { %v3456_v9 = vpop.f32.mrf.mxu0 }
 0x623   :  { %v3598_v44 = vmax.f32 %v3451_v63, %v3534_v39  ;;  %v3457_v48 = vadd.f32 %v3456_v9, %v7594_v19  ;;  %v3635_v33 = vpack.c.bf16 %v3597_v58, %v3595_v16  ;;  %v3535_v2 = vmul.f32 0.1, %v3455_v43 }
 0x624   :  { %v3458_v14 = vpop.f32.mrf.mxu0  ;;  %v7877_v58 = vsub.s32 2, %v7006_v25 }
 0x625   :  { %v3459_v52 = vadd.f32 %v3458_v14, %v7597_v12  ;;  %v3636_v50 = vpack.c.bf16 %v3598_v44, %v3596_v18  ;;  %v3536_v28 = vmul.f32 0.1, %v3457_v48  ;;  %v3599_v30 = vmax.f32 %v3455_v43, %v3535_v2 }
 0x626   :  { %v3460_v49 = vpop.f32.mrf.mxu0  ;;  %v7878_v44 = vsub.s32 3, %v7006_v25 }
 0x627   :  { %v3537_v10 = vmul.f32 0.1, %v3459_v52  ;;  %v3461_v34 = vadd.f32 %v3460_v49, %v7594_v19  ;;  %4201 = vmatprep.mubr.bf16.mxu1 %v3636_v50  ;;  %4394 = vmatprep.mubr.bf16.mxu0 %v3636_v50  ;;  %v3600_v32 = vmax.f32 %v3457_v48, %v3536_v28 }
 0x628   :  { %v3464_v29 = vpop.f32.mrf.mxu0  ;;  %4202 = vmatmul.mubr.bf16.gmra.mxu1 %v3635_v33  ;;  %4395 = vmatmul.mubr.bf16.gmra.mxu0 %v3635_v33 }
 0x629   :  { %v3538_v42 = vmul.f32 0.1, %v3461_v34  ;;  %v3601_v6 = vmax.f32 %v3459_v52, %v3537_v10  ;;  %v3465_v11 = vadd.f32 %v3464_v29, %v7597_v12 }
 0x62a   :  { %v3466_v21 = vpop.f32.mrf.mxu0 }
 0x62b   :  { %v3602_v53 = vmax.f32 %v3461_v34, %v3538_v42  ;;  %v3467_v3 = vadd.f32 %v3466_v21, %v7594_v19  ;;  %v3637_v26 = vpack.c.bf16 %v3601_v6, %v3599_v30  ;;  %v3539_v59 = vmul.f32 0.1, %v3465_v11 }
 0x62c   :  { %v3468_v4 = vpop.f32.mrf.mxu0 }
 0x62d   :  { %v3469_v15 = vadd.f32 %v3468_v4, %v7597_v12  ;;  %v3638_v61 = vpack.c.bf16 %v3602_v53, %v3600_v32  ;;  %v3540_v20 = vmul.f32 0.1, %v3467_v3  ;;  %v3603_v35 = vmax.f32 %v3465_v11, %v3539_v59 }
 0x62e   :  { %v3470_v17 = vpop.f32.mrf.mxu0 }
 0x62f   :  { %v3541_v51 = vmul.f32 0.1, %v3469_v15  ;;  %v3471_v5 = vadd.f32 %v3470_v17, %v7594_v19  ;;  %4211 = vmatprep.mubr.bf16.mxu1 %v3638_v61  ;;  %4404 = vmatprep.mubr.bf16.mxu0 %v3638_v61  ;;  %v3604_v23 = vmax.f32 %v3467_v3, %v3540_v20 }
 0x630   :  { %v3474_v47 = vpop.f32.mrf.mxu0  ;;  %4212 = vmatmul.mubr.bf16.gmra.mxu1 %v3637_v26  ;;  %4405 = vmatmul.mubr.bf16.gmra.mxu0 %v3637_v26 }
 0x631   :  { %v3542_v60 = vmul.f32 0.1, %v3471_v5  ;;  %v3605_v46 = vmax.f32 %v3469_v15, %v3541_v51  ;;  %v3475_v56 = vadd.f32 %v3474_v47, %v7597_v12 }
 0x632   :  { %v3476_v0 = vpop.f32.mrf.mxu0 }
 0x633   :  { %v3606_v57 = vmax.f32 %v3471_v5, %v3542_v60  ;;  %v3477_v13 = vadd.f32 %v3476_v0, %v7594_v19  ;;  %v3639_v36 = vpack.c.bf16 %v3605_v46, %v3603_v35  ;;  %v3543_v1 = vmul.f32 0.1, %v3475_v56 }
 0x634   :  { %v3478_v22 = vpop.f32.mrf.mxu0 }
 0x635   :  { %v3479_v45 = vadd.f32 %v3478_v22, %v7597_v12  ;;  %v3640_v41 = vpack.c.bf16 %v3606_v57, %v3604_v23  ;;  %v3544_v24 = vmul.f32 0.1, %v3477_v13  ;;  %v3607_v8 = vmax.f32 %v3475_v56, %v3543_v1 }
 0x636   :  { %v3480_v54 = vpop.f32.mrf.mxu0 }
 0x637   :  { %v3545_v27 = vmul.f32 0.1, %v3479_v45  ;;  %v3481_v7 = vadd.f32 %v3480_v54, %v7594_v19  ;;  %4221 = vmatprep.mubr.bf16.mxu1 %v3640_v41  ;;  %4414 = vmatprep.mubr.bf16.mxu0 %v3640_v41  ;;  %v3608_v38 = vmax.f32 %v3477_v13, %v3544_v24  ;;  %v3707_v19 = vld [vmem:[%s7865_s14] sm:$0xf] }
 0x638   :  { %4222 = vmatmul.mubr.bf16.gmra.mxu1 %v3639_v36  ;;  %4415 = vmatmul.mubr.bf16.gmra.mxu0 %v3639_v36  ;;  %v7667_v12 = vrot.slane %v3707_v19, %v7010_v31  ;;  %v7671_v9 = vrot.slane %v3707_v19, %v7877_v58  ;;  %v7674_v18 = vrot.slane %v3707_v19, %v7019_v55 }
 0x639   :  { %v3546_v62 = vmul.f32 0.1, %v3481_v7  ;;  %v3609_v37 = vmax.f32 %v3479_v45, %v3545_v27  ;;  %v7678_v48 = vrot.slane %v3707_v19, %v7878_v44 }
 0x63b   :  { %v3610_v63 = vmax.f32 %v3481_v7, %v3546_v62  ;;  %v3641_v39 = vpack.c.bf16 %v3609_v37, %v3607_v8 }
 0x63d   :  { %v3642_v40 = vpack.c.bf16 %v3610_v63, %v3608_v38 }
 0x63f   :  { %4231 = vmatprep.mubr.bf16.mxu1 %v3642_v40  ;;  %4424 = vmatprep.mubr.bf16.mxu0 %v3642_v40 }
 0x640   :  { %4232 = vmatmul.mubr.bf16.gmra.mxu1 %v3641_v39  ;;  %4425 = vmatmul.mubr.bf16.gmra.mxu0 %v3641_v39 }
 0x688   :  { %v4083_v16 = vpop.f32.mrf.mxu1  ;;  %v4276_v43 = vpop.f32.mrf.mxu0 }
 0x689   :  { %v4084_v14 = vadd.f32 %v4083_v16, %v7667_v12  ;;  %v4277_v52 = vadd.f32 %v4276_v43, %v7671_v9 }
 0x68a   :  { %v4085_v50 = vpop.f32.mrf.mxu1  ;;  %v4278_v31 = vpop.f32.mrf.mxu0 }
 0x68b   :  { %v4086_v33 = vadd.f32 %v4085_v50, %v7674_v18  ;;  %v4279_v49 = vadd.f32 %v4278_v31, %v7678_v48  ;;  %v4435_v55 = vmul.f32 0.1, %v4084_v14  ;;  %v4437_v34 = vmul.f32 0.1, %v4277_v52 }
 0x68c   :  { %v4087_v28 = vpop.f32.mrf.mxu1  ;;  %v4280_v10 = vpop.f32.mrf.mxu0 }
 0x68d   :  { %v4088_v25 = vadd.f32 %v4087_v28, %v7667_v12  ;;  %v4281_v2 = vadd.f32 %v4280_v10, %v7671_v9  ;;  %v4436_v6 = vmul.f32 0.1, %v4086_v33  ;;  %v4438_v21 = vmul.f32 0.1, %v4279_v49 }
 0x68e   :  { %v4089_v29 = vpop.f32.mrf.mxu1  ;;  %v4282_v42 = vpop.f32.mrf.mxu0  ;;  %v4563_v20 = vmax.f32 %v4084_v14, %v4435_v55  ;;  %v4565_v51 = vmax.f32 %v4277_v52, %v4437_v34 }
 0x68f   :  { %v4090_v32 = vadd.f32 %v4089_v29, %v7674_v18  ;;  %v4283_v53 = vadd.f32 %v4282_v42, %v7678_v48  ;;  %v4439_v3 = vmul.f32 0.1, %v4088_v25  ;;  %v4441_v30 = vmul.f32 0.1, %v4281_v2 }
 0x690   :  { %v4093_v11 = vpop.f32.mrf.mxu1  ;;  %v4286_v4 = vpop.f32.mrf.mxu0  ;;  %v4564_v46 = vmax.f32 %v4086_v33, %v4436_v6  ;;  %v4566_v0 = vmax.f32 %v4279_v49, %v4438_v21 }
 0x691   :  { %v4440_v15 = vmul.f32 0.1, %v4090_v32  ;;  %v4442_v61 = vmul.f32 0.1, %v4283_v53  ;;  %v4094_v26 = vadd.f32 %v4093_v11, %v7667_v12  ;;  %v4287_v17 = vadd.f32 %v4286_v4, %v7671_v9 }
 0x692   :  { %v4567_v5 = vmax.f32 %v4088_v25, %v4439_v3  ;;  %v4569_v59 = vmax.f32 %v4281_v2, %v4441_v30  ;;  %v4095_v47 = vpop.f32.mrf.mxu1  ;;  %v4288_v60 = vpop.f32.mrf.mxu0 }
 0x693   :  { %v4568_v23 = vmax.f32 %v4090_v32, %v4440_v15  ;;  %v4570_v57 = vmax.f32 %v4283_v53, %v4442_v61  ;;  %v4443_v13 = vmul.f32 0.1, %v4094_v26  ;;  %v4445_v35 = vmul.f32 0.1, %v4287_v17 }
 0x694   :  { %v4096_v56 = vadd.f32 %v4095_v47, %v7674_v18  ;;  %v4289_v22 = vadd.f32 %v4288_v60, %v7678_v48  ;;  %v4097_v45 = vpop.f32.mrf.mxu1  ;;  %v4290_v41 = vpop.f32.mrf.mxu0  ;;  %v4691_v36 = vpack.c.bf16 %v4567_v5, %v4563_v20  ;;  %v4693_v54 = vpack.c.bf16 %v4569_v59, %v4565_v51 }
 0x695   :  { %v4098_v24 = vadd.f32 %v4097_v45, %v7667_v12  ;;  %v4291_v27 = vadd.f32 %v4290_v41, %v7671_v9  ;;  %v4692_v38 = vpack.c.bf16 %v4568_v23, %v4564_v46  ;;  %v4694_v63 = vpack.c.bf16 %v4570_v57, %v4566_v0 }
 0x696   :  { %v4444_v7 = vmul.f32 0.1, %v4096_v56  ;;  %v4446_v1 = vmul.f32 0.1, %v4289_v22  ;;  %v4099_v62 = vpop.f32.mrf.mxu1  ;;  %v4292_v37 = vpop.f32.mrf.mxu0  ;;  %v4571_v16 = vmax.f32 %v4094_v26, %v4443_v13  ;;  %v4573_v50 = vmax.f32 %v4287_v17, %v4445_v35 }
 0x697   :  { %v4447_v8 = vmul.f32 0.1, %v4098_v24  ;;  %v4449_v40 = vmul.f32 0.1, %v4291_v27  ;;  %v4100_v39 = vadd.f32 %v4099_v62, %v7674_v18  ;;  %v4293_v19 = vadd.f32 %v4292_v37, %v7678_v48  ;;  %5050 = vmatprep.mubr.bf16.mxu1 %v4692_v38  ;;  %5211 = vmatprep.mubr.bf16.mxu0 %v4694_v63 }
 0x698   :  { %v4103_v58 = vpop.f32.mrf.mxu1  ;;  %v4296_v44 = vpop.f32.mrf.mxu0  ;;  %5051 = vmatmul.mubr.bf16.vlgmr.msra.gmra.mxu1 %v4691_v36  ;;  %5212 = vmatmul.mubr.bf16.vlgmr.msra.gmra.mxu0 %v4693_v54  ;;  %v4572_v55 = vmax.f32 %v4096_v56, %v4444_v7  ;;  %v4574_v34 = vmax.f32 %v4289_v22, %v4446_v1 }
 0x699   :  { %v4575_v43 = vmax.f32 %v4098_v24, %v4447_v8  ;;  %v4448_v14 = vmul.f32 0.1, %v4100_v39  ;;  %v4450_v52 = vmul.f32 0.1, %v4293_v19  ;;  %v4577_v31 = vmax.f32 %v4291_v27, %v4449_v40 }
 0x69a   :  { %v4104_v33 = vadd.f32 %v4103_v58, %v7667_v12  ;;  %v4297_v49 = vadd.f32 %v4296_v44, %v7671_v9  ;;  %v4105_v28 = vpop.f32.mrf.mxu1  ;;  %v4298_v10 = vpop.f32.mrf.mxu0 }
 0x69b   :  { %v4576_v25 = vmax.f32 %v4100_v39, %v4448_v14  ;;  %v4578_v2 = vmax.f32 %v4293_v19, %v4450_v52  ;;  %v4695_v29 = vpack.c.bf16 %v4575_v43, %v4571_v16  ;;  %v4106_v6 = vadd.f32 %v4105_v28, %v7674_v18 }
 0x69c   :  { %v4451_v42 = vmul.f32 0.1, %v4104_v33  ;;  %v4299_v21 = vadd.f32 %v4298_v10, %v7678_v48  ;;  %v4107_v32 = vpop.f32.mrf.mxu1  ;;  %v4300_v53 = vpop.f32.mrf.mxu0  ;;  %v4697_v15 = vpack.c.bf16 %v4577_v31, %v4573_v50  ;;  %v4453_v61 = vmul.f32 0.1, %v4297_v49 }
 0x69d   :  { %v4108_v3 = vadd.f32 %v4107_v32, %v7667_v12  ;;  %v4301_v30 = vadd.f32 %v4300_v53, %v7671_v9  ;;  %v4696_v11 = vpack.c.bf16 %v4576_v25, %v4572_v55  ;;  %v4698_v4 = vpack.c.bf16 %v4578_v2, %v4574_v34 }
 0x69e   :  { %v4452_v26 = vmul.f32 0.1, %v4106_v6  ;;  %v4454_v17 = vmul.f32 0.1, %v4299_v21  ;;  %v4109_v20 = vpop.f32.mrf.mxu1  ;;  %v4302_v51 = vpop.f32.mrf.mxu0  ;;  %v4579_v23 = vmax.f32 %v4104_v33, %v4451_v42  ;;  %v4581_v56 = vmax.f32 %v4297_v49, %v4453_v61 }
 0x69f   :  { %v4455_v5 = vmul.f32 0.1, %v4108_v3  ;;  %v4457_v59 = vmul.f32 0.1, %v4301_v30  ;;  %v4110_v47 = vadd.f32 %v4109_v20, %v7674_v18  ;;  %v4303_v60 = vadd.f32 %v4302_v51, %v7678_v48  ;;  %5058 = vmatprep.mubr.bf16.mxu1 %v4696_v11  ;;  %5219 = vmatprep.mubr.bf16.mxu0 %v4698_v4 }
 0x6a0   :  { %v4113_v46 = vpop.f32.mrf.mxu1  ;;  %v4306_v0 = vpop.f32.mrf.mxu0  ;;  %5059 = vmatmul.mubr.bf16.gmra.mxu1 %v4695_v29  ;;  %5220 = vmatmul.mubr.bf16.gmra.mxu0 %v4697_v15  ;;  %v4580_v24 = vmax.f32 %v4106_v6, %v4452_v26  ;;  %v4582_v27 = vmax.f32 %v4299_v21, %v4454_v17 }
 0x6a1   :  { %v4583_v57 = vmax.f32 %v4108_v3, %v4455_v5  ;;  %v4456_v13 = vmul.f32 0.1, %v4110_v47  ;;  %v4458_v35 = vmul.f32 0.1, %v4303_v60  ;;  %v4585_v22 = vmax.f32 %v4301_v30, %v4457_v59 }
 0x6a2   :  { %v4114_v45 = vadd.f32 %v4113_v46, %v7667_v12  ;;  %v4307_v41 = vadd.f32 %v4306_v0, %v7671_v9  ;;  %v4115_v36 = vpop.f32.mrf.mxu1  ;;  %v4308_v54 = vpop.f32.mrf.mxu0 }
 0x6a3   :  { %v4584_v7 = vmax.f32 %v4110_v47, %v4456_v13  ;;  %v4586_v1 = vmax.f32 %v4303_v60, %v4458_v35  ;;  %v4699_v62 = vpack.c.bf16 %v4583_v57, %v4579_v23  ;;  %v4116_v38 = vadd.f32 %v4115_v36, %v7674_v18 }
 0x6a4   :  { %v4459_v37 = vmul.f32 0.1, %v4114_v45  ;;  %v4309_v63 = vadd.f32 %v4308_v54, %v7678_v48  ;;  %v4117_v8 = vpop.f32.mrf.mxu1  ;;  %v4310_v40 = vpop.f32.mrf.mxu0  ;;  %v4701_v16 = vpack.c.bf16 %v4585_v22, %v4581_v56  ;;  %v4461_v43 = vmul.f32 0.1, %v4307_v41 }
 0x6a5   :  { %v4118_v39 = vadd.f32 %v4117_v8, %v7667_v12  ;;  %v4311_v19 = vadd.f32 %v4310_v40, %v7671_v9  ;;  %v4700_v58 = vpack.c.bf16 %v4584_v7, %v4580_v24  ;;  %v4702_v44 = vpack.c.bf16 %v4586_v1, %v4582_v27 }
 0x6a6   :  { %v4460_v14 = vmul.f32 0.1, %v4116_v38  ;;  %v4462_v52 = vmul.f32 0.1, %v4309_v63  ;;  %v4119_v50 = vpop.f32.mrf.mxu1  ;;  %v4312_v31 = vpop.f32.mrf.mxu0  ;;  %v4587_v25 = vmax.f32 %v4114_v45, %v4459_v37  ;;  %v4589_v6 = vmax.f32 %v4307_v41, %v4461_v43 }
 0x6a7   :  { %v4463_v33 = vmul.f32 0.1, %v4118_v39  ;;  %v4465_v49 = vmul.f32 0.1, %v4311_v19  ;;  %v4120_v28 = vadd.f32 %v4119_v50, %v7674_v18  ;;  %v4313_v10 = vadd.f32 %v4312_v31, %v7678_v48  ;;  %5066 = vmatprep.mubr.bf16.mxu1 %v4700_v58  ;;  %5227 = vmatprep.mubr.bf16.mxu0 %v4702_v44 }
 0x6a8   :  { %v4123_v55 = vpop.f32.mrf.mxu1  ;;  %v4316_v34 = vpop.f32.mrf.mxu0  ;;  %5067 = vmatmul.mubr.bf16.gmra.mxu1 %v4699_v62  ;;  %5228 = vmatmul.mubr.bf16.gmra.mxu0 %v4701_v16  ;;  %v4588_v11 = vmax.f32 %v4116_v38, %v4460_v14  ;;  %v4590_v4 = vmax.f32 %v4309_v63, %v4462_v52 }
 0x6a9   :  { %v4591_v2 = vmax.f32 %v4118_v39, %v4463_v33  ;;  %v4464_v29 = vmul.f32 0.1, %v4120_v28  ;;  %v4466_v42 = vmul.f32 0.1, %v4313_v10  ;;  %v4593_v21 = vmax.f32 %v4311_v19, %v4465_v49 }
 0x6aa   :  { %v4124_v32 = vadd.f32 %v4123_v55, %v7667_v12  ;;  %v4317_v53 = vadd.f32 %v4316_v34, %v7671_v9  ;;  %v4125_v3 = vpop.f32.mrf.mxu1  ;;  %v4318_v30 = vpop.f32.mrf.mxu0 }
 0x6ab   :  { %v4592_v15 = vmax.f32 %v4120_v28, %v4464_v29  ;;  %v4594_v61 = vmax.f32 %v4313_v10, %v4466_v42  ;;  %v4703_v26 = vpack.c.bf16 %v4591_v2, %v4587_v25  ;;  %v4126_v20 = vadd.f32 %v4125_v3, %v7674_v18 }
 0x6ac   :  { %v4467_v17 = vmul.f32 0.1, %v4124_v32  ;;  %v4319_v51 = vadd.f32 %v4318_v30, %v7678_v48  ;;  %v4127_v5 = vpop.f32.mrf.mxu1  ;;  %v4320_v59 = vpop.f32.mrf.mxu0  ;;  %v4705_v23 = vpack.c.bf16 %v4593_v21, %v4589_v6  ;;  %v4469_v57 = vmul.f32 0.1, %v4317_v53 }
 0x6ad   :  { %v4128_v47 = vadd.f32 %v4127_v5, %v7667_v12  ;;  %v4321_v60 = vadd.f32 %v4320_v59, %v7671_v9  ;;  %v4704_v46 = vpack.c.bf16 %v4592_v15, %v4588_v11  ;;  %v4706_v0 = vpack.c.bf16 %v4594_v61, %v4590_v4 }
 0x6ae   :  { %v4468_v13 = vmul.f32 0.1, %v4126_v20  ;;  %v4470_v35 = vmul.f32 0.1, %v4319_v51  ;;  %v4129_v56 = vpop.f32.mrf.mxu1  ;;  %v4322_v22 = vpop.f32.mrf.mxu0  ;;  %v4595_v7 = vmax.f32 %v4124_v32, %v4467_v17  ;;  %v4597_v38 = vmax.f32 %v4317_v53, %v4469_v57 }
 0x6af   :  { %v4471_v45 = vmul.f32 0.1, %v4128_v47  ;;  %v4473_v41 = vmul.f32 0.1, %v4321_v60  ;;  %v4130_v36 = vadd.f32 %v4129_v56, %v7674_v18  ;;  %v4323_v54 = vadd.f32 %v4322_v22, %v7678_v48  ;;  %5074 = vmatprep.mubr.bf16.mxu1 %v4704_v46  ;;  %5235 = vmatprep.mubr.bf16.mxu0 %v4706_v0 }
 0x6b0   :  { %v4133_v24 = vpop.f32.mrf.mxu1  ;;  %v4326_v27 = vpop.f32.mrf.mxu0  ;;  %5075 = vmatmul.mubr.bf16.gmra.mxu1 %v4703_v26  ;;  %5236 = vmatmul.mubr.bf16.gmra.mxu0 %v4705_v23  ;;  %v4596_v58 = vmax.f32 %v4126_v20, %v4468_v13  ;;  %v4598_v44 = vmax.f32 %v4319_v51, %v4470_v35 }
 0x6b1   :  { %v4599_v1 = vmax.f32 %v4128_v47, %v4471_v45  ;;  %v4472_v62 = vmul.f32 0.1, %v4130_v36  ;;  %v4474_v37 = vmul.f32 0.1, %v4323_v54  ;;  %v4601_v63 = vmax.f32 %v4321_v60, %v4473_v41 }
 0x6b2   :  { %v4134_v8 = vadd.f32 %v4133_v24, %v7667_v12  ;;  %v4327_v40 = vadd.f32 %v4326_v27, %v7671_v9  ;;  %v4135_v39 = vpop.f32.mrf.mxu1  ;;  %v4328_v19 = vpop.f32.mrf.mxu0 }
 0x6b3   :  { %v4600_v16 = vmax.f32 %v4130_v36, %v4472_v62  ;;  %v4602_v43 = vmax.f32 %v4323_v54, %v4474_v37  ;;  %v4707_v14 = vpack.c.bf16 %v4599_v1, %v4595_v7  ;;  %v4136_v50 = vadd.f32 %v4135_v39, %v7674_v18 }
 0x6b4   :  { %v4475_v52 = vmul.f32 0.1, %v4134_v8  ;;  %v4329_v31 = vadd.f32 %v4328_v19, %v7678_v48  ;;  %v4137_v33 = vpop.f32.mrf.mxu1  ;;  %v4330_v49 = vpop.f32.mrf.mxu0  ;;  %v4709_v25 = vpack.c.bf16 %v4601_v63, %v4597_v38  ;;  %v4477_v2 = vmul.f32 0.1, %v4327_v40 }
 0x6b5   :  { %v4138_v28 = vadd.f32 %v4137_v33, %v7667_v12  ;;  %v4331_v10 = vadd.f32 %v4330_v49, %v7671_v9  ;;  %v4708_v55 = vpack.c.bf16 %v4600_v16, %v4596_v58  ;;  %v4710_v34 = vpack.c.bf16 %v4602_v43, %v4598_v44 }
 0x6b6   :  { %v4476_v29 = vmul.f32 0.1, %v4136_v50  ;;  %v4478_v42 = vmul.f32 0.1, %v4329_v31  ;;  %v4139_v6 = vpop.f32.mrf.mxu1  ;;  %v4332_v21 = vpop.f32.mrf.mxu0  ;;  %v4603_v15 = vmax.f32 %v4134_v8, %v4475_v52  ;;  %v4605_v20 = vmax.f32 %v4327_v40, %v4477_v2 }
 0x6b7   :  { %v4479_v32 = vmul.f32 0.1, %v4138_v28  ;;  %v4481_v53 = vmul.f32 0.1, %v4331_v10  ;;  %v4140_v3 = vadd.f32 %v4139_v6, %v7674_v18  ;;  %v4333_v30 = vadd.f32 %v4332_v21, %v7678_v48  ;;  %5082 = vmatprep.mubr.bf16.mxu1 %v4708_v55  ;;  %5243 = vmatprep.mubr.bf16.mxu0 %v4710_v34 }
 0x6b8   :  { %v4143_v11 = vpop.f32.mrf.mxu1  ;;  %v4336_v4 = vpop.f32.mrf.mxu0  ;;  %5083 = vmatmul.mubr.bf16.gmra.mxu1 %v4707_v14  ;;  %5244 = vmatmul.mubr.bf16.gmra.mxu0 %v4709_v25  ;;  %v4604_v46 = vmax.f32 %v4136_v50, %v4476_v29  ;;  %v4606_v0 = vmax.f32 %v4329_v31, %v4478_v42 }
 0x6b9   :  { %v4607_v61 = vmax.f32 %v4138_v28, %v4479_v32  ;;  %v4480_v26 = vmul.f32 0.1, %v4140_v3  ;;  %v4482_v17 = vmul.f32 0.1, %v4333_v30  ;;  %v4609_v51 = vmax.f32 %v4331_v10, %v4481_v53 }
 0x6ba   :  { %v4144_v5 = vadd.f32 %v4143_v11, %v7667_v12  ;;  %v4337_v59 = vadd.f32 %v4336_v4, %v7671_v9  ;;  %v4145_v47 = vpop.f32.mrf.mxu1  ;;  %v4338_v60 = vpop.f32.mrf.mxu0 }
 0x6bb   :  { %v4608_v23 = vmax.f32 %v4140_v3, %v4480_v26  ;;  %v4610_v57 = vmax.f32 %v4333_v30, %v4482_v17  ;;  %v4711_v13 = vpack.c.bf16 %v4607_v61, %v4603_v15  ;;  %v4146_v56 = vadd.f32 %v4145_v47, %v7674_v18 }
 0x6bc   :  { %v4483_v35 = vmul.f32 0.1, %v4144_v5  ;;  %v4339_v22 = vadd.f32 %v4338_v60, %v7678_v48  ;;  %v4147_v45 = vpop.f32.mrf.mxu1  ;;  %v4340_v41 = vpop.f32.mrf.mxu0  ;;  %v4713_v7 = vpack.c.bf16 %v4609_v51, %v4605_v20  ;;  %v4485_v1 = vmul.f32 0.1, %v4337_v59 }
 0x6bd   :  { %v4148_v36 = vadd.f32 %v4147_v45, %v7667_v12  ;;  %v4341_v54 = vadd.f32 %v4340_v41, %v7671_v9  ;;  %v4712_v24 = vpack.c.bf16 %v4608_v23, %v4604_v46  ;;  %v4714_v27 = vpack.c.bf16 %v4610_v57, %v4606_v0 }
 0x6be   :  { %v4484_v62 = vmul.f32 0.1, %v4146_v56  ;;  %v4486_v37 = vmul.f32 0.1, %v4339_v22  ;;  %v4149_v38 = vpop.f32.mrf.mxu1  ;;  %v4342_v63 = vpop.f32.mrf.mxu0  ;;  %v4611_v16 = vmax.f32 %v4144_v5, %v4483_v35  ;;  %v4613_v50 = vmax.f32 %v4337_v59, %v4485_v1 }
 0x6bf   :  { %v4487_v8 = vmul.f32 0.1, %v4148_v36  ;;  %v4489_v40 = vmul.f32 0.1, %v4341_v54  ;;  %v4150_v39 = vadd.f32 %v4149_v38, %v7674_v18  ;;  %v4343_v19 = vadd.f32 %v4342_v63, %v7678_v48  ;;  %5090 = vmatprep.mubr.bf16.mxu1 %v4712_v24  ;;  %5251 = vmatprep.mubr.bf16.mxu0 %v4714_v27 }
 0x6c0   :  { %v4153_v58 = vpop.f32.mrf.mxu1  ;;  %v4346_v44 = vpop.f32.mrf.mxu0  ;;  %5091 = vmatmul.mubr.bf16.gmra.mxu1 %v4711_v13  ;;  %5252 = vmatmul.mubr.bf16.gmra.mxu0 %v4713_v7  ;;  %v4612_v55 = vmax.f32 %v4146_v56, %v4484_v62  ;;  %v4614_v34 = vmax.f32 %v4339_v22, %v4486_v37 }
 0x6c1   :  { %v4615_v43 = vmax.f32 %v4148_v36, %v4487_v8  ;;  %v4488_v14 = vmul.f32 0.1, %v4150_v39  ;;  %v4490_v52 = vmul.f32 0.1, %v4343_v19  ;;  %v4617_v31 = vmax.f32 %v4341_v54, %v4489_v40 }
 0x6c2   :  { %v4154_v33 = vadd.f32 %v4153_v58, %v7667_v12  ;;  %v4347_v49 = vadd.f32 %v4346_v44, %v7671_v9  ;;  %v4155_v28 = vpop.f32.mrf.mxu1  ;;  %v4348_v10 = vpop.f32.mrf.mxu0 }
 0x6c3   :  { %v4616_v25 = vmax.f32 %v4150_v39, %v4488_v14  ;;  %v4618_v2 = vmax.f32 %v4343_v19, %v4490_v52  ;;  %v4715_v29 = vpack.c.bf16 %v4615_v43, %v4611_v16  ;;  %v4156_v6 = vadd.f32 %v4155_v28, %v7674_v18 }
 0x6c4   :  { %v4491_v42 = vmul.f32 0.1, %v4154_v33  ;;  %v4349_v21 = vadd.f32 %v4348_v10, %v7678_v48  ;;  %v4157_v32 = vpop.f32.mrf.mxu1  ;;  %v4350_v53 = vpop.f32.mrf.mxu0  ;;  %v4717_v15 = vpack.c.bf16 %v4617_v31, %v4613_v50  ;;  %v4493_v61 = vmul.f32 0.1, %v4347_v49 }
 0x6c5   :  { %v4158_v3 = vadd.f32 %v4157_v32, %v7667_v12  ;;  %v4351_v30 = vadd.f32 %v4350_v53, %v7671_v9  ;;  %v4716_v11 = vpack.c.bf16 %v4616_v25, %v4612_v55  ;;  %v4718_v4 = vpack.c.bf16 %v4618_v2, %v4614_v34 }
 0x6c6   :  { %v4492_v26 = vmul.f32 0.1, %v4156_v6  ;;  %v4494_v17 = vmul.f32 0.1, %v4349_v21  ;;  %v4159_v20 = vpop.f32.mrf.mxu1  ;;  %v4352_v51 = vpop.f32.mrf.mxu0  ;;  %v4619_v23 = vmax.f32 %v4154_v33, %v4491_v42  ;;  %v4621_v56 = vmax.f32 %v4347_v49, %v4493_v61 }
 0x6c7   :  { %v4495_v5 = vmul.f32 0.1, %v4158_v3  ;;  %v4497_v59 = vmul.f32 0.1, %v4351_v30  ;;  %v4160_v47 = vadd.f32 %v4159_v20, %v7674_v18  ;;  %v4353_v60 = vadd.f32 %v4352_v51, %v7678_v48  ;;  %5098 = vmatprep.mubr.bf16.mxu1 %v4716_v11  ;;  %5259 = vmatprep.mubr.bf16.mxu0 %v4718_v4 }
 0x6c8   :  { %v4163_v46 = vpop.f32.mrf.mxu1  ;;  %v4356_v0 = vpop.f32.mrf.mxu0  ;;  %5099 = vmatmul.mubr.bf16.gmra.mxu1 %v4715_v29  ;;  %5260 = vmatmul.mubr.bf16.gmra.mxu0 %v4717_v15  ;;  %v4620_v24 = vmax.f32 %v4156_v6, %v4492_v26  ;;  %v4622_v27 = vmax.f32 %v4349_v21, %v4494_v17 }
 0x6c9   :  { %v4623_v57 = vmax.f32 %v4158_v3, %v4495_v5  ;;  %v4496_v13 = vmul.f32 0.1, %v4160_v47  ;;  %v4498_v35 = vmul.f32 0.1, %v4353_v60  ;;  %v4625_v22 = vmax.f32 %v4351_v30, %v4497_v59 }
 0x6ca   :  { %v4164_v45 = vadd.f32 %v4163_v46, %v7667_v12  ;;  %v4357_v41 = vadd.f32 %v4356_v0, %v7671_v9  ;;  %v4165_v36 = vpop.f32.mrf.mxu1  ;;  %v4358_v54 = vpop.f32.mrf.mxu0 }
 0x6cb   :  { %v4624_v7 = vmax.f32 %v4160_v47, %v4496_v13  ;;  %v4626_v1 = vmax.f32 %v4353_v60, %v4498_v35  ;;  %v4719_v62 = vpack.c.bf16 %v4623_v57, %v4619_v23  ;;  %v4166_v38 = vadd.f32 %v4165_v36, %v7674_v18 }
 0x6cc   :  { %v4499_v37 = vmul.f32 0.1, %v4164_v45  ;;  %v4359_v63 = vadd.f32 %v4358_v54, %v7678_v48  ;;  %v4167_v8 = vpop.f32.mrf.mxu1  ;;  %v4360_v40 = vpop.f32.mrf.mxu0  ;;  %v4721_v16 = vpack.c.bf16 %v4625_v22, %v4621_v56  ;;  %v4501_v43 = vmul.f32 0.1, %v4357_v41 }
 0x6cd   :  { %v4168_v39 = vadd.f32 %v4167_v8, %v7667_v12  ;;  %v4361_v19 = vadd.f32 %v4360_v40, %v7671_v9  ;;  %v4720_v58 = vpack.c.bf16 %v4624_v7, %v4620_v24  ;;  %v4722_v44 = vpack.c.bf16 %v4626_v1, %v4622_v27 }
 0x6ce   :  { %v4500_v14 = vmul.f32 0.1, %v4166_v38  ;;  %v4502_v52 = vmul.f32 0.1, %v4359_v63  ;;  %v4169_v50 = vpop.f32.mrf.mxu1  ;;  %v4362_v31 = vpop.f32.mrf.mxu0  ;;  %v4627_v25 = vmax.f32 %v4164_v45, %v4499_v37  ;;  %v4629_v6 = vmax.f32 %v4357_v41, %v4501_v43 }
 0x6cf   :  { %v4503_v33 = vmul.f32 0.1, %v4168_v39  ;;  %v4505_v49 = vmul.f32 0.1, %v4361_v19  ;;  %v4170_v28 = vadd.f32 %v4169_v50, %v7674_v18  ;;  %v4363_v10 = vadd.f32 %v4362_v31, %v7678_v48  ;;  %5106 = vmatprep.mubr.bf16.mxu1 %v4720_v58  ;;  %5267 = vmatprep.mubr.bf16.mxu0 %v4722_v44 }
 0x6d0   :  { %v4173_v55 = vpop.f32.mrf.mxu1  ;;  %v4366_v34 = vpop.f32.mrf.mxu0  ;;  %5107 = vmatmul.mubr.bf16.gmra.mxu1 %v4719_v62  ;;  %5268 = vmatmul.mubr.bf16.gmra.mxu0 %v4721_v16  ;;  %v4628_v11 = vmax.f32 %v4166_v38, %v4500_v14  ;;  %v4630_v4 = vmax.f32 %v4359_v63, %v4502_v52 }
 0x6d1   :  { %v4631_v2 = vmax.f32 %v4168_v39, %v4503_v33  ;;  %v4504_v29 = vmul.f32 0.1, %v4170_v28  ;;  %v4506_v42 = vmul.f32 0.1, %v4363_v10  ;;  %v4633_v21 = vmax.f32 %v4361_v19, %v4505_v49 }
 0x6d2   :  { %v4174_v32 = vadd.f32 %v4173_v55, %v7667_v12  ;;  %v4367_v53 = vadd.f32 %v4366_v34, %v7671_v9  ;;  %v4175_v3 = vpop.f32.mrf.mxu1  ;;  %v4368_v30 = vpop.f32.mrf.mxu0 }
 0x6d3   :  { %v4632_v15 = vmax.f32 %v4170_v28, %v4504_v29  ;;  %v4634_v61 = vmax.f32 %v4363_v10, %v4506_v42  ;;  %v4723_v26 = vpack.c.bf16 %v4631_v2, %v4627_v25  ;;  %v4176_v20 = vadd.f32 %v4175_v3, %v7674_v18 }
 0x6d4   :  { %v4507_v17 = vmul.f32 0.1, %v4174_v32  ;;  %v4369_v51 = vadd.f32 %v4368_v30, %v7678_v48  ;;  %v4177_v5 = vpop.f32.mrf.mxu1  ;;  %v4370_v59 = vpop.f32.mrf.mxu0  ;;  %v4725_v23 = vpack.c.bf16 %v4633_v21, %v4629_v6  ;;  %v4509_v57 = vmul.f32 0.1, %v4367_v53 }
 0x6d5   :  { %v4178_v47 = vadd.f32 %v4177_v5, %v7667_v12  ;;  %v4371_v60 = vadd.f32 %v4370_v59, %v7671_v9  ;;  %v4724_v46 = vpack.c.bf16 %v4632_v15, %v4628_v11  ;;  %v4726_v0 = vpack.c.bf16 %v4634_v61, %v4630_v4 }
 0x6d6   :  { %v4508_v13 = vmul.f32 0.1, %v4176_v20  ;;  %v4510_v35 = vmul.f32 0.1, %v4369_v51  ;;  %v4179_v56 = vpop.f32.mrf.mxu1  ;;  %v4372_v22 = vpop.f32.mrf.mxu0  ;;  %v4635_v7 = vmax.f32 %v4174_v32, %v4507_v17  ;;  %v4637_v38 = vmax.f32 %v4367_v53, %v4509_v57 }
 0x6d7   :  { %v4511_v45 = vmul.f32 0.1, %v4178_v47  ;;  %v4513_v41 = vmul.f32 0.1, %v4371_v60  ;;  %v4180_v36 = vadd.f32 %v4179_v56, %v7674_v18  ;;  %v4373_v54 = vadd.f32 %v4372_v22, %v7678_v48  ;;  %5114 = vmatprep.mubr.bf16.mxu1 %v4724_v46  ;;  %5275 = vmatprep.mubr.bf16.mxu0 %v4726_v0 }
 0x6d8   :  { %v4183_v24 = vpop.f32.mrf.mxu1  ;;  %v4376_v27 = vpop.f32.mrf.mxu0  ;;  %5115 = vmatmul.mubr.bf16.gmra.mxu1 %v4723_v26  ;;  %5276 = vmatmul.mubr.bf16.gmra.mxu0 %v4725_v23  ;;  %v4636_v58 = vmax.f32 %v4176_v20, %v4508_v13  ;;  %v4638_v44 = vmax.f32 %v4369_v51, %v4510_v35 }
 0x6d9   :  { %v4639_v1 = vmax.f32 %v4178_v47, %v4511_v45  ;;  %v4512_v62 = vmul.f32 0.1, %v4180_v36  ;;  %v4514_v37 = vmul.f32 0.1, %v4373_v54  ;;  %v4641_v63 = vmax.f32 %v4371_v60, %v4513_v41 }
 0x6da   :  { %v4184_v8 = vadd.f32 %v4183_v24, %v7667_v12  ;;  %v4377_v40 = vadd.f32 %v4376_v27, %v7671_v9  ;;  %v4185_v39 = vpop.f32.mrf.mxu1  ;;  %v4378_v19 = vpop.f32.mrf.mxu0 }
 0x6db   :  { %v4640_v16 = vmax.f32 %v4180_v36, %v4512_v62  ;;  %v4642_v43 = vmax.f32 %v4373_v54, %v4514_v37  ;;  %v4727_v14 = vpack.c.bf16 %v4639_v1, %v4635_v7  ;;  %v4186_v50 = vadd.f32 %v4185_v39, %v7674_v18 }
 0x6dc   :  { %v4515_v52 = vmul.f32 0.1, %v4184_v8  ;;  %v4379_v31 = vadd.f32 %v4378_v19, %v7678_v48  ;;  %v4187_v33 = vpop.f32.mrf.mxu1  ;;  %v4380_v49 = vpop.f32.mrf.mxu0  ;;  %v4729_v25 = vpack.c.bf16 %v4641_v63, %v4637_v38  ;;  %v4517_v2 = vmul.f32 0.1, %v4377_v40 }
 0x6dd   :  { %v4188_v28 = vadd.f32 %v4187_v33, %v7667_v12  ;;  %v4381_v10 = vadd.f32 %v4380_v49, %v7671_v9  ;;  %v4728_v55 = vpack.c.bf16 %v4640_v16, %v4636_v58  ;;  %v4730_v34 = vpack.c.bf16 %v4642_v43, %v4638_v44 }
 0x6de   :  { %v4516_v29 = vmul.f32 0.1, %v4186_v50  ;;  %v4518_v42 = vmul.f32 0.1, %v4379_v31  ;;  %v4189_v6 = vpop.f32.mrf.mxu1  ;;  %v4382_v21 = vpop.f32.mrf.mxu0  ;;  %v4643_v15 = vmax.f32 %v4184_v8, %v4515_v52  ;;  %v4645_v20 = vmax.f32 %v4377_v40, %v4517_v2 }
 0x6df   :  { %v4519_v32 = vmul.f32 0.1, %v4188_v28  ;;  %v4521_v53 = vmul.f32 0.1, %v4381_v10  ;;  %v4190_v3 = vadd.f32 %v4189_v6, %v7674_v18  ;;  %v4383_v30 = vadd.f32 %v4382_v21, %v7678_v48  ;;  %5122 = vmatprep.mubr.bf16.mxu1 %v4728_v55  ;;  %5283 = vmatprep.mubr.bf16.mxu0 %v4730_v34 }
 0x6e0   :  { %v4193_v11 = vpop.f32.mrf.mxu1  ;;  %v4386_v4 = vpop.f32.mrf.mxu0  ;;  %5123 = vmatmul.mubr.bf16.gmra.mxu1 %v4727_v14  ;;  %5284 = vmatmul.mubr.bf16.gmra.mxu0 %v4729_v25  ;;  %v4644_v46 = vmax.f32 %v4186_v50, %v4516_v29  ;;  %v4646_v0 = vmax.f32 %v4379_v31, %v4518_v42 }
 0x6e1   :  { %v4647_v61 = vmax.f32 %v4188_v28, %v4519_v32  ;;  %v4520_v26 = vmul.f32 0.1, %v4190_v3  ;;  %v4522_v17 = vmul.f32 0.1, %v4383_v30  ;;  %v4649_v51 = vmax.f32 %v4381_v10, %v4521_v53 }
 0x6e2   :  { %v4194_v5 = vadd.f32 %v4193_v11, %v7667_v12  ;;  %v4387_v59 = vadd.f32 %v4386_v4, %v7671_v9  ;;  %v4195_v47 = vpop.f32.mrf.mxu1  ;;  %v4388_v60 = vpop.f32.mrf.mxu0 }
 0x6e3   :  { %v4648_v23 = vmax.f32 %v4190_v3, %v4520_v26  ;;  %v4650_v57 = vmax.f32 %v4383_v30, %v4522_v17  ;;  %v4731_v13 = vpack.c.bf16 %v4647_v61, %v4643_v15  ;;  %v4196_v56 = vadd.f32 %v4195_v47, %v7674_v18 }
 0x6e4   :  { %v4523_v35 = vmul.f32 0.1, %v4194_v5  ;;  %v4389_v22 = vadd.f32 %v4388_v60, %v7678_v48  ;;  %v4197_v45 = vpop.f32.mrf.mxu1  ;;  %v4390_v41 = vpop.f32.mrf.mxu0  ;;  %v4733_v7 = vpack.c.bf16 %v4649_v51, %v4645_v20  ;;  %v4525_v1 = vmul.f32 0.1, %v4387_v59 }
 0x6e5   :  { %v4198_v36 = vadd.f32 %v4197_v45, %v7667_v12  ;;  %v4391_v54 = vadd.f32 %v4390_v41, %v7671_v9  ;;  %v4732_v24 = vpack.c.bf16 %v4648_v23, %v4644_v46  ;;  %v4734_v27 = vpack.c.bf16 %v4650_v57, %v4646_v0 }
 0x6e6   :  { %v4524_v62 = vmul.f32 0.1, %v4196_v56  ;;  %v4526_v37 = vmul.f32 0.1, %v4389_v22  ;;  %v4199_v38 = vpop.f32.mrf.mxu1  ;;  %v4392_v63 = vpop.f32.mrf.mxu0  ;;  %v4651_v16 = vmax.f32 %v4194_v5, %v4523_v35  ;;  %v4653_v50 = vmax.f32 %v4387_v59, %v4525_v1 }
 0x6e7   :  { %v4527_v8 = vmul.f32 0.1, %v4198_v36  ;;  %v4529_v40 = vmul.f32 0.1, %v4391_v54  ;;  %v4200_v39 = vadd.f32 %v4199_v38, %v7674_v18  ;;  %v4393_v19 = vadd.f32 %v4392_v63, %v7678_v48  ;;  %5130 = vmatprep.mubr.bf16.mxu1 %v4732_v24  ;;  %5291 = vmatprep.mubr.bf16.mxu0 %v4734_v27 }
 0x6e8   :  { %v4203_v58 = vpop.f32.mrf.mxu1  ;;  %v4396_v44 = vpop.f32.mrf.mxu0  ;;  %5131 = vmatmul.mubr.bf16.gmra.mxu1 %v4731_v13  ;;  %5292 = vmatmul.mubr.bf16.gmra.mxu0 %v4733_v7  ;;  %v4652_v55 = vmax.f32 %v4196_v56, %v4524_v62  ;;  %v4654_v34 = vmax.f32 %v4389_v22, %v4526_v37 }
 0x6e9   :  { %v4655_v43 = vmax.f32 %v4198_v36, %v4527_v8  ;;  %v4528_v14 = vmul.f32 0.1, %v4200_v39  ;;  %v4530_v52 = vmul.f32 0.1, %v4393_v19  ;;  %v4657_v31 = vmax.f32 %v4391_v54, %v4529_v40 }
 0x6ea   :  { %v4204_v33 = vadd.f32 %v4203_v58, %v7667_v12  ;;  %v4397_v49 = vadd.f32 %v4396_v44, %v7671_v9  ;;  %v4205_v28 = vpop.f32.mrf.mxu1  ;;  %v4398_v10 = vpop.f32.mrf.mxu0 }
 0x6eb   :  { %v4656_v25 = vmax.f32 %v4200_v39, %v4528_v14  ;;  %v4658_v2 = vmax.f32 %v4393_v19, %v4530_v52  ;;  %v4735_v29 = vpack.c.bf16 %v4655_v43, %v4651_v16  ;;  %v4206_v6 = vadd.f32 %v4205_v28, %v7674_v18 }
 0x6ec   :  { %v4531_v42 = vmul.f32 0.1, %v4204_v33  ;;  %v4399_v21 = vadd.f32 %v4398_v10, %v7678_v48  ;;  %v4207_v32 = vpop.f32.mrf.mxu1  ;;  %v4400_v53 = vpop.f32.mrf.mxu0  ;;  %v4737_v15 = vpack.c.bf16 %v4657_v31, %v4653_v50  ;;  %v4533_v61 = vmul.f32 0.1, %v4397_v49 }
 0x6ed   :  { %v4208_v3 = vadd.f32 %v4207_v32, %v7667_v12  ;;  %v4401_v30 = vadd.f32 %v4400_v53, %v7671_v9  ;;  %v4736_v11 = vpack.c.bf16 %v4656_v25, %v4652_v55  ;;  %v4738_v4 = vpack.c.bf16 %v4658_v2, %v4654_v34 }
 0x6ee   :  { %v4532_v26 = vmul.f32 0.1, %v4206_v6  ;;  %v4534_v17 = vmul.f32 0.1, %v4399_v21  ;;  %v4209_v20 = vpop.f32.mrf.mxu1  ;;  %v4402_v51 = vpop.f32.mrf.mxu0  ;;  %v4659_v23 = vmax.f32 %v4204_v33, %v4531_v42  ;;  %v4661_v56 = vmax.f32 %v4397_v49, %v4533_v61 }
 0x6ef   :  { %v4535_v5 = vmul.f32 0.1, %v4208_v3  ;;  %v4537_v59 = vmul.f32 0.1, %v4401_v30  ;;  %v4210_v47 = vadd.f32 %v4209_v20, %v7674_v18  ;;  %v4403_v60 = vadd.f32 %v4402_v51, %v7678_v48  ;;  %5138 = vmatprep.mubr.bf16.mxu1 %v4736_v11  ;;  %5299 = vmatprep.mubr.bf16.mxu0 %v4738_v4 }
 0x6f0   :  { %v4213_v46 = vpop.f32.mrf.mxu1  ;;  %v4406_v0 = vpop.f32.mrf.mxu0  ;;  %5139 = vmatmul.mubr.bf16.gmra.mxu1 %v4735_v29  ;;  %5300 = vmatmul.mubr.bf16.gmra.mxu0 %v4737_v15  ;;  %v4660_v24 = vmax.f32 %v4206_v6, %v4532_v26  ;;  %v4662_v27 = vmax.f32 %v4399_v21, %v4534_v17 }
 0x6f1   :  { %v4663_v57 = vmax.f32 %v4208_v3, %v4535_v5  ;;  %v4536_v13 = vmul.f32 0.1, %v4210_v47  ;;  %v4538_v35 = vmul.f32 0.1, %v4403_v60  ;;  %v4665_v22 = vmax.f32 %v4401_v30, %v4537_v59 }
 0x6f2   :  { %v4214_v45 = vadd.f32 %v4213_v46, %v7667_v12  ;;  %v4407_v41 = vadd.f32 %v4406_v0, %v7671_v9  ;;  %v4215_v36 = vpop.f32.mrf.mxu1  ;;  %v4408_v54 = vpop.f32.mrf.mxu0 }
 0x6f3   :  { %v4664_v7 = vmax.f32 %v4210_v47, %v4536_v13  ;;  %v4666_v1 = vmax.f32 %v4403_v60, %v4538_v35  ;;  %v4739_v62 = vpack.c.bf16 %v4663_v57, %v4659_v23  ;;  %v4216_v38 = vadd.f32 %v4215_v36, %v7674_v18 }
 0x6f4   :  { %v4539_v37 = vmul.f32 0.1, %v4214_v45  ;;  %v4409_v63 = vadd.f32 %v4408_v54, %v7678_v48  ;;  %v4217_v8 = vpop.f32.mrf.mxu1  ;;  %v4410_v40 = vpop.f32.mrf.mxu0  ;;  %v4741_v16 = vpack.c.bf16 %v4665_v22, %v4661_v56  ;;  %v4541_v43 = vmul.f32 0.1, %v4407_v41 }
 0x6f5   :  { %v4218_v39 = vadd.f32 %v4217_v8, %v7667_v12  ;;  %v4411_v19 = vadd.f32 %v4410_v40, %v7671_v9  ;;  %v4740_v58 = vpack.c.bf16 %v4664_v7, %v4660_v24  ;;  %v4742_v44 = vpack.c.bf16 %v4666_v1, %v4662_v27 }
 0x6f6   :  { %v4540_v14 = vmul.f32 0.1, %v4216_v38  ;;  %v4542_v52 = vmul.f32 0.1, %v4409_v63  ;;  %v4219_v50 = vpop.f32.mrf.mxu1  ;;  %v4412_v31 = vpop.f32.mrf.mxu0  ;;  %v4667_v25 = vmax.f32 %v4214_v45, %v4539_v37  ;;  %v4669_v6 = vmax.f32 %v4407_v41, %v4541_v43 }
 0x6f7   :  { %v4543_v33 = vmul.f32 0.1, %v4218_v39  ;;  %v4545_v49 = vmul.f32 0.1, %v4411_v19  ;;  %v4220_v28 = vadd.f32 %v4219_v50, %v7674_v18  ;;  %v4413_v10 = vadd.f32 %v4412_v31, %v7678_v48  ;;  %5146 = vmatprep.mubr.bf16.mxu1 %v4740_v58  ;;  %5307 = vmatprep.mubr.bf16.mxu0 %v4742_v44 }
 0x6f8   :  { %v4223_v55 = vpop.f32.mrf.mxu1  ;;  %v4416_v34 = vpop.f32.mrf.mxu0  ;;  %5147 = vmatmul.mubr.bf16.gmra.mxu1 %v4739_v62  ;;  %5308 = vmatmul.mubr.bf16.gmra.mxu0 %v4741_v16  ;;  %v4668_v11 = vmax.f32 %v4216_v38, %v4540_v14  ;;  %v4670_v4 = vmax.f32 %v4409_v63, %v4542_v52 }
 0x6f9   :  { %v4671_v2 = vmax.f32 %v4218_v39, %v4543_v33  ;;  %v4544_v29 = vmul.f32 0.1, %v4220_v28  ;;  %v4546_v42 = vmul.f32 0.1, %v4413_v10  ;;  %v4673_v21 = vmax.f32 %v4411_v19, %v4545_v49 }
 0x6fa   :  { %v4224_v32 = vadd.f32 %v4223_v55, %v7667_v12  ;;  %v4417_v53 = vadd.f32 %v4416_v34, %v7671_v9  ;;  %v4225_v3 = vpop.f32.mrf.mxu1  ;;  %v4418_v30 = vpop.f32.mrf.mxu0 }
 0x6fb   :  { %v4672_v15 = vmax.f32 %v4220_v28, %v4544_v29  ;;  %v4674_v61 = vmax.f32 %v4413_v10, %v4546_v42  ;;  %v4743_v26 = vpack.c.bf16 %v4671_v2, %v4667_v25  ;;  %v4226_v20 = vadd.f32 %v4225_v3, %v7674_v18 }
 0x6fc   :  { %v4547_v17 = vmul.f32 0.1, %v4224_v32  ;;  %v4419_v51 = vadd.f32 %v4418_v30, %v7678_v48  ;;  %v4227_v5 = vpop.f32.mrf.mxu1  ;;  %v4420_v59 = vpop.f32.mrf.mxu0  ;;  %v4745_v23 = vpack.c.bf16 %v4673_v21, %v4669_v6  ;;  %v4549_v57 = vmul.f32 0.1, %v4417_v53 }
 0x6fd   :  { %v4228_v47 = vadd.f32 %v4227_v5, %v7667_v12  ;;  %v4421_v60 = vadd.f32 %v4420_v59, %v7671_v9  ;;  %v4744_v46 = vpack.c.bf16 %v4672_v15, %v4668_v11  ;;  %v4746_v0 = vpack.c.bf16 %v4674_v61, %v4670_v4 }
 0x6fe   :  { %v4548_v13 = vmul.f32 0.1, %v4226_v20  ;;  %v4550_v35 = vmul.f32 0.1, %v4419_v51  ;;  %v4229_v56 = vpop.f32.mrf.mxu1  ;;  %v4422_v22 = vpop.f32.mrf.mxu0  ;;  %v4675_v62 = vmax.f32 %v4224_v32, %v4547_v17  ;;  %v4677_v37 = vmax.f32 %v4417_v53, %v4549_v57 }
 0x6ff   :  { %v4551_v45 = vmul.f32 0.1, %v4228_v47  ;;  %v4553_v41 = vmul.f32 0.1, %v4421_v60  ;;  %v4230_v36 = vadd.f32 %v4229_v56, %v7674_v18  ;;  %v4423_v54 = vadd.f32 %v4422_v22, %v7678_v48  ;;  %5154 = vmatprep.mubr.bf16.mxu1 %v4744_v46  ;;  %5315 = vmatprep.mubr.bf16.mxu0 %v4746_v0  ;;  %v7811_v46 = vld [vmem:[%s7867_s16] ss:$0 sm:$0xff] }
 0x700   :  { %v4233_v24 = vpop.f32.mrf.mxu1  ;;  %v4426_v27 = vpop.f32.mrf.mxu0  ;;  %5155 = vmatmul.mubr.bf16.gmra.mxu1 %v4743_v26  ;;  %5316 = vmatmul.mubr.bf16.gmra.mxu0 %v4745_v23  ;;  %v4676_v39 = vmax.f32 %v4226_v20, %v4548_v13  ;;  %v4678_v19 = vmax.f32 %v4419_v51, %v4550_v35  ;;  %s6763_s16 = smov [#allocation19]  }
 0x701   :  { %v4552_v7 = vmul.f32 0.1, %v4230_v36  ;;  %v4554_v1 = vmul.f32 0.1, %v4423_v54  ;;  %v4679_v38 = vmax.f32 %v4228_v47, %v4551_v45  ;;  %v4681_v63 = vmax.f32 %v4421_v60, %v4553_v41  ;;  %s5377_s27 = sshll.u32 %s6763_s16, 4  ;;  %s5378_s27 = int_to_ptr.vmem [resolvable:$true] %s5377_s27 }
 0x702   :  { %v4235_v8 = vpop.f32.mrf.mxu1  ;;  %v4428_v40 = vpop.f32.mrf.mxu0  ;;  %v4234_v16 = vadd.f32 %v4233_v24, %v7667_v12  ;;  %v4427_v43 = vadd.f32 %v4426_v27, %v7671_v9  ;;  %s6712_s1 = scalar_lea.vmem %s5378_s27, 4096  ;;  %p6717_p9 = scmp.lt.s32.totalorder %s5378_s27, %s5378_s27 }
 0x703   :  { %v4680_v58 = vmax.f32 %v4230_v36, %v4552_v7  ;;  %v4682_v44 = vmax.f32 %v4423_v54, %v4554_v1  ;;  %v4236_v14 = vadd.f32 %v4235_v8, %v7674_v18  ;;  %v4429_v52 = vadd.f32 %v4428_v40, %v7678_v48  ;;  %p6713_p8 = scmp.ne.s32.totalorder %s5378_s27, %s6712_s1  ;;  %p6718_p10 = scmp.lt.s32.totalorder %s6712_s1, %s6712_s1 }
 0x704   :  { %v4237_v50 = vpop.f32.mrf.mxu1  ;;  %v4430_v31 = vpop.f32.mrf.mxu0  ;;  %v4747_v55 = vpack.c.bf16 %v4679_v38, %v4675_v62  ;;  %v4749_v34 = vpack.c.bf16 %v4681_v63, %v4677_v37  ;;  %v4555_v3 = vmul.f32 0.1, %v4234_v16 }
 0x705   :  { %v4238_v33 = vadd.f32 %v4237_v50, %v7667_v12  ;;  %v4431_v49 = vadd.f32 %v4430_v31, %v7671_v9  ;;  %v4748_v28 = vpack.c.bf16 %v4680_v58, %v4676_v39  ;;  %v4750_v10 = vpack.c.bf16 %v4682_v44, %v4678_v19  ;;  %p6719_p11 = por %p6718_p10, %p6717_p9 }
 0x706   :  { %v4556_v25 = vmul.f32 0.1, %v4236_v14  ;;  %v4558_v2 = vmul.f32 0.1, %v4429_v52  ;;  %v4239_v29 = vpop.f32.mrf.mxu1  ;;  %v4432_v42 = vpop.f32.mrf.mxu0  ;;  %v4557_v12 = vmul.f32 0.1, %v4427_v43  ;;  %v4683_v20 = vmax.f32 %v4234_v16, %v4555_v3 }
 0x707   :  { %v4559_v6 = vmul.f32 0.1, %v4238_v33  ;;  %v4561_v21 = vmul.f32 0.1, %v4431_v49  ;;  %v4240_v32 = vadd.f32 %v4239_v29, %v7674_v18  ;;  %v4433_v53 = vadd.f32 %v4432_v42, %v7678_v48  ;;  %5162 = vmatprep.mubr.bf16.mxu1 %v4748_v28  ;;  %5323 = vmatprep.mubr.bf16.mxu0 %v4750_v10  ;;  %p6720_p12 = pnand %p6719_p11, %p6713_p8 }
 0x708   :  { %5163 = vmatmul.mubr.bf16.gmra.mxu1 %v4747_v55  ;;  %5324 = vmatmul.mubr.bf16.gmra.mxu0 %v4749_v34  ;;  %v4684_v11 = vmax.f32 %v4236_v14, %v4556_v25  ;;  %v4686_v4 = vmax.f32 %v4429_v52, %v4558_v2  ;;  %v4685_v51 = vmax.f32 %v4427_v43, %v4557_v12 }
 0x709   :  { %v4560_v30 = vmul.f32 0.1, %v4240_v32  ;;  %v4562_v9 = vmul.f32 0.1, %v4433_v53  ;;  %v4687_v15 = vmax.f32 %v4238_v33, %v4559_v6  ;;  %v4689_v61 = vmax.f32 %v4431_v49, %v4561_v21 }
 0x70b   :  { %v4688_v26 = vmax.f32 %v4240_v32, %v4560_v30  ;;  %v4690_v17 = vmax.f32 %v4433_v53, %v4562_v9  ;;  %v4751_v59 = vpack.c.bf16 %v4687_v15, %v4683_v20  ;;  %v4753_v48 = vpack.c.bf16 %v4689_v61, %v4685_v51 }
 0x70d   :  { %v4752_v5 = vpack.c.bf16 %v4688_v26, %v4684_v11  ;;  %v4754_v18 = vpack.c.bf16 %v4690_v17, %v4686_v4 }
 0x70f   :  { %5170 = vmatprep.mubr.bf16.mxu1 %v4752_v5  ;;  %5331 = vmatprep.mubr.bf16.mxu0 %v4754_v18 }
 0x710   :  { %5171 = vmatmul.mubr.bf16.gmra.mxu1 %v4751_v59  ;;  %5332 = vmatmul.mubr.bf16.gmra.mxu0 %v4753_v48 }
 0x758   :  { %v5830_v47 = vpop.f32.mrf.mxu1  ;;  %v5942_v60 = vpop.f32.mrf.mxu0 }
 0x75a   :  { %v5831_v0 = vpop.f32.mrf.mxu1  ;;  %v5943_v23 = vpop.f32.mrf.mxu0 }
 0x75b   :  { %v5832_v57 = vadd.f32 %v5831_v0, %v5830_v47  ;;  %v5944_v22 = vadd.f32 %v5943_v23, %v5942_v60 }
 0x75c   :  { %v5833_v13 = vpop.f32.mrf.mxu1  ;;  %v5945_v35 = vpop.f32.mrf.mxu0 }
 0x75d   :  { %v5053_v56 = vadd.f32 %v5832_v57, %v7811_v46 }
 0x75e   :  { %v5834_v45 = vpop.f32.mrf.mxu1  ;;  %v5946_v41 = vpop.f32.mrf.mxu0 }
 0x75f   :  { %v5214_v36 = vadd.f32 %v5944_v22, %v5053_v56  ;;  %v5835_v54 = vadd.f32 %v5834_v45, %v5833_v13  ;;  %v5947_v1 = vadd.f32 %v5946_v41, %v5945_v35 }
 0x760   :  { %v5836_v24 = vpop.f32.mrf.mxu1  ;;  %v5948_v27 = vpop.f32.mrf.mxu0 }
 0x761   :  { %5340 = vst [vmem:[#allocation19] sm:$0xff] %v5214_v36  ;;  %v5056_v7 = vadd.f32 %v5835_v54, %v7811_v46 }
 0x762   :  { %v5837_v62 = vpop.f32.mrf.mxu1  ;;  %v5949_v37 = vpop.f32.mrf.mxu0 }
 0x763   :  { %v5217_v38 = vadd.f32 %v5947_v1, %v5056_v7  ;;  %v5838_v63 = vadd.f32 %v5837_v62, %v5836_v24  ;;  %v5950_v19 = vadd.f32 %v5949_v37, %v5948_v27 }
 0x764   :  { %v5839_v8 = vpop.f32.mrf.mxu1  ;;  %v5951_v40 = vpop.f32.mrf.mxu0 }
 0x765   :  { %5341 = vst [vmem:[#allocation19 + $0x8] sm:$0xff] %v5217_v38  ;;  %v5061_v39 = vadd.f32 %v5838_v63, %v7811_v46 }
 0x766   :  { %v5840_v58 = vpop.f32.mrf.mxu1  ;;  %v5952_v44 = vpop.f32.mrf.mxu0 }
 0x767   :  { %v5222_v16 = vadd.f32 %v5950_v19, %v5061_v39  ;;  %v5841_v43 = vadd.f32 %v5840_v58, %v5839_v8  ;;  %v5953_v31 = vadd.f32 %v5952_v44, %v5951_v40 }
 0x768   :  { %v5842_v14 = vpop.f32.mrf.mxu1  ;;  %v5954_v52 = vpop.f32.mrf.mxu0 }
 0x769   :  { %5342 = vst [vmem:[#allocation19 + $0x10] sm:$0xff] %v5222_v16  ;;  %v5064_v50 = vadd.f32 %v5841_v43, %v7811_v46 }
 0x76a   :  { %v5843_v33 = vpop.f32.mrf.mxu1  ;;  %v5955_v49 = vpop.f32.mrf.mxu0 }
 0x76b   :  { %v5225_v28 = vadd.f32 %v5953_v31, %v5064_v50  ;;  %v5844_v10 = vadd.f32 %v5843_v33, %v5842_v14  ;;  %v5956_v2 = vadd.f32 %v5955_v49, %v5954_v52 }
 0x76c   :  { %v5845_v55 = vpop.f32.mrf.mxu1  ;;  %v5957_v34 = vpop.f32.mrf.mxu0 }
 0x76d   :  { %5343 = vst [vmem:[#allocation19 + $0x18] sm:$0xff] %v5225_v28  ;;  %v5069_v25 = vadd.f32 %v5844_v10, %v7811_v46 }
 0x76e   :  { %v5846_v29 = vpop.f32.mrf.mxu1  ;;  %v5958_v42 = vpop.f32.mrf.mxu0 }
 0x76f   :  { %v5230_v6 = vadd.f32 %v5956_v2, %v5069_v25  ;;  %v5847_v21 = vadd.f32 %v5846_v29, %v5845_v55  ;;  %v5959_v12 = vadd.f32 %v5958_v42, %v5957_v34 }
 0x770   :  { %v5848_v32 = vpop.f32.mrf.mxu1  ;;  %v5960_v53 = vpop.f32.mrf.mxu0 }
 0x771   :  { %5344 = vst [vmem:[#allocation19 + $0x20] sm:$0xff] %v5230_v6  ;;  %v5072_v3 = vadd.f32 %v5847_v21, %v7811_v46 }
 0x772   :  { %v5849_v30 = vpop.f32.mrf.mxu1  ;;  %v5961_v9 = vpop.f32.mrf.mxu0 }
 0x773   :  { %v5233_v11 = vadd.f32 %v5959_v12, %v5072_v3  ;;  %v5850_v4 = vadd.f32 %v5849_v30, %v5848_v32  ;;  %v5962_v17 = vadd.f32 %v5961_v9, %v5960_v53 }
 0x774   :  { %v5851_v15 = vpop.f32.mrf.mxu1  ;;  %v5963_v61 = vpop.f32.mrf.mxu0 }
 0x775   :  { %5345 = vst [vmem:[#allocation19 + $0x28] sm:$0xff] %v5233_v11  ;;  %v5077_v26 = vadd.f32 %v5850_v4, %v7811_v46 }
 0x776   :  { %v5852_v20 = vpop.f32.mrf.mxu1  ;;  %v5964_v51 = vpop.f32.mrf.mxu0 }
 0x777   :  { %v5238_v5 = vadd.f32 %v5962_v17, %v5077_v26  ;;  %v5853_v18 = vadd.f32 %v5852_v20, %v5851_v15  ;;  %v5965_v60 = vadd.f32 %v5964_v51, %v5963_v61 }
 0x778   :  { %v5854_v59 = vpop.f32.mrf.mxu1  ;;  %v5966_v48 = vpop.f32.mrf.mxu0 }
 0x779   :  { %5346 = vst [vmem:[#allocation19 + $0x30] sm:$0xff] %v5238_v5  ;;  %v5080_v47 = vadd.f32 %v5853_v18, %v7811_v46 }
 0x77a   :  { %v5855_v0 = vpop.f32.mrf.mxu1  ;;  %v5967_v23 = vpop.f32.mrf.mxu0 }
 0x77b   :  { %v5241_v57 = vadd.f32 %v5965_v60, %v5080_v47  ;;  %v5856_v13 = vadd.f32 %v5855_v0, %v5854_v59  ;;  %v5968_v45 = vadd.f32 %v5967_v23, %v5966_v48 }
 0x77c   :  { %v5857_v35 = vpop.f32.mrf.mxu1  ;;  %v5969_v56 = vpop.f32.mrf.mxu0 }
 0x77d   :  { %5347 = vst [vmem:[#allocation19 + $0x38] sm:$0xff] %v5241_v57  ;;  %v5085_v22 = vadd.f32 %v5856_v13, %v7811_v46 }
 0x77e   :  { %v5858_v41 = vpop.f32.mrf.mxu1  ;;  %v5970_v36 = vpop.f32.mrf.mxu0 }
 0x77f   :  { %v5246_v54 = vadd.f32 %v5968_v45, %v5085_v22  ;;  %v5859_v24 = vadd.f32 %v5858_v41, %v5857_v35  ;;  %v5971_v62 = vadd.f32 %v5970_v36, %v5969_v56 }
 0x780   :  { %v5860_v27 = vpop.f32.mrf.mxu1  ;;  %v5972_v7 = vpop.f32.mrf.mxu0 }
 0x781   :  { %5348 = vst [vmem:[#allocation19 + $0x40] sm:$0xff] %v5246_v54  ;;  %v5088_v1 = vadd.f32 %v5859_v24, %v7811_v46 }
 0x782   :  { %v5861_v37 = vpop.f32.mrf.mxu1  ;;  %v5973_v38 = vpop.f32.mrf.mxu0 }
 0x783   :  { %v5249_v63 = vadd.f32 %v5971_v62, %v5088_v1  ;;  %v5862_v8 = vadd.f32 %v5861_v37, %v5860_v27  ;;  %v5974_v58 = vadd.f32 %v5973_v38, %v5972_v7 }
 0x784   :  { %v5863_v40 = vpop.f32.mrf.mxu1  ;;  %v5975_v39 = vpop.f32.mrf.mxu0 }
 0x785   :  { %5349 = vst [vmem:[#allocation19 + $0x48] sm:$0xff] %v5249_v63  ;;  %v5093_v19 = vadd.f32 %v5862_v8, %v7811_v46 }
 0x786   :  { %v5864_v44 = vpop.f32.mrf.mxu1  ;;  %v5976_v16 = vpop.f32.mrf.mxu0 }
 0x787   :  { %v5254_v43 = vadd.f32 %v5974_v58, %v5093_v19  ;;  %v5865_v14 = vadd.f32 %v5864_v44, %v5863_v40  ;;  %v5977_v33 = vadd.f32 %v5976_v16, %v5975_v39 }
 0x788   :  { %v5866_v52 = vpop.f32.mrf.mxu1  ;;  %v5978_v50 = vpop.f32.mrf.mxu0 }
 0x789   :  { %5350 = vst [vmem:[#allocation19 + $0x50] sm:$0xff] %v5254_v43  ;;  %v5096_v31 = vadd.f32 %v5865_v14, %v7811_v46 }
 0x78a   :  { %v5867_v49 = vpop.f32.mrf.mxu1  ;;  %v5979_v28 = vpop.f32.mrf.mxu0 }
 0x78b   :  { %v5257_v10 = vadd.f32 %v5977_v33, %v5096_v31  ;;  %v5868_v55 = vadd.f32 %v5867_v49, %v5866_v52  ;;  %v5980_v29 = vadd.f32 %v5979_v28, %v5978_v50 }
 0x78c   :  { %v5869_v34 = vpop.f32.mrf.mxu1  ;;  %v5981_v25 = vpop.f32.mrf.mxu0 }
 0x78d   :  { %5351 = vst [vmem:[#allocation19 + $0x58] sm:$0xff] %v5257_v10  ;;  %v5101_v2 = vadd.f32 %v5868_v55, %v7811_v46 }
 0x78e   :  { %v5870_v42 = vpop.f32.mrf.mxu1  ;;  %v5982_v6 = vpop.f32.mrf.mxu0 }
 0x78f   :  { %v5262_v21 = vadd.f32 %v5980_v29, %v5101_v2  ;;  %v5871_v32 = vadd.f32 %v5870_v42, %v5869_v34  ;;  %v5983_v30 = vadd.f32 %v5982_v6, %v5981_v25 }
 0x790   :  { %v5872_v53 = vpop.f32.mrf.mxu1  ;;  %v5984_v3 = vpop.f32.mrf.mxu0 }
 0x791   :  { %5352 = vst [vmem:[#allocation19 + $0x60] sm:$0xff] %v5262_v21  ;;  %v5104_v12 = vadd.f32 %v5871_v32, %v7811_v46 }
 0x792   :  { %v5873_v9 = vpop.f32.mrf.mxu1  ;;  %v5985_v11 = vpop.f32.mrf.mxu0 }
 0x793   :  { %v5265_v4 = vadd.f32 %v5983_v30, %v5104_v12  ;;  %v5874_v15 = vadd.f32 %v5873_v9, %v5872_v53  ;;  %v5986_v20 = vadd.f32 %v5985_v11, %v5984_v3 }
 0x794   :  { %v5875_v61 = vpop.f32.mrf.mxu1  ;;  %v5987_v26 = vpop.f32.mrf.mxu0 }
 0x795   :  { %5353 = vst [vmem:[#allocation19 + $0x68] sm:$0xff] %v5265_v4  ;;  %v5109_v17 = vadd.f32 %v5874_v15, %v7811_v46 }
 0x796   :  { %v5876_v51 = vpop.f32.mrf.mxu1  ;;  %v5988_v5 = vpop.f32.mrf.mxu0 }
 0x797   :  { %v5270_v18 = vadd.f32 %v5986_v20, %v5109_v17  ;;  %v5877_v59 = vadd.f32 %v5876_v51, %v5875_v61  ;;  %v5989_v0 = vadd.f32 %v5988_v5, %v5987_v26 }
 0x798   :  { %v5878_v48 = vpop.f32.mrf.mxu1  ;;  %v5990_v47 = vpop.f32.mrf.mxu0 }
 0x799   :  { %5354 = vst [vmem:[#allocation19 + $0x70] sm:$0xff] %v5270_v18  ;;  %v5112_v60 = vadd.f32 %v5877_v59, %v7811_v46 }
 0x79a   :  { %v5879_v23 = vpop.f32.mrf.mxu1  ;;  %v5991_v57 = vpop.f32.mrf.mxu0 }
 0x79b   :  { %v5273_v13 = vadd.f32 %v5989_v0, %v5112_v60  ;;  %v5880_v35 = vadd.f32 %v5879_v23, %v5878_v48  ;;  %v5992_v41 = vadd.f32 %v5991_v57, %v5990_v47 }
 0x79c   :  { %v5881_v56 = vpop.f32.mrf.mxu1  ;;  %v5993_v22 = vpop.f32.mrf.mxu0 }
 0x79d   :  { %5355 = vst [vmem:[#allocation19 + $0x78] sm:$0xff] %v5273_v13  ;;  %v5117_v45 = vadd.f32 %v5880_v35, %v7811_v46 }
 0x79e   :  { %v5882_v36 = vpop.f32.mrf.mxu1  ;;  %v5994_v54 = vpop.f32.mrf.mxu0 }
 0x79f   :  { %v5278_v24 = vadd.f32 %v5992_v41, %v5117_v45  ;;  %v5883_v27 = vadd.f32 %v5882_v36, %v5881_v56  ;;  %v5995_v37 = vadd.f32 %v5994_v54, %v5993_v22 }
 0x7a0   :  { %v5884_v7 = vpop.f32.mrf.mxu1  ;;  %v5996_v1 = vpop.f32.mrf.mxu0 }
 0x7a1   :  { %5356 = vst [vmem:[#allocation19 + $0x80] sm:$0xff] %v5278_v24  ;;  %v5120_v62 = vadd.f32 %v5883_v27, %v7811_v46 }
 0x7a2   :  { %v5885_v38 = vpop.f32.mrf.mxu1  ;;  %v5997_v63 = vpop.f32.mrf.mxu0 }
 0x7a3   :  { %v5281_v8 = vadd.f32 %v5995_v37, %v5120_v62  ;;  %v5886_v40 = vadd.f32 %v5885_v38, %v5884_v7  ;;  %v5998_v44 = vadd.f32 %v5997_v63, %v5996_v1 }
 0x7a4   :  { %v5887_v39 = vpop.f32.mrf.mxu1  ;;  %v5999_v19 = vpop.f32.mrf.mxu0 }
 0x7a5   :  { %5357 = vst [vmem:[#allocation19 + $0x88] sm:$0xff] %v5281_v8  ;;  %v5125_v58 = vadd.f32 %v5886_v40, %v7811_v46 }
 0x7a6   :  { %v5888_v16 = vpop.f32.mrf.mxu1  ;;  %v6000_v43 = vpop.f32.mrf.mxu0 }
 0x7a7   :  { %v5286_v14 = vadd.f32 %v5998_v44, %v5125_v58  ;;  %v5889_v52 = vadd.f32 %v5888_v16, %v5887_v39  ;;  %v6001_v49 = vadd.f32 %v6000_v43, %v5999_v19 }
 0x7a8   :  { %v5890_v50 = vpop.f32.mrf.mxu1  ;;  %v6002_v31 = vpop.f32.mrf.mxu0 }
 0x7a9   :  { %5358 = vst [vmem:[#allocation19 + $0x90] sm:$0xff] %v5286_v14  ;;  %v5128_v33 = vadd.f32 %v5889_v52, %v7811_v46 }
 0x7aa   :  { %v5891_v28 = vpop.f32.mrf.mxu1  ;;  %v6003_v10 = vpop.f32.mrf.mxu0 }
 0x7ab   :  { %v5289_v55 = vadd.f32 %v6001_v49, %v5128_v33  ;;  %v5892_v34 = vadd.f32 %v5891_v28, %v5890_v50  ;;  %v6004_v42 = vadd.f32 %v6003_v10, %v6002_v31 }
 0x7ac   :  { %v5893_v25 = vpop.f32.mrf.mxu1  ;;  %v6005_v2 = vpop.f32.mrf.mxu0 }
 0x7ad   :  { %5359 = vst [vmem:[#allocation19 + $0x98] sm:$0xff] %v5289_v55  ;;  %v5133_v29 = vadd.f32 %v5892_v34, %v7811_v46 }
 0x7ae   :  { %v5894_v6 = vpop.f32.mrf.mxu1  ;;  %v6006_v21 = vpop.f32.mrf.mxu0 }
 0x7af   :  { %v5294_v32 = vadd.f32 %v6004_v42, %v5133_v29  ;;  %v5895_v53 = vadd.f32 %v5894_v6, %v5893_v25  ;;  %v6007_v9 = vadd.f32 %v6006_v21, %v6005_v2 }
 0x7b0   :  { %v5896_v3 = vpop.f32.mrf.mxu1  ;;  %v6008_v12 = vpop.f32.mrf.mxu0 }
 0x7b1   :  { %5360 = vst [vmem:[#allocation19 + $0xa0] sm:$0xff] %v5294_v32  ;;  %v5136_v30 = vadd.f32 %v5895_v53, %v7811_v46 }
 0x7b2   :  { %v5897_v11 = vpop.f32.mrf.mxu1  ;;  %v6009_v4 = vpop.f32.mrf.mxu0 }
 0x7b3   :  { %v5297_v15 = vadd.f32 %v6007_v9, %v5136_v30  ;;  %v5898_v61 = vadd.f32 %v5897_v11, %v5896_v3  ;;  %v6010_v51 = vadd.f32 %v6009_v4, %v6008_v12 }
 0x7b4   :  { %v5899_v26 = vpop.f32.mrf.mxu1  ;;  %v6011_v17 = vpop.f32.mrf.mxu0 }
 0x7b5   :  { %5361 = vst [vmem:[#allocation19 + $0xa8] sm:$0xff] %v5297_v15  ;;  %v5141_v20 = vadd.f32 %v5898_v61, %v7811_v46 }
 0x7b6   :  { %v5900_v5 = vpop.f32.mrf.mxu1  ;;  %v6012_v18 = vpop.f32.mrf.mxu0 }
 0x7b7   :  { %v5302_v59 = vadd.f32 %v6010_v51, %v5141_v20  ;;  %v5901_v48 = vadd.f32 %v5900_v5, %v5899_v26  ;;  %v6013_v23 = vadd.f32 %v6012_v18, %v6011_v17 }
 0x7b8   :  { %v5902_v47 = vpop.f32.mrf.mxu1  ;;  %v6014_v60 = vpop.f32.mrf.mxu0 }
 0x7b9   :  { %5362 = vst [vmem:[#allocation19 + $0xb0] sm:$0xff] %v5302_v59  ;;  %v5144_v0 = vadd.f32 %v5901_v48, %v7811_v46 }
 0x7ba   :  { %v5903_v57 = vpop.f32.mrf.mxu1  ;;  %v6015_v13 = vpop.f32.mrf.mxu0 }
 0x7bb   :  { %v5305_v35 = vadd.f32 %v6013_v23, %v5144_v0  ;;  %v5904_v56 = vadd.f32 %v5903_v57, %v5902_v47  ;;  %v6016_v36 = vadd.f32 %v6015_v13, %v6014_v60 }
 0x7bc   :  { %v5905_v22 = vpop.f32.mrf.mxu1  ;;  %v6017_v45 = vpop.f32.mrf.mxu0 }
 0x7bd   :  { %5363 = vst [vmem:[#allocation19 + $0xb8] sm:$0xff] %v5305_v35  ;;  %v5149_v41 = vadd.f32 %v5904_v56, %v7811_v46 }
 0x7be   :  { %v5906_v54 = vpop.f32.mrf.mxu1  ;;  %v6018_v24 = vpop.f32.mrf.mxu0 }
 0x7bf   :  { %v5310_v27 = vadd.f32 %v6016_v36, %v5149_v41  ;;  %v5907_v7 = vadd.f32 %v5906_v54, %v5905_v22  ;;  %v6019_v38 = vadd.f32 %v6018_v24, %v6017_v45 }
 0x7c0   :  { %v5908_v1 = vpop.f32.mrf.mxu1  ;;  %v6020_v62 = vpop.f32.mrf.mxu0 }
 0x7c1   :  { %5364 = vst [vmem:[#allocation19 + $0xc0] sm:$0xff] %v5310_v27  ;;  %v5152_v37 = vadd.f32 %v5907_v7, %v7811_v46 }
 0x7c2   :  { %v5909_v63 = vpop.f32.mrf.mxu1  ;;  %v6021_v8 = vpop.f32.mrf.mxu0 }
 0x7c3   :  { %v5313_v40 = vadd.f32 %v6019_v38, %v5152_v37  ;;  %v5910_v39 = vadd.f32 %v5909_v63, %v5908_v1  ;;  %v6022_v16 = vadd.f32 %v6021_v8, %v6020_v62 }
 0x7c4   :  { %v5911_v19 = vpop.f32.mrf.mxu1  ;;  %v6023_v58 = vpop.f32.mrf.mxu0 }
 0x7c5   :  { %5365 = vst [vmem:[#allocation19 + $0xc8] sm:$0xff] %v5313_v40  ;;  %v5157_v44 = vadd.f32 %v5910_v39, %v7811_v46 }
 0x7c6   :  { %v5912_v43 = vpop.f32.mrf.mxu1  ;;  %v6024_v14 = vpop.f32.mrf.mxu0 }
 0x7c7   :  { %v5318_v52 = vadd.f32 %v6022_v16, %v5157_v44  ;;  %v5913_v50 = vadd.f32 %v5912_v43, %v5911_v19  ;;  %v6025_v28 = vadd.f32 %v6024_v14, %v6023_v58 }
 0x7c8   :  { %v5914_v31 = vpop.f32.mrf.mxu1  ;;  %v6026_v33 = vpop.f32.mrf.mxu0 }
 0x7c9   :  { %5366 = vst [vmem:[#allocation19 + $0xd0] sm:$0xff] %v5318_v52  ;;  %v5160_v49 = vadd.f32 %v5913_v50, %v7811_v46 }
 0x7ca   :  { %v5915_v10 = vpop.f32.mrf.mxu1  ;;  %v6027_v55 = vpop.f32.mrf.mxu0 }
 0x7cb   :  { %v5321_v34 = vadd.f32 %v6025_v28, %v5160_v49  ;;  %v5916_v25 = vadd.f32 %v5915_v10, %v5914_v31  ;;  %v6028_v6 = vadd.f32 %v6027_v55, %v6026_v33 }
 0x7cc   :  { %v5917_v2 = vpop.f32.mrf.mxu1  ;;  %v6029_v29 = vpop.f32.mrf.mxu0 }
 0x7cd   :  { %5367 = vst [vmem:[#allocation19 + $0xd8] sm:$0xff] %v5321_v34  ;;  %v5165_v42 = vadd.f32 %v5916_v25, %v7811_v46 }
 0x7ce   :  { %v5918_v21 = vpop.f32.mrf.mxu1  ;;  %v6030_v32 = vpop.f32.mrf.mxu0 }
 0x7cf   :  { %v5326_v53 = vadd.f32 %v6028_v6, %v5165_v42  ;;  %v5919_v3 = vadd.f32 %v5918_v21, %v5917_v2  ;;  %v6031_v11 = vadd.f32 %v6030_v32, %v6029_v29 }
 0x7d0   :  { %v5920_v12 = vpop.f32.mrf.mxu1  ;;  %v6032_v30 = vpop.f32.mrf.mxu0 }
 0x7d1   :  { %5368 = vst [vmem:[#allocation19 + $0xe0] sm:$0xff] %v5326_v53  ;;  %v5168_v9 = vadd.f32 %v5919_v3, %v7811_v46 }
 0x7d2   :  { %v5921_v4 = vpop.f32.mrf.mxu1  ;;  %v6033_v15 = vpop.f32.mrf.mxu0 }
 0x7d3   :  { %v5329_v61 = vadd.f32 %v6031_v11, %v5168_v9  ;;  %v5922_v26 = vadd.f32 %v5921_v4, %v5920_v12  ;;  %v6034_v5 = vadd.f32 %v6033_v15, %v6032_v30 }
 0x7d4   :  { %v5923_v17 = vpop.f32.mrf.mxu1  ;;  %v6035_v20 = vpop.f32.mrf.mxu0 }
 0x7d5   :  { %5369 = vst [vmem:[#allocation19 + $0xe8] sm:$0xff] %v5329_v61  ;;  %v5173_v51 = vadd.f32 %v5922_v26, %v7811_v46 }
 0x7d6   :  { %v5924_v18 = vpop.f32.mrf.mxu1  ;;  %v6036_v59 = vpop.f32.mrf.mxu0 }
 0x7d7   :  { %v5334_v48 = vadd.f32 %v6034_v5, %v5173_v51  ;;  %v5925_v47 = vadd.f32 %v5924_v18, %v5923_v17  ;;  %v6037_v0 = vadd.f32 %v6036_v59, %v6035_v20 }
 0x7d9   :  { %5370 = vst [vmem:[#allocation19 + $0xf0] sm:$0xff] %v5334_v48  ;;  %v5176_v60 = vadd.f32 %v5925_v47, %v7811_v46 }
 0x7db   :  { %v5337_v23 = vadd.f32 %v6037_v0, %v5176_v60 }
 0x7dd   :  { %5371 = vst [vmem:[#allocation19 + $0xf8] sm:$0xff] %v5337_v23 }
 0x7de   :  { %6723 = shalt.err (!%p6720_p12)
}
 0x7df   :  { %5383 = dma.vmem_to_hbm [thread:$0]  %s5378_s27, 4096, %s7868_s17, [#allocation4], %s6750_s20, %s6750_s20, %s6751_s21  }
 0x7e0   :  { %6744 = dma.done.wait [#allocation4], 4096  }
 0x7e1   :  { %6745 = vsyncadd [#allocation4], 4294963200 }
 0x7e2   :  { %5387 = vsyncpa [#allocation3], 1 }
 0x7e3   :  { %5388 = vsyncpa [#allocation6], 1 }
 0x7e4   :  { %5389 = vsyncpa [#allocation9], 1 }
 0x7e5   :  { %5390 = vsyncpa [#allocation12], 1 }
 0x7e6   :  { %5391 = vsyncpa [#allocation15], 1 }
 0x7e7   :  { %5392 = vsyncpa [#allocation18], 1 }
 0x7e8   :  { %5393 = vsyncpa [#allocation4], 1 }

</bundles_post_ra>
